<compile_context>
chip_gen: v7x
topology: tpu7x:2x2x1
jax: 0.10.0
libtpu: 0.0.40
codegen_flags: <defaults>
</compile_context>

<pallas_src>
import functools

import jax
import jax.numpy as jnp
from jax.experimental import pallas as pl
from jax.experimental.pallas import tpu as pltpu


# ---------------------------------------------------------------------------
# Kernel
# ---------------------------------------------------------------------------
def _net3_kernel(x_ref, w1_ref, b1_ref, w2_ref, b2_ref, w3_ref, b3_ref, o_ref,
                 *, bblk, L, d, K, pad, compute_dtype, lane_dense_io):
    """Fused 3-layer Conv1d stack for one block of `bblk` batch elements.

    Working layout: every activation is a 2-D (rows, channels) tile with
    rows = (batch-in-block, time) stacked and channels on the lane axis, so each
    conv layer is ONE MXU matmul with M = bblk * L.

    x_ref  : (bblk, L*d) lane-dense signal rows        (or (bblk*L, d) fallback)
    wN_ref : (K*CinN, CoutN) im2col-folded weights (tap-major rows)
    bN_ref : (1, CoutN) biases
    o_ref  : (bblk, L*d) lane-dense output rows         (or (bblk*L, d) fallback)
    """
    rblk = bblk * L

    if lane_dense_io:
        # (bblk, L*d) signal rows -> (bblk*L, d) row-stacked, channels on lanes.
        x2d = x_ref[...].reshape(rblk, d)
    else:
        x2d = x_ref[...]

    # Per-row time index within its batch element; the per-shift validity masks
    # implement Conv1d "same" zero padding and keep taps from crossing
    # batch-element boundaries. Computed ONCE, reused by all three layers.
    if K > 1:
        t = jax.lax.broadcasted_iota(jnp.int32, (rblk, 1), 0) % L
        masks = {s: jnp.logical_and(t + s >= 0, t + s < L)
                 for s in range(-pad, K - pad) if s != 0}
    else:
        masks = {}

    def row_shift(h, s):
        # shifted[r] = h[(r + s) % rblk]; every row whose tap would cross a
        # batch-element boundary (including the wrap-around rows) is zeroed by
        # the caller's mask, so the rotation wrap never leaks into the result.
        k = s % rblk
        if k == 0:
            return h
        return jnp.concatenate([h[k:, :], h[:k, :]], axis=0)

    def conv_layer(h, w_ref, b_ref, relu):
        # Build the im2col matrix in registers (no VMEM scratch round trip):
        # one masked, row-shifted copy of h per tap, packed along the lane axis.
        taps = []
        for j in range(K):
            s = j - pad
            if s == 0:
                taps.append(h)
            else:
                taps.append(jnp.where(masks[s], row_shift(h, s), 0.0))
        xcol = taps[0] if K == 1 else jnp.concatenate(taps, axis=-1)
        acc = jnp.dot(xcol.astype(compute_dtype), w_ref[...],
                      preferred_element_type=jnp.float32)
        acc = acc + b_ref[...].astype(jnp.float32)
        return jnp.maximum(acc, 0.0) if relu else acc

    h1 = conv_layer(x2d, w1_ref, b1_ref, relu=True)    # convint + ReLU
    h2 = conv_layer(h1, w2_ref, b2_ref, relu=True)     # conv1   + ReLU
    y = conv_layer(h2, w3_ref, b3_ref, relu=False)     # convout

    if lane_dense_io:
        # (bblk*L, d) rows are the output signal in row-major order: write them
        # back as dense (bblk, L*d) lanes (PixelShuffle1D is free here).
        o_ref[...] = y.reshape(bblk, L * d).astype(o_ref.dtype)
    else:
        o_ref[...] = y.astype(o_ref.dtype)


# ---------------------------------------------------------------------------
# Wrapper helpers
# ---------------------------------------------------------------------------
def _tpu_device_kind():
    try:
        return jax.devices()[0].device_kind.lower()
    except Exception:
        return ""


def _num_parallel_tensorcores():
    # v7x-class chips expose 2 TensorCores (sharded via a "parallel" grid axis);
    # v5e/v6e have a single TensorCore, where more grid steps only add overhead.
    kind = _tpu_device_kind()
    return 2 if ("v7" in kind or "7x" in kind) else 1


def _vmem_capacity_bytes():
    try:
        return int(pltpu.get_tpu_info().vmem_capacity_bytes)
    except Exception:
        return 128 << 20


def _choose_batch_block(batch, rows_per_elem, num_cores, target_rows=2048):
    """Largest batch block whose stacked rows stay within `target_rows`.

    Constraints: bblk*L must be a multiple of 8 (f32 sublane tiling) and bblk
    must be a multiple of 8 or the whole batch (lane-dense second-minor block
    dim). On multi-TC chips prefer a block keeping the grid length a multiple
    of the core count; on single-TC chips prefer one maximal step (grid=(1,)).
    """
    def ok(b):
        return (batch % b == 0 and (b * rows_per_elem) % 8 == 0
                and (b % 8 == 0 or b == batch))

    cand = [b for b in range(1, batch + 1)
            if ok(b) and b * rows_per_elem <= target_rows]
    if not cand:
        cand = [b for b in range(1, batch + 1) if ok(b)]
    if not cand:
        return 1
    if num_cores > 1:
        balanced = [b for b in cand
                    if (batch // b) >= num_cores and (batch // b) % num_cores == 0]
        if balanced:
            return max(balanced)
    return max(cand)


# ---------------------------------------------------------------------------
# Forward pass
# ---------------------------------------------------------------------------
def network3_forward(x, params, *, downsample, kernel, batch_block=None,
                     compute_dtype=jnp.float32, lane_dense_io=True):
    """x: (B, 1, signal_len) float32, NCL like the PyTorch module.

    compute_dtype=jnp.bfloat16 gives faster MXU matmuls on v6e/v7x (accumulation
    stays float32); the float32 default matches the reference exactly.
    """
    B, C, sig_len = x.shape
    assert C == 1, "Network3 expects a single input channel"
    d = downsample
    assert sig_len % d == 0
    L = sig_len // d
    K = kernel
    pad = K // 2

    w1, b1, w2, b2, w3, b3 = params            # wN: (K, Cin, Cout), bN: (1, Cout)
    C1, C2, Cout = w1.shape[-1], w2.shape[-1], w3.shape[-1]
    assert Cout == d

    bblk = (batch_block if batch_block is not None
            else _choose_batch_block(B, L, _num_parallel_tensorcores()))
    assert B % bblk == 0
    rblk = bblk * L
    assert rblk % 8 == 0, \
        "batch_block * (signal_len // downsample) must be a multiple of 8"
    grid = (B // bblk,)

    # Fold the K taps into the contraction dimension (im2col weights, tap-major);
    # store them directly in the compute dtype.
    w1f = w1.reshape(K * d, C1).astype(compute_dtype)
    w2f = w2.reshape(K * C1, C2).astype(compute_dtype)
    w3f = w3.reshape(K * C2, Cout).astype(compute_dtype)
    b1f = b1.astype(jnp.float32)
    b2f = b2.astype(jnp.float32)
    b3f = b3.astype(jnp.float32)

    # TODO(synk): for very long signals add a time-blocked grid axis with a
    # `pad`-row halo so block size stays bounded on v7x's 64 MiB VMEM.

    # Advisory cost estimate for XLA's scheduler.
    rows = B * L
    flops = 2 * rows * K * (d * C1 + C1 * C2 + C2 * Cout)
    wbytes = sum(int(a.size) * a.dtype.itemsize
                 for a in (w1f, w2f, w3f, b1f, b2f, b3f))
    io_bytes = 2 * B * sig_len * x.dtype.itemsize
    cost = pl.CostEstimate(flops=int(flops), transcendentals=0,
                           bytes_accessed=int(io_bytes + wbytes))

    # Scoped-VMEM budget: double-buffered in/out blocks + resident weights +
    # the in-register/spilled activation working set, with generous slack, but
    # always leaving headroom below the chip's physical VMEM capacity.
    cmax = max(d, C1, C2)
    est = (2 * 2 * bblk * sig_len * 4
           + 2 * wbytes
           + rblk * (K + 2) * cmax * 4)
    cap = _vmem_capacity_bytes()
    vmem_limit = int(min(max(4 * est + (4 << 20), 16 << 20), cap - (8 << 20)))

    def run(lane_dense):
        if lane_dense:
            x_in = x.reshape(B, sig_len)                       # free reshape
            in_spec0 = pl.BlockSpec((bblk, sig_len), lambda i: (i, 0))
            out_spec = pl.BlockSpec((bblk, sig_len), lambda i: (i, 0))
            out_shape = jax.ShapeDtypeStruct((B, sig_len), jnp.float32)
        else:
            x_in = x.reshape(B * L, d)                         # free reshape
            in_spec0 = pl.BlockSpec((rblk, d), lambda i: (i, 0))
            out_spec = pl.BlockSpec((rblk, d), lambda i: (i, 0))
            out_shape = jax.ShapeDtypeStruct((B * L, d), jnp.float32)

        kernel_fn = functools.partial(
            _net3_kernel, bblk=bblk, L=L, d=d, K=K, pad=pad,
            compute_dtype=compute_dtype, lane_dense_io=lane_dense)

        out = pl.pallas_call(
            kernel_fn,
            out_shape=out_shape,
            grid_spec=pltpu.PrefetchScalarGridSpec(
                num_scalar_prefetch=0,
                grid=grid,
                in_specs=[
                    in_spec0,
                    pl.BlockSpec(w1f.shape, lambda i: (0, 0)),
                    pl.BlockSpec(b1f.shape, lambda i: (0, 0)),
                    pl.BlockSpec(w2f.shape, lambda i: (0, 0)),
                    pl.BlockSpec(b2f.shape, lambda i: (0, 0)),
                    pl.BlockSpec(w3f.shape, lambda i: (0, 0)),
                    pl.BlockSpec(b3f.shape, lambda i: (0, 0)),
                ],
                out_specs=out_spec,
            ),
            compiler_params=pltpu.CompilerParams(
                dimension_semantics=("parallel",),
                vmem_limit_bytes=vmem_limit),
            cost_estimate=cost,
        )(x_in, w1f, b1f, w2f, b2f, w3f, b3f)
        # PixelShuffle1D (C == 1): the rows are already the output signal in
        # row-major order, so this final reshape is free (no data movement).
        return out.reshape(B, 1, sig_len)

    if lane_dense_io:
        try:
            return run(True)
        except Exception:
            # Fallback: if the toolchain rejects the in-kernel lane<->channel
            # relayout reshape, use the row-layout I/O path (no in-kernel
            # reshape, slightly lane-sparse DMAs).
            return run(False)
    return run(False)


# ----------------------------- reference (pure JAX) --------------------------
def _conv1d_ref(x_ncl, w_oik, b, pad):
    y = jax.lax.conv_general_dilated(
        x_ncl, w_oik, window_strides=(1,), padding=[(pad, pad)],
        dimension_numbers=('NCH', 'OIH', 'NCH'))
    return y + b[None, :, None]


def network3_ref(x, params, *, downsample, kernel):
    B, _, sig_len = x.shape
    d = downsample
    L = sig_len // d
    pad = kernel // 2
    w1, b1, w2, b2, w3, b3 = params
    w1_oik = jnp.transpose(w1, (2, 1, 0))
    w2_oik = jnp.transpose(w2, (2, 1, 0))
    w3_oik = jnp.transpose(w3, (2, 1, 0))
    # PixelUnshuffle1D -> (B, d, L)
    h = x.reshape(B, L, d).transpose(0, 2, 1)
    h = jnp.maximum(_conv1d_ref(h, w1_oik, b1.reshape(-1), pad), 0.0)
    h = jnp.maximum(_conv1d_ref(h, w2_oik, b2.reshape(-1), pad), 0.0)
    h = _conv1d_ref(h, w3_oik, b3.reshape(-1), pad)
    # PixelShuffle1D -> (B, 1, sig_len)
    return h.transpose(0, 2, 1).reshape(B, 1, sig_len)


# ----------------------------- parameter init -------------------------------
def init_params(key, *, downsample, channeln, kernel):
    """Deterministic init; weight layout (K, Cin, Cout), bias (1, Cout)."""
    def conv_init(k, cin, cout):
        kw, kb = jax.random.split(k)
        bound = 1.0 / jnp.sqrt(cin * kernel)
        w = jax.random.uniform(kw, (kernel, cin, cout), jnp.float32,
                               minval=-bound, maxval=bound)
        b = jax.random.uniform(kb, (1, cout), jnp.float32,
                               minval=-bound, maxval=bound)
        return w, b

    k1, k2, k3 = jax.random.split(key, 3)
    w1, b1 = conv_init(k1, downsample, channeln)   # convint
    w2, b2 = conv_init(k2, channeln, channeln)     # conv1
    w3, b3 = conv_init(k3, channeln, downsample)   # convout
    return (w1, b1, w2, b2, w3, b3)


if __name__ == "__main__":
    downsample = 4
    signal_len = 128
    kerneln = 3
    channeln = 32
    batch = 8

    key = jax.random.PRNGKey(0)
    kx, kp = jax.random.split(key)
    x = jax.random.normal(kx, (batch, 1, signal_len), jnp.float32)
    params = init_params(kp, downsample=downsample, channeln=channeln,
                         kernel=kerneln)

    y = network3_forward(x, params, downsample=downsample, kernel=kerneln)
    y = jax.block_until_ready(y)

    y_ref = network3_ref(x, params, downsample=downsample, kernel=kerneln)
    assert y.shape == (batch, 1, signal_len)
    err = float(jnp.max(jnp.abs(y - y_ref)))
    assert jnp.allclose(y, y_ref, rtol=1e-4, atol=1e-4), err

    print("KERNEL_OK")
</pallas_src>

<mosaic_0001>
module attributes {stable_mosaic.version = 11 : i64} {
  func.func @_net3_kernel(%arg0: i32, %arg1: memref<8x128xf32, #tpu.memory_space<vmem>>, %arg2: memref<12x32xf32, #tpu.memory_space<vmem>>, %arg3: memref<1x32xf32, #tpu.memory_space<vmem>>, %arg4: memref<96x32xf32, #tpu.memory_space<vmem>>, %arg5: memref<1x32xf32, #tpu.memory_space<vmem>>, %arg6: memref<96x4xf32, #tpu.memory_space<vmem>>, %arg7: memref<1x4xf32, #tpu.memory_space<vmem>>, %arg8: memref<8x128xf32, #tpu.memory_space<vmem>>) attributes {dimension_semantics = [#tpu.dimension_semantics<parallel>], iteration_bounds = array<i64: 1>, scalar_prefetch = 0 : i64, scratch_operands = 0 : i64, tpu.core_type = #tpu.core_type<tc>, window_params = [{transform_indices = @transform_0, window_bounds = array<i64: 8, 128>}, {pipeline_mode = #tpu.pipeline_mode<synchronous>, transform_indices = @transform_1, window_bounds = array<i64: 12, 32>}, {pipeline_mode = #tpu.pipeline_mode<synchronous>, transform_indices = @transform_2, window_bounds = array<i64: 1, 32>}, {pipeline_mode = #tpu.pipeline_mode<synchronous>, transform_indices = @transform_3, window_bounds = array<i64: 96, 32>}, {pipeline_mode = #tpu.pipeline_mode<synchronous>, transform_indices = @transform_4, window_bounds = array<i64: 1, 32>}, {pipeline_mode = #tpu.pipeline_mode<synchronous>, transform_indices = @transform_5, window_bounds = array<i64: 96, 4>}, {pipeline_mode = #tpu.pipeline_mode<synchronous>, transform_indices = @transform_6, window_bounds = array<i64: 1, 4>}, {transform_indices = @transform_7, window_bounds = array<i64: 8, 128>}]} {
    %c0 = arith.constant 0 : index
    %c0_0 = arith.constant 0 : index
    %0 = vector.load %arg1[%c0, %c0_0] : memref<8x128xf32, #tpu.memory_space<vmem>>, vector<8x128xf32>
    %1 = vector.shape_cast %0 : vector<8x128xf32> to vector<256x4xf32>
    %2 = tpu.iota {dimensions = array<i32: 0>} : vector<256x1xi32>
    %c32_i32 = arith.constant 32 : i32
    %c0_i32 = arith.constant 0 : i32
    %3 = arith.cmpi eq, %c32_i32, %c0_i32 : i32
    %c1_i32 = arith.constant 1 : i32
    %4 = arith.select %3, %c1_i32, %c32_i32 : i32
    %5 = vector.broadcast %4 : i32 to vector<256x1xi32>
    %6 = arith.remsi %2, %5 : vector<256x1xi32>
    %c0_i32_1 = arith.constant 0 : i32
    %7 = vector.broadcast %c0_i32_1 : i32 to vector<256x1xi32>
    %8 = arith.cmpi ne, %6, %7 : vector<256x1xi32>
    %c0_i32_2 = arith.constant 0 : i32
    %9 = vector.broadcast %c0_i32_2 : i32 to vector<256x1xi32>
    %10 = arith.cmpi slt, %6, %9 : vector<256x1xi32>
    %c0_i32_3 = arith.constant 0 : i32
    %11 = arith.cmpi slt, %4, %c0_i32_3 : i32
    %12 = vector.broadcast %11 : i1 to vector<256x1xi1>
    %13 = vector.broadcast %12 : vector<256x1xi1> to vector<256x1xi1>
    %14 = arith.xori %10, %13 : vector<256x1xi1>
    %15 = arith.andi %14, %8 : vector<256x1xi1>
    %16 = vector.broadcast %4 : i32 to vector<256x1xi32>
    %17 = arith.addi %6, %16 : vector<256x1xi32>
    %18 = arith.select %15, %17, %6 : vector<256x1xi1>, vector<256x1xi32>
    %c-1_i32 = arith.constant -1 : i32
    %19 = vector.broadcast %c-1_i32 : i32 to vector<256x1xi32>
    %20 = arith.addi %18, %19 : vector<256x1xi32>
    %c0_i32_4 = arith.constant 0 : i32
    %21 = vector.broadcast %c0_i32_4 : i32 to vector<256x1xi32>
    %22 = arith.cmpi sge, %20, %21 : vector<256x1xi32>
    %c-1_i32_5 = arith.constant -1 : i32
    %23 = vector.broadcast %c-1_i32_5 : i32 to vector<256x1xi32>
    %24 = arith.addi %18, %23 : vector<256x1xi32>
    %c32_i32_6 = arith.constant 32 : i32
    %25 = vector.broadcast %c32_i32_6 : i32 to vector<256x1xi32>
    %26 = arith.cmpi slt, %24, %25 : vector<256x1xi32>
    %27 = arith.andi %22, %26 : vector<256x1xi1>
    %c1_i32_7 = arith.constant 1 : i32
    %28 = vector.broadcast %c1_i32_7 : i32 to vector<256x1xi32>
    %29 = arith.addi %18, %28 : vector<256x1xi32>
    %c0_i32_8 = arith.constant 0 : i32
    %30 = vector.broadcast %c0_i32_8 : i32 to vector<256x1xi32>
    %31 = arith.cmpi sge, %29, %30 : vector<256x1xi32>
    %c1_i32_9 = arith.constant 1 : i32
    %32 = vector.broadcast %c1_i32_9 : i32 to vector<256x1xi32>
    %33 = arith.addi %18, %32 : vector<256x1xi32>
    %c32_i32_10 = arith.constant 32 : i32
    %34 = vector.broadcast %c32_i32_10 : i32 to vector<256x1xi32>
    %35 = arith.cmpi slt, %33, %34 : vector<256x1xi32>
    %36 = arith.andi %31, %35 : vector<256x1xi1>
    %37 = vector.extract_strided_slice %1 {offsets = [255, 0], sizes = [1, 4], strides = [1, 1]} : vector<256x4xf32> to vector<1x4xf32>
    %38 = vector.extract_strided_slice %1 {offsets = [0, 0], sizes = [255, 4], strides = [1, 1]} : vector<256x4xf32> to vector<255x4xf32>
    %39 = tpu.concatenate %37, %38 in 0 : vector<1x4xf32>, vector<255x4xf32> -> vector<256x4xf32>
    %cst = arith.constant 0.000000e+00 : f32
    %40 = vector.shape_cast %27 : vector<256x1xi1> to vector<256x1xi1>
    %41 = vector.broadcast %40 : vector<256x1xi1> to vector<256x4xi1>
    %42 = vector.broadcast %cst : f32 to vector<256x4xf32>
    %43 = arith.select %41, %39, %42 : vector<256x4xi1>, vector<256x4xf32>
    %44 = vector.extract_strided_slice %1 {offsets = [1, 0], sizes = [255, 4], strides = [1, 1]} : vector<256x4xf32> to vector<255x4xf32>
    %45 = vector.extract_strided_slice %1 {offsets = [0, 0], sizes = [1, 4], strides = [1, 1]} : vector<256x4xf32> to vector<1x4xf32>
    %46 = tpu.concatenate %44, %45 in 0 : vector<255x4xf32>, vector<1x4xf32> -> vector<256x4xf32>
    %cst_11 = arith.constant 0.000000e+00 : f32
    %47 = vector.shape_cast %36 : vector<256x1xi1> to vector<256x1xi1>
    %48 = vector.broadcast %47 : vector<256x1xi1> to vector<256x4xi1>
    %49 = vector.broadcast %cst_11 : f32 to vector<256x4xf32>
    %50 = arith.select %48, %46, %49 : vector<256x4xi1>, vector<256x4xf32>
    %51 = tpu.concatenate %43, %1, %50 in 1 : vector<256x4xf32>, vector<256x4xf32>, vector<256x4xf32> -> vector<256x12xf32>
    %c0_12 = arith.constant 0 : index
    %c0_13 = arith.constant 0 : index
    %52 = vector.load %arg2[%c0_12, %c0_13] : memref<12x32xf32, #tpu.memory_space<vmem>>, vector<12x32xf32>
    %cst_14 = arith.constant dense<0.000000e+00> : vector<256x32xf32>
    %53 = tpu.matmul %51, %52, %cst_14 {dimension_numbers = #tpu.dot_dimension_numbers<[1], [0], [0], [1], [0, 0, 1, 1], [], []>} : vector<256x12xf32>, vector<12x32xf32>, vector<256x32xf32> -> vector<256x32xf32>
    %c0_15 = arith.constant 0 : index
    %c0_16 = arith.constant 0 : index
    %54 = vector.load %arg3[%c0_15, %c0_16] : memref<1x32xf32, #tpu.memory_space<vmem>>, vector<1x32xf32>
    %55 = vector.broadcast %54 : vector<1x32xf32> to vector<256x32xf32>
    %56 = arith.addf %53, %55 : vector<256x32xf32>
    %cst_17 = arith.constant 0.000000e+00 : f32
    %57 = vector.broadcast %cst_17 : f32 to vector<256x32xf32>
    %58 = arith.maximumf %56, %57 : vector<256x32xf32>
    %59 = vector.extract_strided_slice %58 {offsets = [255, 0], sizes = [1, 32], strides = [1, 1]} : vector<256x32xf32> to vector<1x32xf32>
    %60 = vector.extract_strided_slice %58 {offsets = [0, 0], sizes = [255, 32], strides = [1, 1]} : vector<256x32xf32> to vector<255x32xf32>
    %61 = tpu.concatenate %59, %60 in 0 : vector<1x32xf32>, vector<255x32xf32> -> vector<256x32xf32>
    %cst_18 = arith.constant 0.000000e+00 : f32
    %62 = vector.shape_cast %27 : vector<256x1xi1> to vector<256x1xi1>
    %63 = vector.broadcast %62 : vector<256x1xi1> to vector<256x32xi1>
    %64 = vector.broadcast %cst_18 : f32 to vector<256x32xf32>
    %65 = arith.select %63, %61, %64 : vector<256x32xi1>, vector<256x32xf32>
    %66 = vector.extract_strided_slice %58 {offsets = [1, 0], sizes = [255, 32], strides = [1, 1]} : vector<256x32xf32> to vector<255x32xf32>
    %67 = vector.extract_strided_slice %58 {offsets = [0, 0], sizes = [1, 32], strides = [1, 1]} : vector<256x32xf32> to vector<1x32xf32>
    %68 = tpu.concatenate %66, %67 in 0 : vector<255x32xf32>, vector<1x32xf32> -> vector<256x32xf32>
    %cst_19 = arith.constant 0.000000e+00 : f32
    %69 = vector.shape_cast %36 : vector<256x1xi1> to vector<256x1xi1>
    %70 = vector.broadcast %69 : vector<256x1xi1> to vector<256x32xi1>
    %71 = vector.broadcast %cst_19 : f32 to vector<256x32xf32>
    %72 = arith.select %70, %68, %71 : vector<256x32xi1>, vector<256x32xf32>
    %73 = tpu.concatenate %65, %58, %72 in 1 : vector<256x32xf32>, vector<256x32xf32>, vector<256x32xf32> -> vector<256x96xf32>
    %c0_20 = arith.constant 0 : index
    %c0_21 = arith.constant 0 : index
    %74 = vector.load %arg4[%c0_20, %c0_21] : memref<96x32xf32, #tpu.memory_space<vmem>>, vector<96x32xf32>
    %cst_22 = arith.constant dense<0.000000e+00> : vector<256x32xf32>
    %75 = tpu.matmul %73, %74, %cst_22 {dimension_numbers = #tpu.dot_dimension_numbers<[1], [0], [0], [1], [0, 0, 1, 1], [], []>} : vector<256x96xf32>, vector<96x32xf32>, vector<256x32xf32> -> vector<256x32xf32>
    %c0_23 = arith.constant 0 : index
    %c0_24 = arith.constant 0 : index
    %76 = vector.load %arg5[%c0_23, %c0_24] : memref<1x32xf32, #tpu.memory_space<vmem>>, vector<1x32xf32>
    %77 = vector.broadcast %76 : vector<1x32xf32> to vector<256x32xf32>
    %78 = arith.addf %75, %77 : vector<256x32xf32>
    %cst_25 = arith.constant 0.000000e+00 : f32
    %79 = vector.broadcast %cst_25 : f32 to vector<256x32xf32>
    %80 = arith.maximumf %78, %79 : vector<256x32xf32>
    %81 = vector.extract_strided_slice %80 {offsets = [255, 0], sizes = [1, 32], strides = [1, 1]} : vector<256x32xf32> to vector<1x32xf32>
    %82 = vector.extract_strided_slice %80 {offsets = [0, 0], sizes = [255, 32], strides = [1, 1]} : vector<256x32xf32> to vector<255x32xf32>
    %83 = tpu.concatenate %81, %82 in 0 : vector<1x32xf32>, vector<255x32xf32> -> vector<256x32xf32>
    %cst_26 = arith.constant 0.000000e+00 : f32
    %84 = vector.shape_cast %27 : vector<256x1xi1> to vector<256x1xi1>
    %85 = vector.broadcast %84 : vector<256x1xi1> to vector<256x32xi1>
    %86 = vector.broadcast %cst_26 : f32 to vector<256x32xf32>
    %87 = arith.select %85, %83, %86 : vector<256x32xi1>, vector<256x32xf32>
    %88 = vector.extract_strided_slice %80 {offsets = [1, 0], sizes = [255, 32], strides = [1, 1]} : vector<256x32xf32> to vector<255x32xf32>
    %89 = vector.extract_strided_slice %80 {offsets = [0, 0], sizes = [1, 32], strides = [1, 1]} : vector<256x32xf32> to vector<1x32xf32>
    %90 = tpu.concatenate %88, %89 in 0 : vector<255x32xf32>, vector<1x32xf32> -> vector<256x32xf32>
    %cst_27 = arith.constant 0.000000e+00 : f32
    %91 = vector.shape_cast %36 : vector<256x1xi1> to vector<256x1xi1>
    %92 = vector.broadcast %91 : vector<256x1xi1> to vector<256x32xi1>
    %93 = vector.broadcast %cst_27 : f32 to vector<256x32xf32>
    %94 = arith.select %92, %90, %93 : vector<256x32xi1>, vector<256x32xf32>
    %95 = tpu.concatenate %87, %80, %94 in 1 : vector<256x32xf32>, vector<256x32xf32>, vector<256x32xf32> -> vector<256x96xf32>
    %c0_28 = arith.constant 0 : index
    %c0_29 = arith.constant 0 : index
    %96 = vector.load %arg6[%c0_28, %c0_29] : memref<96x4xf32, #tpu.memory_space<vmem>>, vector<96x4xf32>
    %cst_30 = arith.constant dense<0.000000e+00> : vector<256x4xf32>
    %97 = tpu.matmul %95, %96, %cst_30 {dimension_numbers = #tpu.dot_dimension_numbers<[1], [0], [0], [1], [0, 0, 1, 1], [], []>} : vector<256x96xf32>, vector<96x4xf32>, vector<256x4xf32> -> vector<256x4xf32>
    %c0_31 = arith.constant 0 : index
    %c0_32 = arith.constant 0 : index
    %98 = vector.load %arg7[%c0_31, %c0_32] : memref<1x4xf32, #tpu.memory_space<vmem>>, vector<1x4xf32>
    %99 = vector.broadcast %98 : vector<1x4xf32> to vector<256x4xf32>
    %100 = arith.addf %97, %99 : vector<256x4xf32>
    %101 = vector.shape_cast %100 : vector<256x4xf32> to vector<8x128xf32>
    %c0_33 = arith.constant 0 : index
    %c0_34 = arith.constant 0 : index
    %102 = vector.load %arg8[%c0_33, %c0_34] : memref<8x128xf32, #tpu.memory_space<vmem>>, vector<8x128xf32>
    tpu.vector_store %arg8[%c0_33, %c0_34], %101 {strides = array<i32>} : memref<8x128xf32, #tpu.memory_space<vmem>>, vector<8x128xf32>,
    return
  }
  func.func @transform_0(%arg0: i32) -> (i32, i32) {
    %c0_i32 = arith.constant 0 : i32
    %c0_i32_0 = arith.constant 0 : i32
    return %arg0, %c0_i32 : i32, i32
  }
  func.func @transform_1(%arg0: i32) -> (i32, i32) {
    %c0_i32 = arith.constant 0 : i32
    %c0_i32_0 = arith.constant 0 : i32
    %c0_i32_1 = arith.constant 0 : i32
    return %c0_i32, %c0_i32_0 : i32, i32
  }
  func.func @transform_2(%arg0: i32) -> (i32, i32) {
    %c0_i32 = arith.constant 0 : i32
    %c0_i32_0 = arith.constant 0 : i32
    %c0_i32_1 = arith.constant 0 : i32
    return %c0_i32, %c0_i32_0 : i32, i32
  }
  func.func @transform_3(%arg0: i32) -> (i32, i32) {
    %c0_i32 = arith.constant 0 : i32
    %c0_i32_0 = arith.constant 0 : i32
    %c0_i32_1 = arith.constant 0 : i32
    return %c0_i32, %c0_i32_0 : i32, i32
  }
  func.func @transform_4(%arg0: i32) -> (i32, i32) {
    %c0_i32 = arith.constant 0 : i32
    %c0_i32_0 = arith.constant 0 : i32
    %c0_i32_1 = arith.constant 0 : i32
    return %c0_i32, %c0_i32_0 : i32, i32
  }
  func.func @transform_5(%arg0: i32) -> (i32, i32) {
    %c0_i32 = arith.constant 0 : i32
    %c0_i32_0 = arith.constant 0 : i32
    %c0_i32_1 = arith.constant 0 : i32
    return %c0_i32, %c0_i32_0 : i32, i32
  }
  func.func @transform_6(%arg0: i32) -> (i32, i32) {
    %c0_i32 = arith.constant 0 : i32
    %c0_i32_0 = arith.constant 0 : i32
    %c0_i32_1 = arith.constant 0 : i32
    return %c0_i32, %c0_i32_0 : i32, i32
  }
  func.func @transform_7(%arg0: i32) -> (i32, i32) {
    %c0_i32 = arith.constant 0 : i32
    %c0_i32_0 = arith.constant 0 : i32
    return %arg0, %c0_i32 : i32, i32
  }
}

module attributes {stable_mosaic.version = 11 : i64} {
  func.func @_net3_kernel(%arg0: i32, %arg1: memref<256x4xf32, #tpu.memory_space<vmem>>, %arg2: memref<12x32xf32, #tpu.memory_space<vmem>>, %arg3: memref<1x32xf32, #tpu.memory_space<vmem>>, %arg4: memref<96x32xf32, #tpu.memory_space<vmem>>, %arg5: memref<1x32xf32, #tpu.memory_space<vmem>>, %arg6: memref<96x4xf32, #tpu.memory_space<vmem>>, %arg7: memref<1x4xf32, #tpu.memory_space<vmem>>, %arg8: memref<256x4xf32, #tpu.memory_space<vmem>>) attributes {dimension_semantics = [#tpu.dimension_semantics<parallel>], iteration_bounds = array<i64: 1>, scalar_prefetch = 0 : i64, scratch_operands = 0 : i64, tpu.core_type = #tpu.core_type<tc>, window_params = [{transform_indices = @transform_0, window_bounds = array<i64: 256, 4>}, {pipeline_mode = #tpu.pipeline_mode<synchronous>, transform_indices = @transform_1, window_bounds = array<i64: 12, 32>}, {pipeline_mode = #tpu.pipeline_mode<synchronous>, transform_indices = @transform_2, window_bounds = array<i64: 1, 32>}, {pipeline_mode = #tpu.pipeline_mode<synchronous>, transform_indices = @transform_3, window_bounds = array<i64: 96, 32>}, {pipeline_mode = #tpu.pipeline_mode<synchronous>, transform_indices = @transform_4, window_bounds = array<i64: 1, 32>}, {pipeline_mode = #tpu.pipeline_mode<synchronous>, transform_indices = @transform_5, window_bounds = array<i64: 96, 4>}, {pipeline_mode = #tpu.pipeline_mode<synchronous>, transform_indices = @transform_6, window_bounds = array<i64: 1, 4>}, {transform_indices = @transform_7, window_bounds = array<i64: 256, 4>}]} {
    %c0 = arith.constant 0 : index
    %c0_0 = arith.constant 0 : index
    %0 = vector.load %arg1[%c0, %c0_0] : memref<256x4xf32, #tpu.memory_space<vmem>>, vector<256x4xf32>
    %1 = tpu.iota {dimensions = array<i32: 0>} : vector<256x1xi32>
    %c32_i32 = arith.constant 32 : i32
    %c0_i32 = arith.constant 0 : i32
    %2 = arith.cmpi eq, %c32_i32, %c0_i32 : i32
    %c1_i32 = arith.constant 1 : i32
    %3 = arith.select %2, %c1_i32, %c32_i32 : i32
    %4 = vector.broadcast %3 : i32 to vector<256x1xi32>
    %5 = arith.remsi %1, %4 : vector<256x1xi32>
    %c0_i32_1 = arith.constant 0 : i32
    %6 = vector.broadcast %c0_i32_1 : i32 to vector<256x1xi32>
    %7 = arith.cmpi ne, %5, %6 : vector<256x1xi32>
    %c0_i32_2 = arith.constant 0 : i32
    %8 = vector.broadcast %c0_i32_2 : i32 to vector<256x1xi32>
    %9 = arith.cmpi slt, %5, %8 : vector<256x1xi32>
    %c0_i32_3 = arith.constant 0 : i32
    %10 = arith.cmpi slt, %3, %c0_i32_3 : i32
    %11 = vector.broadcast %10 : i1 to vector<256x1xi1>
    %12 = vector.broadcast %11 : vector<256x1xi1> to vector<256x1xi1>
    %13 = arith.xori %9, %12 : vector<256x1xi1>
    %14 = arith.andi %13, %7 : vector<256x1xi1>
    %15 = vector.broadcast %3 : i32 to vector<256x1xi32>
    %16 = arith.addi %5, %15 : vector<256x1xi32>
    %17 = arith.select %14, %16, %5 : vector<256x1xi1>, vector<256x1xi32>
    %c-1_i32 = arith.constant -1 : i32
    %18 = vector.broadcast %c-1_i32 : i32 to vector<256x1xi32>
    %19 = arith.addi %17, %18 : vector<256x1xi32>
    %c0_i32_4 = arith.constant 0 : i32
    %20 = vector.broadcast %c0_i32_4 : i32 to vector<256x1xi32>
    %21 = arith.cmpi sge, %19, %20 : vector<256x1xi32>
    %c-1_i32_5 = arith.constant -1 : i32
    %22 = vector.broadcast %c-1_i32_5 : i32 to vector<256x1xi32>
    %23 = arith.addi %17, %22 : vector<256x1xi32>
    %c32_i32_6 = arith.constant 32 : i32
    %24 = vector.broadcast %c32_i32_6 : i32 to vector<256x1xi32>
    %25 = arith.cmpi slt, %23, %24 : vector<256x1xi32>
    %26 = arith.andi %21, %25 : vector<256x1xi1>
    %c1_i32_7 = arith.constant 1 : i32
    %27 = vector.broadcast %c1_i32_7 : i32 to vector<256x1xi32>
    %28 = arith.addi %17, %27 : vector<256x1xi32>
    %c0_i32_8 = arith.constant 0 : i32
    %29 = vector.broadcast %c0_i32_8 : i32 to vector<256x1xi32>
    %30 = arith.cmpi sge, %28, %29 : vector<256x1xi32>
    %c1_i32_9 = arith.constant 1 : i32
    %31 = vector.broadcast %c1_i32_9 : i32 to vector<256x1xi32>
    %32 = arith.addi %17, %31 : vector<256x1xi32>
    %c32_i32_10 = arith.constant 32 : i32
    %33 = vector.broadcast %c32_i32_10 : i32 to vector<256x1xi32>
    %34 = arith.cmpi slt, %32, %33 : vector<256x1xi32>
    %35 = arith.andi %30, %34 : vector<256x1xi1>
    %36 = vector.extract_strided_slice %0 {offsets = [255, 0], sizes = [1, 4], strides = [1, 1]} : vector<256x4xf32> to vector<1x4xf32>
    %37 = vector.extract_strided_slice %0 {offsets = [0, 0], sizes = [255, 4], strides = [1, 1]} : vector<256x4xf32> to vector<255x4xf32>
    %38 = tpu.concatenate %36, %37 in 0 : vector<1x4xf32>, vector<255x4xf32> -> vector<256x4xf32>
    %cst = arith.constant 0.000000e+00 : f32
    %39 = vector.shape_cast %26 : vector<256x1xi1> to vector<256x1xi1>
    %40 = vector.broadcast %39 : vector<256x1xi1> to vector<256x4xi1>
    %41 = vector.broadcast %cst : f32 to vector<256x4xf32>
    %42 = arith.select %40, %38, %41 : vector<256x4xi1>, vector<256x4xf32>
    %43 = vector.extract_strided_slice %0 {offsets = [1, 0], sizes = [255, 4], strides = [1, 1]} : vector<256x4xf32> to vector<255x4xf32>
    %44 = vector.extract_strided_slice %0 {offsets = [0, 0], sizes = [1, 4], strides = [1, 1]} : vector<256x4xf32> to vector<1x4xf32>
    %45 = tpu.concatenate %43, %44 in 0 : vector<255x4xf32>, vector<1x4xf32> -> vector<256x4xf32>
    %cst_11 = arith.constant 0.000000e+00 : f32
    %46 = vector.shape_cast %35 : vector<256x1xi1> to vector<256x1xi1>
    %47 = vector.broadcast %46 : vector<256x1xi1> to vector<256x4xi1>
    %48 = vector.broadcast %cst_11 : f32 to vector<256x4xf32>
    %49 = arith.select %47, %45, %48 : vector<256x4xi1>, vector<256x4xf32>
    %50 = tpu.concatenate %42, %0, %49 in 1 : vector<256x4xf32>, vector<256x4xf32>, vector<256x4xf32> -> vector<256x12xf32>
    %c0_12 = arith.constant 0 : index
    %c0_13 = arith.constant 0 : index
    %51 = vector.load %arg2[%c0_12, %c0_13] : memref<12x32xf32, #tpu.memory_space<vmem>>, vector<12x32xf32>
    %cst_14 = arith.constant dense<0.000000e+00> : vector<256x32xf32>
    %52 = tpu.matmul %50, %51, %cst_14 {dimension_numbers = #tpu.dot_dimension_numbers<[1], [0], [0], [1], [0, 0, 1, 1], [], []>} : vector<256x12xf32>, vector<12x32xf32>, vector<256x32xf32> -> vector<256x32xf32>
    %c0_15 = arith.constant 0 : index
    %c0_16 = arith.constant 0 : index
    %53 = vector.load %arg3[%c0_15, %c0_16] : memref<1x32xf32, #tpu.memory_space<vmem>>, vector<1x32xf32>
    %54 = vector.broadcast %53 : vector<1x32xf32> to vector<256x32xf32>
    %55 = arith.addf %52, %54 : vector<256x32xf32>
    %cst_17 = arith.constant 0.000000e+00 : f32
    %56 = vector.broadcast %cst_17 : f32 to vector<256x32xf32>
    %57 = arith.maximumf %55, %56 : vector<256x32xf32>
    %58 = vector.extract_strided_slice %57 {offsets = [255, 0], sizes = [1, 32], strides = [1, 1]} : vector<256x32xf32> to vector<1x32xf32>
    %59 = vector.extract_strided_slice %57 {offsets = [0, 0], sizes = [255, 32], strides = [1, 1]} : vector<256x32xf32> to vector<255x32xf32>
    %60 = tpu.concatenate %58, %59 in 0 : vector<1x32xf32>, vector<255x32xf32> -> vector<256x32xf32>
    %cst_18 = arith.constant 0.000000e+00 : f32
    %61 = vector.shape_cast %26 : vector<256x1xi1> to vector<256x1xi1>
    %62 = vector.broadcast %61 : vector<256x1xi1> to vector<256x32xi1>
    %63 = vector.broadcast %cst_18 : f32 to vector<256x32xf32>
    %64 = arith.select %62, %60, %63 : vector<256x32xi1>, vector<256x32xf32>
    %65 = vector.extract_strided_slice %57 {offsets = [1, 0], sizes = [255, 32], strides = [1, 1]} : vector<256x32xf32> to vector<255x32xf32>
    %66 = vector.extract_strided_slice %57 {offsets = [0, 0], sizes = [1, 32], strides = [1, 1]} : vector<256x32xf32> to vector<1x32xf32>
    %67 = tpu.concatenate %65, %66 in 0 : vector<255x32xf32>, vector<1x32xf32> -> vector<256x32xf32>
    %cst_19 = arith.constant 0.000000e+00 : f32
    %68 = vector.shape_cast %35 : vector<256x1xi1> to vector<256x1xi1>
    %69 = vector.broadcast %68 : vector<256x1xi1> to vector<256x32xi1>
    %70 = vector.broadcast %cst_19 : f32 to vector<256x32xf32>
    %71 = arith.select %69, %67, %70 : vector<256x32xi1>, vector<256x32xf32>
    %72 = tpu.concatenate %64, %57, %71 in 1 : vector<256x32xf32>, vector<256x32xf32>, vector<256x32xf32> -> vector<256x96xf32>
    %c0_20 = arith.constant 0 : index
    %c0_21 = arith.constant 0 : index
    %73 = vector.load %arg4[%c0_20, %c0_21] : memref<96x32xf32, #tpu.memory_space<vmem>>, vector<96x32xf32>
    %cst_22 = arith.constant dense<0.000000e+00> : vector<256x32xf32>
    %74 = tpu.matmul %72, %73, %cst_22 {dimension_numbers = #tpu.dot_dimension_numbers<[1], [0], [0], [1], [0, 0, 1, 1], [], []>} : vector<256x96xf32>, vector<96x32xf32>, vector<256x32xf32> -> vector<256x32xf32>
    %c0_23 = arith.constant 0 : index
    %c0_24 = arith.constant 0 : index
    %75 = vector.load %arg5[%c0_23, %c0_24] : memref<1x32xf32, #tpu.memory_space<vmem>>, vector<1x32xf32>
    %76 = vector.broadcast %75 : vector<1x32xf32> to vector<256x32xf32>
    %77 = arith.addf %74, %76 : vector<256x32xf32>
    %cst_25 = arith.constant 0.000000e+00 : f32
    %78 = vector.broadcast %cst_25 : f32 to vector<256x32xf32>
    %79 = arith.maximumf %77, %78 : vector<256x32xf32>
    %80 = vector.extract_strided_slice %79 {offsets = [255, 0], sizes = [1, 32], strides = [1, 1]} : vector<256x32xf32> to vector<1x32xf32>
    %81 = vector.extract_strided_slice %79 {offsets = [0, 0], sizes = [255, 32], strides = [1, 1]} : vector<256x32xf32> to vector<255x32xf32>
    %82 = tpu.concatenate %80, %81 in 0 : vector<1x32xf32>, vector<255x32xf32> -> vector<256x32xf32>
    %cst_26 = arith.constant 0.000000e+00 : f32
    %83 = vector.shape_cast %26 : vector<256x1xi1> to vector<256x1xi1>
    %84 = vector.broadcast %83 : vector<256x1xi1> to vector<256x32xi1>
    %85 = vector.broadcast %cst_26 : f32 to vector<256x32xf32>
    %86 = arith.select %84, %82, %85 : vector<256x32xi1>, vector<256x32xf32>
    %87 = vector.extract_strided_slice %79 {offsets = [1, 0], sizes = [255, 32], strides = [1, 1]} : vector<256x32xf32> to vector<255x32xf32>
    %88 = vector.extract_strided_slice %79 {offsets = [0, 0], sizes = [1, 32], strides = [1, 1]} : vector<256x32xf32> to vector<1x32xf32>
    %89 = tpu.concatenate %87, %88 in 0 : vector<255x32xf32>, vector<1x32xf32> -> vector<256x32xf32>
    %cst_27 = arith.constant 0.000000e+00 : f32
    %90 = vector.shape_cast %35 : vector<256x1xi1> to vector<256x1xi1>
    %91 = vector.broadcast %90 : vector<256x1xi1> to vector<256x32xi1>
    %92 = vector.broadcast %cst_27 : f32 to vector<256x32xf32>
    %93 = arith.select %91, %89, %92 : vector<256x32xi1>, vector<256x32xf32>
    %94 = tpu.concatenate %86, %79, %93 in 1 : vector<256x32xf32>, vector<256x32xf32>, vector<256x32xf32> -> vector<256x96xf32>
    %c0_28 = arith.constant 0 : index
    %c0_29 = arith.constant 0 : index
    %95 = vector.load %arg6[%c0_28, %c0_29] : memref<96x4xf32, #tpu.memory_space<vmem>>, vector<96x4xf32>
    %cst_30 = arith.constant dense<0.000000e+00> : vector<256x4xf32>
    %96 = tpu.matmul %94, %95, %cst_30 {dimension_numbers = #tpu.dot_dimension_numbers<[1], [0], [0], [1], [0, 0, 1, 1], [], []>} : vector<256x96xf32>, vector<96x4xf32>, vector<256x4xf32> -> vector<256x4xf32>
    %c0_31 = arith.constant 0 : index
    %c0_32 = arith.constant 0 : index
    %97 = vector.load %arg7[%c0_31, %c0_32] : memref<1x4xf32, #tpu.memory_space<vmem>>, vector<1x4xf32>
    %98 = vector.broadcast %97 : vector<1x4xf32> to vector<256x4xf32>
    %99 = arith.addf %96, %98 : vector<256x4xf32>
    %c0_33 = arith.constant 0 : index
    %c0_34 = arith.constant 0 : index
    %100 = vector.load %arg8[%c0_33, %c0_34] : memref<256x4xf32, #tpu.memory_space<vmem>>, vector<256x4xf32>
    tpu.vector_store %arg8[%c0_33, %c0_34], %99 {strides = array<i32>} : memref<256x4xf32, #tpu.memory_space<vmem>>, vector<256x4xf32>,
    return
  }
  func.func @transform_0(%arg0: i32) -> (i32, i32) {
    %c0_i32 = arith.constant 0 : i32
    %c0_i32_0 = arith.constant 0 : i32
    return %arg0, %c0_i32 : i32, i32
  }
  func.func @transform_1(%arg0: i32) -> (i32, i32) {
    %c0_i32 = arith.constant 0 : i32
    %c0_i32_0 = arith.constant 0 : i32
    %c0_i32_1 = arith.constant 0 : i32
    return %c0_i32, %c0_i32_0 : i32, i32
  }
  func.func @transform_2(%arg0: i32) -> (i32, i32) {
    %c0_i32 = arith.constant 0 : i32
    %c0_i32_0 = arith.constant 0 : i32
    %c0_i32_1 = arith.constant 0 : i32
    return %c0_i32, %c0_i32_0 : i32, i32
  }
  func.func @transform_3(%arg0: i32) -> (i32, i32) {
    %c0_i32 = arith.constant 0 : i32
    %c0_i32_0 = arith.constant 0 : i32
    %c0_i32_1 = arith.constant 0 : i32
    return %c0_i32, %c0_i32_0 : i32, i32
  }
  func.func @transform_4(%arg0: i32) -> (i32, i32) {
    %c0_i32 = arith.constant 0 : i32
    %c0_i32_0 = arith.constant 0 : i32
    %c0_i32_1 = arith.constant 0 : i32
    return %c0_i32, %c0_i32_0 : i32, i32
  }
  func.func @transform_5(%arg0: i32) -> (i32, i32) {
    %c0_i32 = arith.constant 0 : i32
    %c0_i32_0 = arith.constant 0 : i32
    %c0_i32_1 = arith.constant 0 : i32
    return %c0_i32, %c0_i32_0 : i32, i32
  }
  func.func @transform_6(%arg0: i32) -> (i32, i32) {
    %c0_i32 = arith.constant 0 : i32
    %c0_i32_0 = arith.constant 0 : i32
    %c0_i32_1 = arith.constant 0 : i32
    return %c0_i32, %c0_i32_0 : i32, i32
  }
  func.func @transform_7(%arg0: i32) -> (i32, i32) {
    %c0_i32 = arith.constant 0 : i32
    %c0_i32_0 = arith.constant 0 : i32
    return %arg0, %c0_i32 : i32, i32
  }
}

</mosaic_0001>

<bundles_post_ra>
// kernel: tpu_custom_call.1
= control target key start
LH: loop header
LB: loop body
LE: loop exit
PB: predicated region body
PF: predicated region fallthrough
CT: control target
= control target key end

     0   :  { %v58_v0 = vlaneseq  ;;  %vm957_vm0 = vcmask 1046528   ;;  %s4194_s30 = smov 4   ;;  %s4195_s12 = smov 8   ;;  %vm1547_vm2 = vcmask 1043456   ;;  %vm4196_vm4 = vmmov 1   ;;  %s6181_s0 = inlined_call_operand.vmem [shape: f32[256,4], index: 0, kind: input, shape index: {}]   ;;  %s6182_s1 = inlined_call_operand.vmem [shape: f32[12,32], index: 1, kind: input, shape index: {}]   ;;  %s6183_s2 = inlined_call_operand.vmem [shape: f32[1,32], index: 2, kind: input, shape index: {}]   ;;  %s6184_s3 = inlined_call_operand.vmem [shape: f32[96,32], index: 3, kind: input, shape index: {}]   ;;  %s6185_s5 = inlined_call_operand.vmem [shape: f32[96,4], index: 5, kind: input, shape index: {}]   ;;  %s6186_s4 = inlined_call_operand.vmem [shape: f32[1,32], index: 4, kind: input, shape index: {}]   ;;  %s6187_s6 = inlined_call_operand.vmem [shape: f32[1,4], index: 6, kind: input, shape index: {}]   ;;  %s6188_s7 = inlined_call_operand.vmem [shape: f32[256,4], index: 7, kind: output, shape index: {}]  }
   0x1   :  { %v4242_v1 = vld [vmem:[%s6181_s0] sm:$0xff]  ;;  %v4247_v2 = vld [vmem:[%s6181_s0 + $0x8] sm:$0xff]  ;;  %v4252_v3 = vld [vmem:[%s6181_s0 + $0x10] sm:$0xff]  ;;  %vm765_vm6 = vcmask 1040384   ;;  %vm6208_vm13 = vcmask 31744   ;;  %vm1408_vm14 = vcmask 64512  }
   0x2   :  { %1151 = vrot.lane.b32.xlu0 %v4242_v1, %s4194_s30  ;;  %v958_v4 = vrot.slane %v4242_v1, 1  ;;  %v959_v5 = vrot.slane %v4247_v2, 1  ;;  %v961_v6 = vrot.slane %v4252_v3, 1  ;;  %v4259_v7 = vshrl.u32 %v58_v0, 7  ;;  %v4267_v9 = vld [vmem:[%s6181_s0 + $0x18] sm:$0xff]  ;;  %v4272_v10 = vld [vmem:[%s6181_s0 + $0x20] sm:$0xff]  ;;  %vm4349_vm5 = vmpackc.low %vm1547_vm2, %vm4196_vm4 }
   0x3   :  { %v963_v13 = vrot.slane %v4267_v9, 1  ;;  %v965_v15 = vrot.slane %v4272_v10, 1  ;;  %v4292_v19 = vld [vmem:[%s6181_s0 + $0x28] sm:$0xff]  ;;  %v4303_v22 = vld [vmem:[%s6181_s0 + $0x30] sm:$0xff]  ;;  %v4314_v27 = vld [vmem:[%s6181_s0 + $0x38] sm:$0xff]  ;;  %v766_v38 = vrot.slane %v4242_v1, 7 }
   0x4   :  { %v960_v8 = vsel %vm957_vm0, %v958_v4, %v959_v5  ;;  %v62_v11 = vadd.s32 24, %v4259_v7  ;;  %v962_v12 = vsel %vm957_vm0, %v959_v5, %v961_v6  ;;  %v967_v21 = vrot.slane %v4292_v19, 1  ;;  %v4319_v28 = vld [vmem:[%s6181_s0 + $0x40] sm:$0xff]  ;;  %v1442_v36 = vld [vmem:[%s6182_s1 + $0x8] sm:$0xf]  ;;  %v36_v43 = vld [vmem:[%s6181_s0 + $0x50] sm:$0xff] }
   0x5   :  { %1279 = vrot.lane.b32.xlu1 %v960_v8, %s4195_s12  ;;  %v964_v17 = vsel %vm957_vm0, %v961_v6, %v963_v13  ;;  %v966_v18 = vsel %vm957_vm0, %v963_v13, %v965_v15  ;;  %v66_v23 = vadd.s32 56, %v4259_v7  ;;  %v969_v24 = vrot.slane %v4303_v22, 1  ;;  %v1441_v35 = vld [vmem:[%s6182_s1] sm:$0xff]  ;;  %v35_v37 = vld [vmem:[%s6181_s0 + $0x48] sm:$0xff]  ;;  %v4363_v47 = vld [vmem:[%s6181_s0 + $0xf8] sm:$0xff] }
   0x6   :  { %1153 = vrot.lane.b32.xlu0 %v4247_v2, %s4194_s30  ;;  %v116_v14 = vand.u32 31, %v62_v11  ;;  %v968_v25 = vsel %vm957_vm0, %v965_v15, %v967_v21  ;;  %v971_v30 = vrot.slane %v4314_v27, 1  ;;  %v973_v32 = vrot.slane %v4319_v28, 1  ;;  %v37_v54 = vld [vmem:[%s6181_s0 + $0x58] sm:$0xff]  ;;  %v39_v8 = vld [vmem:[%s6181_s0 + $0x68] sm:$0xff] }
   0x7   :  { %v144_v26 = vand.u32 31, %v66_v23  ;;  %v970_v29 = vsel %vm957_vm0, %v967_v21, %v969_v24  ;;  %v771_v39 = vrot.slane %v4267_v9, 7  ;;  %v767_v40 = vrot.slane %v4247_v2, 7  ;;  %v38_v2 = vld [vmem:[%s6181_s0 + $0x60] sm:$0xff]  ;;  %v41_v21 = vld [vmem:[%s6181_s0 + $0x78] sm:$0xff] }
   0x8   :  { %v4282_v16 = vadd.s32 1, %v116_v14  ;;  %v972_v33 = vsel %vm957_vm0, %v969_v24, %v971_v30  ;;  %v974_v34 = vsel %vm957_vm0, %v971_v30, %v973_v32  ;;  %v4133_v44 = vpack.c.bf16 %v1442_v36, %v1441_v35  ;;  %v43_v35 = vld [vmem:[%s6181_s0 + $0x88] sm:$0xff] }
   0x9   :  { %1281 = vrot.lane.b32.xlu1 %v962_v12, %s4195_s12  ;;  %v4326_v31 = vadd.s32 1, %v144_v26  ;;  %v975_v45 = vrot.slane %v35_v37, 1  ;;  %v70_v46 = vadd.s32 88, %v4259_v7  ;;  %v4368_v48 = vsel %vm765_vm6, %v766_v38, %v767_v40 }
   0xa   :  { %6212 = vst [vmem:[#allocation2_spill] sm:$0xff] %v4282_v16  ;;  %1155 = vrot.lane.b32.xlu0 %v4252_v3, %s4194_s30  ;;  %vm670_vm1 = vcmp.lt.s32.totalorder %v4282_v16, 32  ;;  %v769_v49 = vrot.slane %v4252_v3, 7  ;;  %v775_v50 = vrot.slane %v4292_v19, 7  ;;  %4135 = vmatprep.subr.msk.bf16.mxu0 %vm4349_vm5, %v4133_v44  ;;  %v1019_v51 = vrot.slane %v4363_v47, 1 }
   0xb   :  { %v1122_v20 = vsel %vm670_vm1, %v966_v18, 0.0  ;;  %6213 = vst [vmem:[#allocation3_spill] sm:$0xff] %v4326_v31  ;;  %vm674_vm3 = vcmp.lt.s32.totalorder %v4326_v31, 32  ;;  %4187 = vmatprep.subr.msk.bf16.mxu1 %vm4349_vm5, %v4133_v44  ;;  %v779_v52 = vrot.slane %v4314_v27, 7  ;;  %v977_v53 = vrot.slane %v36_v43, 1  ;;  %4138 = vmatpush3.bf16.msk.msra.mxu0 %vm4349_vm5, %v4133_v44 }
   0xc   :  { %v1126_v42 = vsel %vm674_vm3, %v974_v34, 0.0  ;;  %v4385_v55 = vsel %vm765_vm6, %v767_v40, %v769_v49  ;;  %v4388_v56 = vsel %vm765_vm6, %v769_v49, %v771_v39  ;;  %v783_v57 = vrot.slane %v35_v37, 7  ;;  %4188 = vmatpush3.bf16.msk.msra.mxu1 %vm4349_vm5, %v4133_v44 }
   0xd   :  { %1157 = vrot.lane.b32.xlu1 %v4267_v9, %s4194_s30  ;;  %v787_v58 = vrot.slane %v37_v54, 7  ;;  %v4397_v59 = vsel %vm957_vm0, %v1019_v51, %v958_v4  ;;  %v773_v60 = vrot.slane %v4272_v10, 7  ;;  %v976_v61 = vsel %vm957_vm0, %v973_v32, %v975_v45 }
   0xe   :  { %1283 = vrot.lane.b32.xlu0 %v964_v17, %s4195_s12  ;;  %v172_v62 = vand.u32 31, %v70_v46  ;;  %v777_v63 = vrot.slane %v4303_v22, 7  ;;  %v781_v0 = vrot.slane %v4319_v28, 7  ;;  %v785_v5 = vrot.slane %v36_v43, 7 }
   0xf   :  { %v4409_v3 = vsel %vm765_vm6, %v771_v39, %v773_v60  ;;  %v4412_v4 = vsel %vm765_vm6, %v773_v60, %v775_v50  ;;  %v978_v6 = vsel %vm957_vm0, %v975_v45, %v977_v53  ;;  %v791_v11 = vrot.slane %v39_v8, 7  ;;  %v42_v39 = vld [vmem:[%s6181_s0 + $0x80] sm:$0xff] }
  0x10   :  { %v4420_v9 = vsel %vm765_vm6, %v775_v50, %v777_v63  ;;  %v4427_v12 = vsel %vm765_vm6, %v779_v52, %v781_v0  ;;  %v4430_v13 = vsel %vm765_vm6, %v781_v0, %v783_v57  ;;  %v4433_v14 = vsel %vm765_vm6, %v783_v57, %v785_v5 }
  0x11   :  { %1285 = vrot.lane.b32.xlu1 %v1122_v20, %s4195_s12  ;;  %v979_v15 = vrot.slane %v37_v54, 1  ;;  %v4435_v17 = vadd.s32 1, %v172_v62  ;;  %v981_v18 = vrot.slane %v38_v2, 1  ;;  %v789_v20 = vrot.slane %v38_v2, 7 }
  0x12   :  { %1159 = vrot.lane.b32.xlu0 %v4272_v10, %s4194_s30  ;;  %v4423_v10 = vsel %vm765_vm6, %v777_v63, %v779_v52  ;;  %v74_v34 = vadd.s32 120, %v4259_v7  ;;  %v799_v36 = vrot.slane %v43_v35, 7  ;;  %v987_v46 = vrot.slane %v41_v21, 1  ;;  %v45_v52 = vld [vmem:[%s6181_s0 + $0x98] sm:$0xff] }
  0x13   :  { %v4446_v23 = vsel %vm765_vm6, %v787_v58, %v789_v20  ;;  %v4449_v24 = vsel %vm765_vm6, %v789_v20, %v791_v11  ;;  %vm678_vm7 = vcmp.lt.s32.totalorder %v4435_v17, 32  ;;  %v982_v26 = vsel %vm957_vm0, %v979_v15, %v981_v18 }
  0x14   :  { %v200_v41 = vand.u32 31, %v74_v34  ;;  %v989_v50 = vrot.slane %v42_v39, 1  ;;  %v991_v0 = vrot.slane %v43_v35, 1  ;;  %v995_v20 = vrot.slane %v45_v52, 1  ;;  %v4548_v34 = vld [vmem:[%s6181_s0 + $0xb0] sm:$0xff] }
  0x15   :  { %1161 = vrot.lane.b32.xlu1 %v4292_v19, %s4194_s30  ;;  %v4438_v19 = vsel %vm765_vm6, %v785_v5, %v787_v58  ;;  %v44_v58 = vld [vmem:[%s6181_s0 + $0x90] sm:$0xff]  ;;  %vm1450_vm15 = vcmask 97280  }
  0x16   :  { %1287 = vrot.lane.b32.xlu0 %v968_v25, %s4195_s12  ;;  %v980_v25 = vsel %vm957_vm0, %v977_v53, %v979_v15  ;;  %v4486_v49 = vadd.s32 1, %v200_v41  ;;  %v803_v53 = vrot.slane %v45_v52, 7  ;;  %v990_v57 = vsel %vm957_vm0, %v987_v46, %v989_v50  ;;  %v4564_v41 = vld [vmem:[%s6181_s0 + $0xc0] sm:$0xff] }
  0x17   :  { %v801_v60 = vrot.slane %v44_v58, 7  ;;  %v993_v5 = vrot.slane %v44_v58, 1 }
  0x18   :  { %vm682_vm8 = vcmp.lt.s32.totalorder %v4486_v49, 32 }
  0x19   :  { %1289 = vrot.lane.b32.xlu1 %v970_v29, %s4195_s12  ;;  %v1130_v29 = vsel %vm678_vm7, %v982_v26, 0.0  ;;  %v4504_v62 = vsel %vm765_vm6, %v799_v36, %v801_v60  ;;  %v4507_v63 = vsel %vm765_vm6, %v801_v60, %v803_v53  ;;  %v996_v26 = vsel %vm957_vm0, %v993_v5, %v995_v20  ;;  %v4594_v60 = vld [vmem:[%s6181_s0 + $0xd0] sm:$0xff] }
  0x1a   :  { %1163 = vrot.lane.b32.xlu0 %v4303_v22, %s4194_s30  ;;  %v795_v22 = vrot.slane %v41_v21, 7 }
  0x1d   :  { %1165 = vrot.lane.b32.xlu1 %v4314_v27, %s4194_s30  ;;  %v40_v27 = vld [vmem:[%s6181_s0 + $0x70] sm:$0xff] }
  0x1e   :  { %1291 = vrot.lane.b32.xlu0 %v972_v33, %s4195_s12  ;;  %v983_v33 = vrot.slane %v39_v8, 1 }
  0x20   :  { %v984_v40 = vsel %vm957_vm0, %v981_v18, %v983_v33  ;;  %v994_v18 = vsel %vm957_vm0, %v991_v0, %v993_v5  ;;  %v4605_v5 = vld [vmem:[%s6181_s0 + $0xd8] sm:$0xff] }
  0x21   :  { %1293 = vrot.lane.b32.xlu1 %v1126_v42, %s4195_s12  ;;  %v797_v42 = vrot.slane %v42_v39, 7 }
  0x22   :  { %1167 = vrot.lane.b32.xlu0 %v4319_v28, %s4194_s30  ;;  %v793_v28 = vrot.slane %v40_v27, 7 }
  0x23   :  { %v4482_v44 = vsel %vm765_vm6, %v797_v42, %v799_v36  ;;  %v1001_v36 = vrot.slane %v4548_v34, 1 }
  0x24   :  { %v4462_v30 = vsel %vm765_vm6, %v791_v11, %v793_v28  ;;  %v4465_v32 = vsel %vm765_vm6, %v793_v28, %v795_v22  ;;  %v4516_v11 = vld [vmem:[%s6181_s0 + $0xa0] sm:$0xff]  ;;  %v4538_v28 = vld [vmem:[%s6181_s0 + $0xa8] sm:$0xff] }
  0x25   :  { %1169 = vrot.lane.b32.xlu1 %v35_v37, %s4194_s30  ;;  %v985_v37 = vrot.slane %v40_v27, 1  ;;  %v805_v15 = vrot.slane %v4516_v11, 7 }
  0x26   :  { %1295 = vrot.lane.b32.xlu0 %v976_v61, %s4195_s12  ;;  %v1134_v61 = vsel %vm682_vm8, %v990_v57, 0.0 }
  0x27   :  { %v986_v45 = vsel %vm957_vm0, %v983_v33, %v985_v37  ;;  %v999_v33 = vrot.slane %v4538_v28, 1 }
  0x29   :  { %1297 = vrot.lane.b32.xlu1 %v978_v6, %s4195_s12  ;;  %v992_v6 = vsel %vm957_vm0, %v989_v50, %v991_v0  ;;  %v1005_v50 = vrot.slane %v4564_v41, 1  ;;  %v1009_v0 = vrot.slane %v4594_v60, 1 }
  0x2a   :  { %1171 = vrot.lane.b32.xlu0 %v36_v43, %s4194_s30  ;;  %v4479_v43 = vsel %vm765_vm6, %v795_v22, %v797_v42  ;;  %v997_v22 = vrot.slane %v4516_v11, 1  ;;  %v1002_v42 = vsel %vm957_vm0, %v999_v33, %v1001_v36 }
  0x2d   :  { %1173 = vrot.lane.b32.xlu1 %v37_v54, %s4194_s30  ;;  %v988_v54 = vsel %vm957_vm0, %v985_v37, %v987_v46  ;;  %v1000_v37 = vsel %vm957_vm0, %v997_v22, %v999_v33 }
  0x2e   :  { %1299 = vrot.lane.b32.xlu0 %v980_v25, %s4195_s12  ;;  %v4528_v25 = vsel %vm765_vm6, %v803_v53, %v805_v15 }
  0x31   :  { %1301 = vrot.lane.b32.xlu1 %v1130_v29, %s4195_s12 }
  0x32   :  { %1175 = vrot.lane.b32.xlu0 %v38_v2, %s4194_s30  ;;  %v78_v2 = vadd.s32 152, %v4259_v7 }
  0x35   :  { %1177 = vrot.lane.b32.xlu1 %v39_v8, %s4194_s30  ;;  %v228_v8 = vand.u32 31, %v78_v2 }
  0x36   :  { %1303 = vrot.lane.b32.xlu0 %v984_v40, %s4195_s12  ;;  %v4559_v40 = vld [vmem:[%s6181_s0 + $0xb8] sm:$0xff] }
  0x39   :  { %1305 = vrot.lane.b32.xlu1 %v986_v45, %s4195_s12  ;;  %v1003_v45 = vrot.slane %v4559_v40, 1 }
  0x3a   :  { %1179 = vrot.lane.b32.xlu0 %v40_v27, %s4194_s30  ;;  %v998_v27 = vsel %vm957_vm0, %v995_v20, %v997_v22  ;;  %v1011_v20 = vrot.slane %v4605_v5, 1 }
  0x3b   :  { %v1006_v53 = vsel %vm957_vm0, %v1003_v45, %v1005_v50 }
  0x3d   :  { %1181 = vrot.lane.b32.xlu1 %v41_v21, %s4194_s30  ;;  %v4522_v21 = vadd.s32 1, %v228_v8  ;;  %v4610_v8 = vld [vmem:[%s6181_s0 + $0xe0] sm:$0xff] }
  0x3e   :  { %1307 = vrot.lane.b32.xlu0 %v988_v54, %s4195_s12  ;;  %v4583_v54 = vld [vmem:[%s6181_s0 + $0xc8] sm:$0xff] }
  0x3f   :  { %6216 = vst [vmem:[#allocation4_spill] sm:$0xff] %v4522_v21  ;;  %vm686_vm9 = vcmp.lt.s32.totalorder %v4522_v21, 32 }
  0x40   :  { %v1138_v29 = vsel %vm686_vm9, %v998_v27, 0.0  ;;  %v95_v27 = vand.u32 31, %v4259_v7 }
  0x41   :  { %1309 = vrot.lane.b32.xlu1 %v1134_v61, %s4195_s12  ;;  %v86_v61 = vadd.s32 216, %v4259_v7 }
  0x42   :  { %1183 = vrot.lane.b32.xlu0 %v42_v39, %s4194_s30 }
  0x45   :  { %1185 = vrot.lane.b32.xlu1 %v43_v35, %s4194_s30  ;;  %v82_v35 = vadd.s32 184, %v4259_v7 }
  0x46   :  { %1311 = vrot.lane.b32.xlu0 %v992_v6, %s4195_s12  ;;  %v284_v6 = vand.u32 31, %v86_v61  ;;  %v63_v61 = vadd.s32 32, %v4259_v7 }
  0x47   :  { %v256_v39 = vand.u32 31, %v82_v35  ;;  %v4627_v35 = vadd.s32 4294967295, %v95_v27 }
  0x48   :  { %v4617_v22 = vadd.s32 1, %v284_v6  ;;  %v123_v27 = vand.u32 31, %v63_v61 }
  0x49   :  { %1313 = vrot.lane.b32.xlu1 %v994_v18, %s4195_s12  ;;  %v4571_v46 = vadd.s32 1, %v256_v39  ;;  %vm507_vm12 = vcmp.ge.s32.totalorder %v4627_v35, 0 }
  0x4a   :  { %1187 = vrot.lane.b32.xlu0 %v44_v58, %s4194_s30  ;;  %v1007_v58 = vrot.slane %v4583_v54, 1  ;;  %vm694_vm11 = vcmp.lt.s32.totalorder %v4617_v22, 32 }
  0x4b   :  { %vm690_vm10 = vcmp.lt.s32.totalorder %v4571_v46, 32 }
  0x4c   :  { %v1142_v57 = vsel %vm690_vm10, %v1006_v53, 0.0  ;;  %v1008_v2 = vsel %vm957_vm0, %v1005_v50, %v1007_v58  ;;  %v1010_v18 = vsel %vm957_vm0, %v1007_v58, %v1009_v0  ;;  %v4650_v50 = vld [vmem:[%s6181_s0 + $0xf0] sm:$0xff] }
  0x4d   :  { %1189 = vrot.lane.b32.xlu1 %v45_v52, %s4194_s30  ;;  %v1004_v52 = vsel %vm957_vm0, %v1001_v36, %v1003_v45  ;;  %v732_v36 = vrot.slane %v4363_v47, 7 }
  0x4e   :  { %1315 = vrot.lane.b32.xlu0 %v996_v26, %s4195_s12  ;;  %v1013_v26 = vrot.slane %v4610_v8, 1 }
  0x50   :  { %v1014_v33 = vsel %vm957_vm0, %v1011_v20, %v1013_v26 }
  0x51   :  { %1317 = vrot.lane.b32.xlu1 %v1138_v29, %s4195_s12  ;;  %v1012_v29 = vsel %vm957_vm0, %v1009_v0, %v1011_v20  ;;  %v1146_v39 = vsel %vm694_vm11, %v1014_v33, 0.0 }
  0x52   :  { %1191 = vrot.lane.b32.xlu0 %v4516_v11, %s4194_s30 }
  0x55   :  { %1193 = vrot.lane.b32.xlu1 %v4538_v28, %s4194_s30 }
  0x56   :  { %1319 = vrot.lane.b32.xlu0 %v1000_v37, %s4195_s12  ;;  %v4633_v37 = vld [vmem:[%s6181_s0 + $0xe8] sm:$0xff] }
  0x57   :  { %v1015_v45 = vrot.slane %v4633_v37, 1 }
  0x59   :  { %1321 = vrot.lane.b32.xlu1 %v1002_v42, %s4195_s12  ;;  %v860_v42 = vsel %vm765_vm6, %v732_v36, %v766_v38  ;;  %v1017_v38 = vrot.slane %v4650_v50, 1  ;;  %v1016_v53 = vsel %vm957_vm0, %v1013_v26, %v1015_v45 }
  0x5a   :  { %1195 = vrot.lane.b32.xlu0 %v4548_v34, %s4194_s30  ;;  %v925_v1 = vsel %vm507_vm12, %v860_v42, 0.0 }
  0x5d   :  { %1197 = vrot.lane.b32.xlu1 %v4559_v40, %s4194_s30 }
  0x5e   :  { %1323 = vrot.lane.b32.xlu0 %v1004_v52, %s4195_s12  ;;  %v90_v52 = vadd.s32 248, %v4259_v7 }
  0x61   :  { %1325 = vrot.lane.b32.xlu1 %v1142_v57, %s4195_s12  ;;  %v312_v57 = vand.u32 31, %v90_v52  ;;  %v4680_v52 = vadd.s32 4294967295, %v123_v27 }
  0x62   :  { %1199 = vrot.lane.b32.xlu0 %v4564_v41, %s4194_s30 }
  0x63   :  { %vm6209_vm4 = vcmp.ge.s32.totalorder %v4680_v52, 0 }
  0x65   :  { %1201 = vrot.lane.b32.xlu1 %v4583_v54, %s4194_s30 }
  0x66   :  { %1327 = vrot.lane.b32.xlu0 %v1008_v2, %s4195_s12  ;;  %v1018_v2 = vsel %vm957_vm0, %v1015_v45, %v1017_v38 }
  0x69   :  { %1329 = vrot.lane.b32.xlu1 %v1010_v18, %s4195_s12  ;;  %v4666_v18 = vadd.s32 1, %v312_v57 }
  0x6a   :  { %1203 = vrot.lane.b32.xlu0 %v4594_v60, %s4194_s30 }
  0x6b   :  { %vm698_vm2 = vcmp.lt.s32.totalorder %v4666_v18, 32 }
  0x6d   :  { %1205 = vrot.lane.b32.xlu1 %v4605_v5, %s4194_s30 }
  0x6e   :  { %1331 = vrot.lane.b32.xlu0 %v1012_v29, %s4195_s12 }
  0x71   :  { %1333 = vrot.lane.b32.xlu1 %v1146_v39, %s4195_s12  ;;  %v1020_v39 = vsel %vm957_vm0, %v1017_v38, %v1019_v51  ;;  %v1150_v51 = vsel %vm698_vm2, %v4397_v59, 0.0 }
  0x72   :  { %1207 = vrot.lane.b32.xlu0 %v4610_v8, %s4194_s30 }
  0x74   :  { %v1152_v58 = vpop.permute.xlu0 %1151 }
  0x75   :  { %v1376_v0 = vsel %vm6208_vm13, %v925_v1, %v1152_v58  ;;  %1209 = vrot.lane.b32.xlu1 %v4633_v37, %s4194_s30  ;;  %v929_v58 = vsel %vm6209_vm4, %v4409_v3, 0.0 }
  0x76   :  { %1335 = vrot.lane.b32.xlu0 %v1016_v53, %s4195_s12 }
  0x77   :  { %v1280_v6 = vpop.permute.xlu1 %1279 }
  0x78   :  { %v1154_v20 = vpop.permute.xlu0 %1153  ;;  %v1409_v26 = vsel %vm1408_vm14, %v1376_v0, %v1280_v6  ;;  %v67_v0 = vadd.s32 64, %v4259_v7 }
  0x79   :  { %v1377_v29 = vsel %vm6208_vm13, %v4368_v48, %v1154_v20  ;;  %1337 = vrot.lane.b32.xlu1 %v1018_v2, %s4195_s12  ;;  %3941 = vmatprep.mubr.msk.f32.mxu0 %vm1450_vm15, %v1409_v26 }
  0x7a   :  { %1211 = vrot.lane.b32.xlu0 %v4650_v50, %s4194_s30  ;;  %v151_v26 = vand.u32 31, %v67_v0 }
  0x7b   :  { %v1282_v33 = vpop.permute.xlu1 %1281 }
  0x7c   :  { %v1410_v42 = vsel %vm1408_vm14, %v1377_v29, %v1282_v33  ;;  %v1156_v45 = vpop.permute.xlu0 %1155 }
  0x7d   :  { %1213 = vrot.lane.b32.xlu1 %v4363_v47, %s4194_s30  ;;  %3942 = vmatmul.mubr.msk.f32.vlgmr.msra.gmra.mrb[0].mxu0 %vm1450_vm15, %v1410_v42  ;;  %v1378_v48 = vsel %vm6208_vm13, %v4385_v55, %v1156_v45 }
  0x7e   :  { %1339 = vrot.lane.b32.xlu0 %v1020_v39, %s4195_s12  ;;  %v4709_v39 = vadd.s32 4294967295, %v151_v26 }
  0x7f   :  { %v1158_v1 = vpop.permute.xlu1 %1157 }
  0x80   :  { %v1284_v38 = vpop.permute.xlu0 %1283  ;;  %v1379_v57 = vsel %vm6208_vm13, %v4388_v56, %v1158_v1  ;;  %vm6189_vm5 = vcmp.ge.s32.totalorder %v4709_v39, 0 }
  0x81   :  { %v1411_v53 = vsel %vm1408_vm14, %v1378_v48, %v1284_v38  ;;  %1341 = vrot.lane.b32.xlu1 %v1150_v51, %s4195_s12  ;;  %v933_v38 = vsel %vm6189_vm5, %v4427_v12, 0.0  ;;  %s4197_s12 = smov 32  }
  0x82   :  { %3944 = vmatprep.mubr.msk.f32.mxu0 %vm1450_vm15, %v1411_v53 }
  0x83   :  { %v1286_v55 = vpop.permute.xlu1 %1285 }
  0x84   :  { %v1412_v59 = vsel %vm1408_vm14, %v1379_v57, %v1286_v55  ;;  %v1160_v61 = vpop.permute.xlu0 %1159 }
  0x85   :  { %3945 = vmatmul.mubr.msk.f32.gmra.mrb[2].mxu0 %vm1450_vm15, %v1412_v59  ;;  %v1380_v2 = vsel %vm6208_vm13, %v929_v58, %v1160_v61 }
  0x87   :  { %v1162_v6 = vpop.permute.xlu1 %1161 }
  0x88   :  { %v1288_v20 = vpop.permute.xlu0 %1287  ;;  %v1381_v56 = vsel %vm6208_vm13, %v4412_v4, %v1162_v6 }
  0x89   :  { %v1413_v27 = vsel %vm1408_vm14, %v1380_v2, %v1288_v20 }
  0x8a   :  { %3947 = vmatprep.mubr.msk.f32.mxu0 %vm1450_vm15, %v1413_v27 }
  0x8b   :  { %v1290_v3 = vpop.permute.xlu1 %1289 }
  0x8c   :  { %v1414_v29 = vsel %vm1408_vm14, %v1381_v56, %v1290_v3  ;;  %v1164_v33 = vpop.permute.xlu0 %1163 }
  0x8d   :  { %3948 = vmatmul.mubr.msk.f32.gmra.mrb[4].mxu0 %vm1450_vm15, %v1414_v29  ;;  %v1382_v42 = vsel %vm6208_vm13, %v4420_v9, %v1164_v33  ;;  %v71_v9 = vadd.s32 96, %v4259_v7 }
  0x8f   :  { %v1166_v45 = vpop.permute.xlu1 %1165  ;;  %v179_v61 = vand.u32 31, %v71_v9 }
  0x90   :  { %v1292_v48 = vpop.permute.xlu0 %1291  ;;  %v1383_v4 = vsel %vm6208_vm13, %v4423_v10, %v1166_v45 }
  0x91   :  { %v1415_v51 = vsel %vm1408_vm14, %v1382_v42, %v1292_v48  ;;  %v4731_v20 = vadd.s32 4294967295, %v179_v61 }
  0x92   :  { %3950 = vmatprep.mubr.msk.f32.mxu0 %vm1450_vm15, %v1415_v51 }
  0x93   :  { %v1294_v1 = vpop.permute.xlu1 %1293  ;;  %vm6190_vm5 = vcmp.ge.s32.totalorder %v4731_v20, 0 }
  0x94   :  { %v1416_v53 = vsel %vm1408_vm14, %v1383_v4, %v1294_v1  ;;  %v1168_v57 = vpop.permute.xlu0 %1167  ;;  %v937_v33 = vsel %vm6190_vm5, %v4446_v23, 0.0 }
  0x95   :  { %3951 = vmatmul.mubr.msk.f32.gmra.mrb[6].mxu0 %vm1450_vm15, %v1416_v53  ;;  %v1384_v55 = vsel %vm6208_vm13, %v933_v38, %v1168_v57 }
  0x97   :  { %v1170_v58 = vpop.permute.xlu1 %1169 }
  0x98   :  { %v1296_v59 = vpop.permute.xlu0 %1295  ;;  %v1385_v10 = vsel %vm6208_vm13, %v4430_v13, %v1170_v58 }
  0x99   :  { %v1417_v0 = vsel %vm1408_vm14, %v1384_v55, %v1296_v59 }
  0x9a   :  { %3953 = vmatprep.mubr.msk.f32.mxu0 %vm1450_vm15, %v1417_v0 }
  0x9b   :  { %v1298_v12 = vpop.permute.xlu1 %1297 }
  0x9c   :  { %v1418_v2 = vsel %vm1408_vm14, %v1385_v10, %v1298_v12  ;;  %v1172_v6 = vpop.permute.xlu0 %1171 }
  0x9d   :  { %3954 = vmatmul.mubr.msk.f32.gmra.mrb[8].mxu0 %vm1450_vm15, %v1418_v2  ;;  %v1386_v26 = vsel %vm6208_vm13, %v4433_v14, %v1172_v6  ;;  %v75_v14 = vadd.s32 128, %v4259_v7 }
  0x9f   :  { %v1174_v27 = vpop.permute.xlu1 %1173  ;;  %v207_v1 = vand.u32 31, %v75_v14 }
  0xa0   :  { %v1300_v56 = vpop.permute.xlu0 %1299  ;;  %v1387_v13 = vsel %vm6208_vm13, %v4438_v19, %v1174_v27 }
  0xa1   :  { %v1419_v3 = vsel %vm1408_vm14, %v1386_v26, %v1300_v56  ;;  %v4753_v9 = vadd.s32 4294967295, %v207_v1 }
  0xa2   :  { %3956 = vmatprep.mubr.msk.f32.mxu0 %vm1450_vm15, %v1419_v3 }
  0xa3   :  { %v1302_v29 = vpop.permute.xlu1 %1301  ;;  %vm6191_vm5 = vcmp.ge.s32.totalorder %v4753_v9, 0 }
  0xa4   :  { %v1420_v42 = vsel %vm1408_vm14, %v1387_v13, %v1302_v29  ;;  %v1176_v45 = vpop.permute.xlu0 %1175  ;;  %v941_v10 = vsel %vm6191_vm5, %v4479_v43, 0.0 }
  0xa5   :  { %3957 = vmatmul.mubr.msk.f32.gmra.mrb[10].mxu0 %vm1450_vm15, %v1420_v42  ;;  %v1388_v48 = vsel %vm6208_vm13, %v937_v33, %v1176_v45 }
  0xa7   :  { %v1178_v51 = vpop.permute.xlu1 %1177 }
  0xa8   :  { %v1304_v4 = vpop.permute.xlu0 %1303  ;;  %v1389_v19 = vsel %vm6208_vm13, %v4449_v24, %v1178_v51  ;;  %v807_v51 = vrot.slane %v4538_v28, 7 }
  0xa9   :  { %v1421_v38 = vsel %vm1408_vm14, %v1388_v48, %v1304_v4 }
  0xaa   :  { %3959 = vmatprep.mubr.msk.f32.mxu0 %vm1450_vm15, %v1421_v38  ;;  %v808_v28 = vsel %vm765_vm6, %v805_v15, %v807_v51 }
  0xab   :  { %v1306_v23 = vpop.permute.xlu1 %1305 }
  0xac   :  { %v1422_v53 = vsel %vm1408_vm14, %v1389_v19, %v1306_v23  ;;  %v1180_v57 = vpop.permute.xlu0 %1179  ;;  %v83_v19 = vadd.s32 192, %v4259_v7 }
  0xad   :  { %3960 = vmatmul.mubr.msk.f32.gmra.mrb[12].mxu0 %vm1450_vm15, %v1422_v53  ;;  %v1390_v55 = vsel %vm6208_vm13, %v4462_v30, %v1180_v57  ;;  %v79_v30 = vadd.s32 160, %v4259_v7 }
  0xaf   :  { %v1182_v58 = vpop.permute.xlu1 %1181  ;;  %v235_v56 = vand.u32 31, %v79_v30 }
  0xb0   :  { %v1308_v59 = vpop.permute.xlu0 %1307  ;;  %v1391_v24 = vsel %vm6208_vm13, %v4465_v32, %v1182_v58 }
  0xb1   :  { %v1423_v61 = vsel %vm1408_vm14, %v1390_v55, %v1308_v59  ;;  %v4775_v33 = vadd.s32 4294967295, %v235_v56  ;;  %v263_v55 = vand.u32 31, %v83_v19  ;;  %v811_v59 = vrot.slane %v4559_v40, 7 }
  0xb2   :  { %3962 = vmatprep.mubr.msk.f32.mxu0 %vm1450_vm15, %v1423_v61 }
  0xb3   :  { %v1310_v0 = vpop.permute.xlu1 %1309  ;;  %6217 = vst [vmem:[#allocation5_spill] sm:$0xff] %v4775_v33  ;;  %vm6192_vm5 = vcmp.ge.s32.totalorder %v4775_v33, 0  ;;  %v4803_v15 = vadd.s32 4294967295, %v263_v55  ;;  %v823_v55 = vrot.slane %v4633_v37, 7 }
  0xb4   :  { %v1424_v12 = vsel %vm1408_vm14, %v1391_v24, %v1310_v0  ;;  %v1184_v2 = vpop.permute.xlu0 %1183  ;;  %v945_v1 = vsel %vm6192_vm5, %v4528_v25, 0.0 }
  0xb5   :  { %3963 = vmatmul.mubr.msk.f32.gmra.mrb[14].mxu0 %vm1450_vm15, %v1424_v12  ;;  %v1392_v6 = vsel %vm6208_vm13, %v941_v10, %v1184_v2  ;;  %6218 = vst [vmem:[#allocation6_spill] sm:$0xff] %v4803_v15  ;;  %vm6193_vm5 = vcmp.ge.s32.totalorder %v4803_v15, 0 }
  0xb7   :  { %v1186_v26 = vpop.permute.xlu1 %1185 }
  0xb8   :  { %v1312_v27 = vpop.permute.xlu0 %1311  ;;  %v1393_v32 = vsel %vm6208_vm13, %v4482_v44, %v1186_v26 }
  0xb9   :  { %v1425_v3 = vsel %vm1408_vm14, %v1392_v6, %v1312_v27  ;;  %v815_v27 = vrot.slane %v4583_v54, 7  ;;  %v817_v54 = vrot.slane %v4594_v60, 7  ;;  %v821_v60 = vrot.slane %v4610_v8, 7 }
  0xba   :  { %3965 = vmatprep.mubr.msk.f32.mxu1 %vm1450_vm15, %v1425_v3 }
  0xbb   :  { %v1314_v43 = vpop.permute.xlu1 %1313 }
  0xbc   :  { %v1426_v13 = vsel %vm1408_vm14, %v1393_v32, %v1314_v43  ;;  %v1188_v29 = vpop.permute.xlu0 %1187  ;;  %v87_v43 = vadd.s32 224, %v4259_v7 }
  0xbd   :  { %3966 = vmatmul.mubr.msk.f32.vlgmr.msra.gmra.mrb[0].mxu1 %vm1450_vm15, %v1426_v13  ;;  %v1394_v42 = vsel %vm6208_vm13, %v4504_v62, %v1188_v29 }
  0xbf   :  { %v1190_v45 = vpop.permute.xlu1 %1189 }
  0xc0   :  { %v1316_v14 = vpop.permute.xlu0 %1315  ;;  %v1395_v44 = vsel %vm6208_vm13, %v4507_v63, %v1190_v45  ;;  %v809_v63 = vrot.slane %v4548_v34, 7  ;;  %v813_v34 = vrot.slane %v4564_v41, 7 }
  0xc1   :  { %v1427_v48 = vsel %vm1408_vm14, %v1394_v42, %v1316_v14  ;;  %v291_v14 = vand.u32 31, %v87_v43  ;;  %v4866_v43 = vld [vmem:[%s6183_s2] ss:$0 sm:$0xff] }
  0xc2   :  { %3968 = vmatprep.mubr.msk.f32.mxu1 %vm1450_vm15, %v1427_v48  ;;  %v810_v24 = vsel %vm765_vm6, %v807_v51, %v809_v63  ;;  %v812_v12 = vsel %vm765_vm6, %v809_v63, %v811_v59  ;;  %v814_v30 = vsel %vm765_vm6, %v811_v59, %v813_v34  ;;  %v816_v29 = vsel %vm765_vm6, %v813_v34, %v815_v27 }
  0xc3   :  { %v1318_v4 = vpop.permute.xlu1 %1317  ;;  %v949_v56 = vsel %vm6193_vm5, %v814_v30, 0.0 }
  0xc4   :  { %v1428_v62 = vsel %vm1408_vm14, %v1395_v44, %v1318_v4  ;;  %v1192_v38 = vpop.permute.xlu0 %1191  ;;  %v819_v44 = vrot.slane %v4605_v5, 7  ;;  %v818_v4 = vsel %vm765_vm6, %v815_v27, %v817_v54 }
  0xc5   :  { %3969 = vmatmul.mubr.msk.f32.gmra.mrb[2].mxu1 %vm1450_vm15, %v1428_v62  ;;  %v1396_v23 = vsel %vm6208_vm13, %v945_v1, %v1192_v38  ;;  %v4829_v38 = vadd.s32 4294967295, %v291_v14 }
  0xc7   :  { %v1194_v53 = vpop.permute.xlu1 %1193  ;;  %6219 = vst [vmem:[#allocation7_spill] sm:$0xff] %v4829_v38  ;;  %vm535_vm5 = vcmp.ge.s32.totalorder %v4829_v38, 0 }
  0xc8   :  { %v1320_v57 = vpop.permute.xlu0 %1319  ;;  %v1397_v25 = vsel %vm6208_vm13, %v808_v28, %v1194_v53  ;;  %v822_v53 = vsel %vm765_vm6, %v819_v44, %v821_v60 }
  0xc9   :  { %v1429_v58 = vsel %vm1408_vm14, %v1396_v23, %v1320_v57  ;;  %v820_v23 = vsel %vm765_vm6, %v817_v54, %v819_v44 }
  0xca   :  { %3971 = vmatprep.mubr.msk.f32.mxu1 %vm1450_vm15, %v1429_v58 }
  0xcb   :  { %v1322_v61 = vpop.permute.xlu1 %1321 }
  0xcc   :  { %v1430_v11 = vsel %vm1408_vm14, %v1397_v25, %v1322_v61  ;;  %v1196_v0 = vpop.permute.xlu0 %1195  ;;  %v953_v25 = vsel %vm535_vm5, %v822_v53, 0.0  ;;  %v2389_v53 = vld [vmem:[%s6184_s3 + $0x8] sm:$0xff] }
  0xcd   :  { %3972 = vmatmul.mubr.msk.f32.gmra.mrb[4].mxu1 %vm1450_vm15, %v1430_v11  ;;  %v1398_v10 = vsel %vm6208_vm13, %v810_v24, %v1196_v0  ;;  %v824_v24 = vsel %vm765_vm6, %v821_v60, %v823_v55  ;;  %v825_v0 = vrot.slane %v4650_v50, 7 }
  0xcf   :  { %v1198_v2 = vpop.permute.xlu1 %1197  ;;  %v827_v50 = vsel %vm765_vm6, %v825_v0, %v732_v36 }
  0xd0   :  { %v1324_v40 = vpop.permute.xlu0 %1323  ;;  %v1399_v6 = vsel %vm6208_vm13, %v812_v12, %v1198_v2  ;;  %v826_v2 = vsel %vm765_vm6, %v823_v55, %v825_v0  ;;  %v2391_v55 = vld [vmem:[%s6184_s3 + $0x18] sm:$0xff] }
  0xd1   :  { %v1431_v26 = vsel %vm1408_vm14, %v1398_v10, %v1324_v40  ;;  %v2395_v0 = vld [vmem:[%s6184_s3 + $0x38] sm:$0xff] }
  0xd2   :  { %3974 = vmatprep.mubr.msk.f32.mxu1 %vm1450_vm15, %v1431_v26 }
  0xd3   :  { %v1326_v41 = vpop.permute.xlu1 %1325 }
  0xd4   :  { %v1432_v3 = vsel %vm1408_vm14, %v1399_v6, %v1326_v41  ;;  %v1200_v32 = vpop.permute.xlu0 %1199 }
  0xd5   :  { %3975 = vmatmul.mubr.msk.f32.gmra.mrb[6].mxu1 %vm1450_vm15, %v1432_v3  ;;  %v1400_v13 = vsel %vm6208_vm13, %v949_v56, %v1200_v32 }
  0xd7   :  { %v1202_v42 = vpop.permute.xlu1 %1201 }
  0xd8   :  { %v1328_v45 = vpop.permute.xlu0 %1327  ;;  %v1401_v48 = vsel %vm6208_vm13, %v816_v29, %v1202_v42 }
  0xd9   :  { %v1433_v51 = vsel %vm1408_vm14, %v1400_v13, %v1328_v45 }
  0xda   :  { %3977 = vmatprep.mubr.msk.f32.mxu1 %vm1450_vm15, %v1433_v51 }
  0xdb   :  { %v1330_v7 = vpop.permute.xlu1 %1329 }
  0xdc   :  { %v1434_v1 = vsel %vm1408_vm14, %v1401_v48, %v1330_v7  ;;  %v1204_v62 = vpop.permute.xlu0 %1203 }
  0xdd   :  { %3978 = vmatmul.mubr.msk.f32.gmra.mrb[8].mxu1 %vm1450_vm15, %v1434_v1  ;;  %v1402_v19 = vsel %vm6208_vm13, %v818_v4, %v1204_v62 }
  0xdf   :  { %v1206_v28 = vpop.permute.xlu1 %1205 }
  0xe0   :  { %v1332_v5 = vpop.permute.xlu0 %1331  ;;  %v1403_v63 = vsel %vm6208_vm13, %v820_v23, %v1206_v28 }
  0xe1   :  { %v1435_v57 = vsel %vm1408_vm14, %v1402_v19, %v1332_v5  ;;  %v2388_v5 = vld [vmem:[%s6184_s3] sm:$0xff] }
  0xe2   :  { %3980 = vmatprep.mubr.msk.f32.mxu1 %vm1450_vm15, %v1435_v57  ;;  %v2390_v57 = vld [vmem:[%s6184_s3 + $0x10] sm:$0xff] }
  0xe3   :  { %v1334_v8 = vpop.permute.xlu1 %1333 }
  0xe4   :  { %v1436_v58 = vsel %vm1408_vm14, %v1403_v63, %v1334_v8  ;;  %v1208_v59 = vpop.permute.xlu0 %1207  ;;  %v4139_v63 = vpack.c.bf16 %v2389_v53, %v2388_v5  ;;  %v4143_v8 = vpack.c.bf16 %v2391_v55, %v2390_v57 }
  0xe5   :  { %3981 = vmatmul.mubr.msk.f32.gmra.mrb[10].mxu1 %vm1450_vm15, %v1436_v58  ;;  %v1404_v61 = vsel %vm6208_vm13, %v953_v25, %v1208_v59  ;;  %v2392_v59 = vld [vmem:[%s6184_s3 + $0x20] sm:$0xff] }
  0xe6   :  { %4140 = vmatprep.subr.bf16.mxu1 %v4139_v63 }
  0xe7   :  { %v1210_v11 = vpop.permute.xlu1 %1209  ;;  %4142 = vmatpush3.bf16.msra.mxu1 %v4139_v63 }
  0xe8   :  { %v1336_v34 = vpop.permute.xlu0 %1335  ;;  %v1405_v37 = vsel %vm6208_vm13, %v824_v24, %v1210_v11  ;;  %4144 = vmatprep.subr.bf16.mxu1 %v4143_v8  ;;  %v2394_v11 = vld [vmem:[%s6184_s3 + $0x30] sm:$0xff] }
  0xe9   :  { %v1437_v10 = vsel %vm1408_vm14, %v1404_v61, %v1336_v34  ;;  %v2393_v61 = vld [vmem:[%s6184_s3 + $0x28] sm:$0xff]  ;;  %v4151_v34 = vpack.c.bf16 %v2395_v0, %v2394_v11 }
  0xea   :  { %3983 = vmatprep.mubr.msk.f32.mxu1 %vm1450_vm15, %v1437_v10  ;;  %v4147_v24 = vpack.c.bf16 %v2393_v61, %v2392_v59 }
  0xeb   :  { %v1338_v12 = vpop.permute.xlu1 %1337  ;;  %4146 = vmatpush3.bf16.msra.mxu1 %v4143_v8 }
  0xec   :  { %v1438_v40 = vsel %vm1408_vm14, %v1405_v37, %v1338_v12  ;;  %v1212_v30 = vpop.permute.xlu0 %1211  ;;  %4148 = vmatprep.subr.bf16.mxu1 %v4147_v24  ;;  %v2396_v12 = vld [vmem:[%s6184_s3 + $0x40] sm:$0xff] }
  0xed   :  { %3984 = vmatmul.mubr.msk.f32.gmra.mrb[12].mxu1 %vm1450_vm15, %v1438_v40  ;;  %v1406_v6 = vsel %vm6208_vm13, %v826_v2, %v1212_v30  ;;  %v2397_v2 = vld [vmem:[%s6184_s3 + $0x48] sm:$0xff]  ;;  %v2398_v30 = vld [vmem:[%s6184_s3 + $0x50] sm:$0xff] }
  0xee   :  { %v4155_v40 = vpack.c.bf16 %v2397_v2, %v2396_v12 }
  0xef   :  { %v1214_v26 = vpop.permute.xlu1 %1213  ;;  %4150 = vmatpush3.bf16.msra.mxu1 %v4147_v24 }
  0xf0   :  { %v1340_v27 = vpop.permute.xlu0 %1339  ;;  %v1407_v41 = vsel %vm6208_vm13, %v827_v50, %v1214_v26  ;;  %4152 = vmatprep.subr.bf16.mxu1 %v4151_v34  ;;  %vm2407_vm13 = vcmask 785408  }
  0xf1   :  { %v1439_v56 = vsel %vm1408_vm14, %v1406_v6, %v1340_v27  ;;  %v2399_v6 = vld [vmem:[%s6184_s3 + $0x58] sm:$0xff]  ;;  %s4198_s3 = smov 64  }
  0xf2   :  { %3986 = vmatprep.mubr.msk.f32.mxu1 %vm1450_vm15, %v1439_v56  ;;  %v4159_v50 = vpack.c.bf16 %v2399_v6, %v2398_v30 }
  0xf3   :  { %v1342_v3 = vpop.permute.xlu1 %1341  ;;  %4154 = vmatpush3.bf16.msra.mxu1 %v4151_v34 }
  0xf4   :  { %v1440_v32 = vsel %vm1408_vm14, %v1407_v41, %v1342_v3  ;;  %4156 = vmatprep.subr.bf16.mxu1 %v4155_v40  ;;  %vm2355_vm14 = vcmask 523264  }
  0xf5   :  { %3987 = vmatmul.mubr.msk.f32.gmra.mrb[14].mxu1 %vm1450_vm15, %v1440_v32  ;;  %vm2322_vm15 = vcmask 261120  }
  0xf7   :  { %4158 = vmatpush3.bf16.msra.mxu1 %v4155_v40 }
  0xf8   :  { %4160 = vmatprep.subr.bf16.mxu1 %v4159_v50 }
  0xfb   :  { %4162 = vmatpush3.bf16.msra.mxu1 %v4159_v50 }
 0x150   :  { %v3943_v47 = vpop.f32.mrb[0].mxu0 }
 0x151   :  { %v1623_v36 = vadd.f32 %v3943_v47, %v4866_v43  ;;  %v1617_v13 = vpop.f32.mrb[1].mxu0 }
 0x152   :  { %v1618_v29 = vadd.f32 %v4866_v43, %v1617_v13 }
 0x153   :  { %v4870_v42 = vmax.f32 %v1623_v36, 0.0 }
 0x154   :  { %v4872_v54 = vmax.f32 %v1618_v29, 0.0 }
 0x155   :  { %v6195_v45 = vrot.slane %v4870_v42, 7  ;;  %2100 = vrot.lane.b32.xlu1 %v4870_v42, %s4197_s12  ;;  %v1970_v13 = vrot.slane %v4870_v42, 1 }
 0x156   :  { %v6198_v14 = vrot.slane %v4872_v54, 7  ;;  %2098 = vrot.lane.b32.xlu0 %v4872_v54, %s4197_s12  ;;  %v6196_v29 = vrot.slane %v4872_v54, 1 }
 0x158   :  { %v3946_v48 = vpop.f32.mrb[2].mxu0  ;;  %v4885_v51 = vsel %vm765_vm6, %v6198_v14, %v6195_v45  ;;  %v1971_v11 = vsel %vm957_vm0, %v6196_v29, %v1970_v13 }
 0x159   :  { %v1627_v44 = vpop.f32.mrb[3].mxu0  ;;  %v1633_v3 = vadd.f32 %v3946_v48, %v4866_v43 }
 0x15a   :  { %v1628_v32 = vadd.f32 %v4866_v43, %v1627_v44 }
 0x15b   :  { %v4960_v48 = vmax.f32 %v1633_v3, 0.0 }
 0x15c   :  { %v4962_v44 = vmax.f32 %v1628_v32, 0.0 }
 0x15e   :  { %v1972_v34 = vrot.slane %v4962_v44, 1 }
 0x160   :  { %v4887_v7 = vpop.f32.mrb[4].mxu0 }
 0x161   :  { %v4889_v4 = vpop.f32.mrb[5].mxu0 }
 0x168   :  { %v4891_v1 = vpop.f32.mrb[6].mxu0 }
 0x169   :  { %v4893_v62 = vpop.f32.mrb[7].mxu0 }
 0x170   :  { %v4895_v60 = vpop.f32.mrb[8].mxu0 }
 0x171   :  { %v4897_v19 = vpop.f32.mrb[9].mxu0 }
 0x172   :  { %v1658_v21 = vadd.f32 %v4866_v43, %v4897_v19 }
 0x178   :  { %v4899_v23 = vpop.f32.mrb[10].mxu0 }
 0x179   :  { %v4901_v28 = vpop.f32.mrb[11].mxu0 }
 0x180   :  { %v4915_v25 = vpop.f32.mrb[12].mxu0 }
 0x181   :  { %v4917_v58 = vpop.f32.mrb[13].mxu0 }
 0x188   :  { %v4931_v37 = vpop.f32.mrb[14].mxu0 }
 0x189   :  { %v4933_v10 = vpop.f32.mrb[15].mxu0 }
 0x190   :  { %v3967_v26 = vpop.f32.mrb[0].mxu1 }
 0x191   :  { %v1703_v27 = vadd.f32 %v3967_v26, %v4866_v43  ;;  %v1697_v41 = vpop.f32.mrb[1].mxu1  ;;  %v1643_v26 = vadd.f32 %v4887_v7, %v4866_v43 }
 0x192   :  { %v1698_v56 = vadd.f32 %v4866_v43, %v1697_v41 }
 0x193   :  { %v1793_v47 = vmax.f32 %v1703_v27, 0.0  ;;  %v1973_v27 = vsel %vm957_vm0, %v1970_v13, %v1972_v34  ;;  %v4999_v13 = vmax.f32 %v1643_v26, 0.0 }
 0x194   :  { %v4951_v36 = vmax.f32 %v1698_v56, 0.0 }
 0x195   :  { %v1875_v5 = vrot.slane %v1793_v47, 7  ;;  %v2002_v53 = vrot.slane %v1793_v47, 1  ;;  %2132 = vrot.lane.b32.xlu1 %v1793_v47, %s4197_s12 }
 0x196   :  { %v6194_v63 = vrot.slane %v4951_v36, 7  ;;  %v6197_v57 = vrot.slane %v4951_v36, 1  ;;  %2130 = vrot.lane.b32.xlu0 %v4951_v36, %s4197_s12 }
 0x198   :  { %v3970_v55 = vpop.f32.mrb[2].mxu1  ;;  %v2003_v8 = vsel %vm957_vm0, %v6197_v57, %v2002_v53  ;;  %v4970_v59 = vsel %vm765_vm6, %v6194_v63, %v1875_v5 }
 0x199   :  { %v1713_v61 = vadd.f32 %v3970_v55, %v4866_v43  ;;  %v1707_v24 = vpop.f32.mrb[3].mxu1  ;;  %2104 = vrot.lane.b32.xlu1 %v4960_v48, %s4197_s12 }
 0x19a   :  { %v1708_v0 = vadd.f32 %v4866_v43, %v1707_v24  ;;  %2226 = vrot.lane.b32.xlu0 %v1971_v11, %s4198_s3  ;;  %v1974_v24 = vrot.slane %v4960_v48, 1 }
 0x19b   :  { %v1795_v12 = vmax.f32 %v1713_v61, 0.0 }
 0x19c   :  { %v1794_v2 = vmax.f32 %v1708_v0, 0.0 }
 0x19d   :  { %v1879_v40 = vrot.slane %v1795_v12, 7  ;;  %v2006_v30 = vrot.slane %v1795_v12, 1  ;;  %2136 = vrot.lane.b32.xlu1 %v1795_v12, %s4197_s12 }
 0x19e   :  { %v1877_v6 = vrot.slane %v1794_v2, 7  ;;  %v2004_v50 = vrot.slane %v1794_v2, 1  ;;  %2258 = vrot.lane.b32.xlu0 %v2003_v8, %s4198_s3 }
 0x1a0   :  { %v3973_v41 = vpop.f32.mrb[4].mxu1  ;;  %v2005_v56 = vsel %vm957_vm0, %v2002_v53, %v2004_v50  ;;  %v2007_v3 = vsel %vm957_vm0, %v2004_v50, %v2006_v30  ;;  %v4989_v32 = vsel %vm765_vm6, %v1877_v6, %v1879_v40  ;;  %v4992_v47 = vsel %vm765_vm6, %v1875_v5, %v1877_v6 }
 0x1a1   :  { %6220 = vst [vmem:[#allocation8_spill] sm:$0xff] %v4989_v32  ;;  %v1723_v55 = vadd.f32 %v3973_v41, %v4866_v43  ;;  %v1717_v61 = vpop.f32.mrb[5].mxu1  ;;  %2228 = vrot.lane.b32.xlu1 %v1973_v27, %s4198_s3  ;;  %v1638_v6 = vadd.f32 %v4866_v43, %v4889_v4 }
 0x1a2   :  { %v1718_v7 = vadd.f32 %v4866_v43, %v1717_v61  ;;  %2102 = vrot.lane.b32.xlu0 %v4962_v44, %s4197_s12 }
 0x1a3   :  { %v1797_v53 = vmax.f32 %v1723_v55, 0.0 }
 0x1a4   :  { %v1796_v8 = vmax.f32 %v1718_v7, 0.0 }
 0x1a5   :  { %v1883_v11 = vrot.slane %v1797_v53, 7  ;;  %v2010_v0 = vrot.slane %v1797_v53, 1  ;;  %2108 = vrot.lane.b32.xlu1 %v4999_v13, %s4197_s12 }
 0x1a6   :  { %v1881_v5 = vrot.slane %v1796_v8, 7  ;;  %v2008_v12 = vrot.slane %v1796_v8, 1  ;;  %2134 = vrot.lane.b32.xlu0 %v1794_v2, %s4197_s12  ;;  %v1975_v2 = vsel %vm957_vm0, %v1972_v34, %v1974_v24 }
 0x1a8   :  { %v3976_v50 = vpop.f32.mrb[6].mxu1  ;;  %v2009_v26 = vsel %vm957_vm0, %v2006_v30, %v2008_v12  ;;  %v2011_v27 = vsel %vm957_vm0, %v2008_v12, %v2010_v0  ;;  %v5010_v41 = vsel %vm765_vm6, %v1881_v5, %v1883_v11  ;;  %v5013_v55 = vsel %vm765_vm6, %v1879_v40, %v1881_v5 }
 0x1a9   :  { %6221 = vst [vmem:[#allocation9_spill] sm:$0xff] %v5010_v41  ;;  %6222 = vst [vmem:[#allocation10_spill] sm:$0xff] %v5013_v55  ;;  %v1733_v61 = vadd.f32 %v3976_v50, %v4866_v43  ;;  %v1727_v7 = vpop.f32.mrb[7].mxu1  ;;  %2260 = vrot.lane.b32.xlu1 %v2005_v56, %s4198_s3  ;;  %v5020_v30 = vmax.f32 %v1638_v6, 0.0  ;;  %v1653_v12 = vadd.f32 %v4891_v1, %v4866_v43 }
 0x1aa   :  { %v1728_v4 = vadd.f32 %v4866_v43, %v1727_v7  ;;  %2230 = vrot.lane.b32.xlu0 %v1975_v2, %s4198_s3  ;;  %v1678_v55 = vadd.f32 %v4866_v43, %v4917_v58 }
 0x1ab   :  { %v1799_v63 = vmax.f32 %v1733_v61, 0.0  ;;  %v1976_v50 = vrot.slane %v5020_v30, 1  ;;  %v5031_v6 = vmax.f32 %v1653_v12, 0.0 }
 0x1ac   :  { %v5024_v45 = vmax.f32 %v1728_v4, 0.0  ;;  %v5208_v58 = vmax.f32 %v1678_v55, 0.0 }
 0x1ad   :  { %v1887_v40 = vrot.slane %v1799_v63, 7  ;;  %v2014_v5 = vrot.slane %v1799_v63, 1  ;;  %2140 = vrot.lane.b32.xlu1 %v1797_v53, %s4197_s12 }
 0x1ae   :  { %v1885_v56 = vrot.slane %v5024_v45, 7  ;;  %v2012_v34 = vrot.slane %v5024_v45, 1  ;;  %2262 = vrot.lane.b32.xlu0 %v2007_v3, %s4198_s3 }
 0x1b0   :  { %v3979_v7 = vpop.f32.mrb[8].mxu1  ;;  %v5034_v1 = vsel %vm957_vm0, %v2010_v0, %v2012_v34  ;;  %v5037_v61 = vsel %vm957_vm0, %v2012_v34, %v2014_v5  ;;  %v5040_v2 = vsel %vm765_vm6, %v1885_v56, %v1887_v40  ;;  %v5043_v53 = vsel %vm765_vm6, %v1883_v11, %v1885_v56 }
 0x1b1   :  { %6223 = vst [vmem:[#allocation11_spill] sm:$0xff] %v5040_v2  ;;  %6224 = vst [vmem:[#allocation12_spill] sm:$0xff] %v5043_v53  ;;  %v1743_v4 = vadd.f32 %v3979_v7, %v4866_v43  ;;  %v1737_v3 = vpop.f32.mrb[9].mxu1  ;;  %2112 = vrot.lane.b32.xlu1 %v5031_v6, %s4197_s12  ;;  %v1648_v0 = vadd.f32 %v4866_v43, %v4893_v62  ;;  %v1977_v11 = vsel %vm957_vm0, %v1974_v24, %v1976_v50 }
 0x1b2   :  { %v1738_v12 = vadd.f32 %v4866_v43, %v1737_v3  ;;  %2106 = vrot.lane.b32.xlu0 %v5020_v30, %s4197_s12  ;;  %v1978_v56 = vrot.slane %v4999_v13, 1 }
 0x1b3   :  { %v5053_v34 = vmax.f32 %v1743_v4, 0.0  ;;  %v5065_v62 = vmax.f32 %v1648_v0, 0.0  ;;  %v2069_v4 = vsel %vm670_vm1, %v1977_v11, 0.0 }
 0x1b4   :  { %v5055_v29 = vmax.f32 %v1738_v12, 0.0 }
 0x1b5   :  { %v1891_v7 = vrot.slane %v5053_v34, 7  ;;  %v2018_v57 = vrot.slane %v5053_v34, 1  ;;  %2144 = vrot.lane.b32.xlu1 %v1799_v63, %s4197_s12 }
 0x1b6   :  { %v1889_v3 = vrot.slane %v5055_v29, 7  ;;  %v2016_v14 = vrot.slane %v5055_v29, 1  ;;  %2138 = vrot.lane.b32.xlu0 %v1796_v8, %s4197_s12  ;;  %v1979_v8 = vsel %vm957_vm0, %v1976_v50, %v1978_v56 }
 0x1b8   :  { %v3982_v24 = vpop.f32.mrb[10].mxu1  ;;  %v5070_v12 = vsel %vm957_vm0, %v2014_v5, %v2016_v14  ;;  %v5073_v38 = vsel %vm957_vm0, %v2016_v14, %v2018_v57  ;;  %v5076_v63 = vsel %vm765_vm6, %v1889_v3, %v1891_v7  ;;  %v5079_v15 = vsel %vm765_vm6, %v1887_v40, %v1889_v3 }
 0x1b9   :  { %6225 = vst [vmem:[#allocation13_spill] sm:$0xff] %v5076_v63  ;;  %6226 = vst [vmem:[#allocation14_spill] sm:$0xff] %v5079_v15  ;;  %2232 = vrot.lane.b32.xlu1 %v2069_v4, %s4198_s3  ;;  %v1753_v0 = vadd.f32 %v3982_v24, %v4866_v43  ;;  %v1747_v11 = vpop.f32.mrb[11].mxu1  ;;  %v1980_v14 = vrot.slane %v5065_v62, 1  ;;  %v2085_v63 = vsel %vm686_vm9, %v2009_v26, 0.0 }
 0x1ba   :  { %2234 = vrot.lane.b32.xlu0 %v1979_v8, %s4198_s3  ;;  %v1748_v5 = vadd.f32 %v4866_v43, %v1747_v11  ;;  %v1663_v8 = vadd.f32 %v4895_v60, %v4866_v43 }
 0x1bb   :  { %v5087_v16 = vmax.f32 %v1753_v0, 0.0  ;;  %v1981_v0 = vsel %vm957_vm0, %v1978_v56, %v1980_v14 }
 0x1bc   :  { %v5091_v40 = vmax.f32 %v1748_v5, 0.0 }
 0x1bd   :  { %2264 = vrot.lane.b32.xlu1 %v2085_v63, %s4198_s3  ;;  %v1895_v50 = vrot.slane %v5087_v16, 7  ;;  %v2022_v3 = vrot.slane %v5087_v16, 1 }
 0x1be   :  { %2266 = vrot.lane.b32.xlu0 %v2011_v27, %s4198_s3  ;;  %v1893_v4 = vrot.slane %v5091_v40, 7  ;;  %v2020_v24 = vrot.slane %v5091_v40, 1 }
 0x1c0   :  { %v3985_v26 = vpop.f32.mrb[12].mxu1  ;;  %v5103_v11 = vsel %vm957_vm0, %v2018_v57, %v2020_v24  ;;  %v5106_v63 = vsel %vm957_vm0, %v2020_v24, %v2022_v3  ;;  %v5109_v27 = vsel %vm765_vm6, %v1893_v4, %v1895_v50  ;;  %v5112_v5 = vsel %vm765_vm6, %v1891_v7, %v1893_v4 }
 0x1c1   :  { %6227 = vst [vmem:[#allocation15_spill] sm:$0xff] %v5109_v27  ;;  %6228 = vst [vmem:[#allocation16_spill] sm:$0xff] %v5112_v5  ;;  %2236 = vrot.lane.b32.xlu1 %v1981_v0, %s4198_s3  ;;  %v1763_v60 = vadd.f32 %v3985_v26, %v4866_v43  ;;  %v1757_v56 = vpop.f32.mrb[13].mxu1  ;;  %v5121_v24 = vmax.f32 %v1663_v8, 0.0  ;;  %v1982_v7 = vrot.slane %v5031_v6, 1  ;;  %v5128_v4 = vmax.f32 %v1658_v21, 0.0 }
 0x1c2   :  { %2110 = vrot.lane.b32.xlu0 %v5065_v62, %s4197_s12  ;;  %v1758_v57 = vadd.f32 %v4866_v43, %v1757_v56  ;;  %v1668_v21 = vadd.f32 %v4866_v43, %v4901_v28 }
 0x1c3   :  { %v5123_v15 = vmax.f32 %v1763_v60, 0.0  ;;  %v1673_v60 = vadd.f32 %v4899_v23, %v4866_v43  ;;  %v1983_v23 = vsel %vm957_vm0, %v1980_v14, %v1982_v7 }
 0x1c4   :  { %v5125_v27 = vmax.f32 %v1758_v57, 0.0  ;;  %v5165_v33 = vmax.f32 %v1668_v21, 0.0  ;;  %v6231_v21 = vrot.slane %v4872_v54, 7 }
 0x1c5   :  { %2116 = vrot.lane.b32.xlu1 %v5121_v24, %s4197_s12  ;;  %v1899_v19 = vrot.slane %v5123_v15, 7  ;;  %v2026_v0 = vrot.slane %v5123_v15, 1 }
 0x1c6   :  { %2142 = vrot.lane.b32.xlu0 %v5024_v45, %s4197_s12  ;;  %v1897_v8 = vrot.slane %v5125_v27, 7  ;;  %v2024_v26 = vrot.slane %v5125_v27, 1  ;;  %v1984_v45 = vrot.slane %v5128_v4, 1 }
 0x1c8   :  { %v3988_v56 = vpop.f32.mrb[14].mxu1  ;;  %v5143_v57 = vsel %vm957_vm0, %v2022_v3, %v2024_v26  ;;  %v5146_v5 = vsel %vm957_vm0, %v2024_v26, %v2026_v0  ;;  %v5149_v2 = vsel %vm765_vm6, %v1897_v8, %v1899_v19  ;;  %v5157_v41 = vsel %vm765_vm6, %v1895_v50, %v1897_v8 }
 0x1c9   :  { %6229 = vst [vmem:[#allocation17_spill] sm:$0xff] %v5149_v2  ;;  %v1773_v53 = vadd.f32 %v3988_v56, %v4866_v43  ;;  %2268 = vrot.lane.b32.xlu1 %v5034_v1, %s4198_s3  ;;  %v1767_v28 = vpop.f32.mrb[15].mxu1  ;;  %6230 = vst [vmem:[#allocation18_spill] sm:$0xff] %v5157_v41  ;;  %v5161_v26 = vmax.f32 %v1673_v60, 0.0  ;;  %v1986_v1 = vrot.slane %v5121_v24, 1  ;;  %v1985_v50 = vsel %vm957_vm0, %v1982_v7, %v1984_v45 }
 0x1ca   :  { %2238 = vrot.lane.b32.xlu0 %v1983_v23, %s4198_s3  ;;  %v1768_v3 = vadd.f32 %v4866_v43, %v1767_v28  ;;  %v1988_v28 = vrot.slane %v5165_v33, 1 }
 0x1cb   :  { %v5163_v2 = vmax.f32 %v1773_v53, 0.0 }
 0x1cc   :  { %v5167_v56 = vmax.f32 %v1768_v3, 0.0  ;;  %v2073_v3 = vsel %vm674_vm3, %v1985_v50, 0.0  ;;  %v1989_v50 = vsel %vm957_vm0, %v1986_v1, %v1988_v28 }
 0x1cd   :  { %v1809_v14 = vrot.slane %v5163_v2, 7  ;;  %2120 = vrot.lane.b32.xlu1 %v5161_v26, %s4197_s12  ;;  %v2030_v8 = vrot.slane %v5163_v2, 1 }
 0x1ce   :  { %2114 = vrot.lane.b32.xlu0 %v5128_v4, %s4197_s12  ;;  %v1901_v53 = vrot.slane %v5167_v56, 7  ;;  %v2028_v60 = vrot.slane %v5167_v56, 1 }
 0x1cf   :  { %v5182_v23 = vsel %vm765_vm6, %v1809_v14, %v6231_v21  ;;  %v1987_v21 = vsel %vm957_vm0, %v1984_v45, %v1986_v1 }
 0x1d0   :  { %v2029_v7 = vsel %vm957_vm0, %v2026_v0, %v2028_v60  ;;  %v5191_v41 = vsel %vm957_vm0, %v2028_v60, %v2030_v8  ;;  %v5198_v32 = vsel %vm765_vm6, %v1901_v53, %v1809_v14  ;;  %v5201_v31 = vsel %vm765_vm6, %v1899_v19, %v1901_v53 }
 0x1d1   :  { %2240 = vrot.lane.b32.xlu1 %v2073_v3, %s4198_s3  ;;  %v1683_v0 = vadd.f32 %v4915_v25, %v4866_v43  ;;  %v1990_v60 = vrot.slane %v5161_v26, 1  ;;  %v1693_v19 = vadd.f32 %v4931_v37, %v4866_v43  ;;  %v1688_v14 = vadd.f32 %v4866_v43, %v4933_v10 }
 0x1d2   :  { %2242 = vrot.lane.b32.xlu0 %v1987_v21, %s4198_s3  ;;  %v1992_v25 = vrot.slane %v5208_v58, 1 }
 0x1d3   :  { %v5213_v45 = vmax.f32 %v1683_v0, 0.0  ;;  %v1991_v55 = vsel %vm957_vm0, %v1988_v28, %v1990_v60  ;;  %v5224_v1 = vmax.f32 %v1693_v19, 0.0  ;;  %v5226_v53 = vmax.f32 %v1688_v14, 0.0 }
 0x1d4   :  { %v1993_v43 = vsel %vm957_vm0, %v1990_v60, %v1992_v25 }
 0x1d5   :  { %2244 = vrot.lane.b32.xlu1 %v1989_v50, %s4198_s3  ;;  %v1994_v3 = vrot.slane %v5213_v45, 1  ;;  %v1996_v37 = vrot.slane %v5226_v53, 1  ;;  %v2077_v10 = vsel %vm678_vm7, %v1993_v43, 0.0  ;;  %v1998_v21 = vrot.slane %v5224_v1, 1 }
 0x1d6   :  { %2118 = vrot.lane.b32.xlu0 %v5165_v33, %s4197_s12  ;;  %v6232_v50 = vrot.slane %v4951_v36, 1 }
 0x1d7   :  { %v1995_v28 = vsel %vm957_vm0, %v1992_v25, %v1994_v3  ;;  %v1997_v0 = vsel %vm957_vm0, %v1994_v3, %v1996_v37  ;;  %v1999_v14 = vsel %vm957_vm0, %v1996_v37, %v1998_v21  ;;  %v2089_v25 = vsel %vm690_vm10, %v5070_v12, 0.0 }
 0x1d8   :  { %v2001_v60 = vsel %vm957_vm0, %v1998_v21, %v6232_v50  ;;  %v1937_v12 = vsel %vm507_vm12, %v5182_v23, 0.0 }
 0x1d9   :  { %2124 = vrot.lane.b32.xlu1 %v5213_v45, %s4197_s12  ;;  %v2081_v19 = vsel %vm682_vm8, %v2001_v60, 0.0  ;;  %v1849_v60 = vrot.slane %v5020_v30, 7 }
 0x1da   :  { %2246 = vrot.lane.b32.xlu0 %v1991_v55, %s4198_s3  ;;  %v1845_v55 = vrot.slane %v4962_v44, 7 }
 0x1dd   :  { %2128 = vrot.lane.b32.xlu1 %v5224_v1, %s4197_s12 }
 0x1de   :  { %2122 = vrot.lane.b32.xlu0 %v5208_v58, %s4197_s12 }
 0x1e1   :  { %2248 = vrot.lane.b32.xlu1 %v2077_v10, %s4198_s3 }
 0x1e2   :  { %2250 = vrot.lane.b32.xlu0 %v1995_v28, %s4198_s3 }
 0x1e5   :  { %2252 = vrot.lane.b32.xlu1 %v1997_v0, %s4198_s3 }
 0x1e6   :  { %2126 = vrot.lane.b32.xlu0 %v5226_v53, %s4197_s12 }
 0x1e9   :  { %2256 = vrot.lane.b32.xlu1 %v2081_v19, %s4198_s3 }
 0x1ea   :  { %2254 = vrot.lane.b32.xlu0 %v1999_v14, %s4198_s3 }
 0x1ed   :  { %2272 = vrot.lane.b32.xlu1 %v2089_v25, %s4198_s3 }
 0x1ee   :  { %2270 = vrot.lane.b32.xlu0 %v5037_v61, %s4198_s3  ;;  %v2093_v61 = vsel %vm694_vm11, %v5143_v57, 0.0 }
 0x1f1   :  { %2148 = vrot.lane.b32.xlu1 %v5053_v34, %s4197_s12 }
 0x1f2   :  { %2146 = vrot.lane.b32.xlu0 %v5055_v29, %s4197_s12 }
 0x1f5   :  { %2276 = vrot.lane.b32.xlu1 %v5103_v11, %s4198_s3 }
 0x1f6   :  { %2274 = vrot.lane.b32.xlu0 %v5073_v38, %s4198_s3  ;;  %v2101_v38 = vpop.permute.xlu1 %2100 }
 0x1f9   :  { %2152 = vrot.lane.b32.xlu1 %v5087_v16, %s4197_s12  ;;  %v2099_v16 = vpop.permute.xlu0 %2098 }
 0x1fa   :  { %2150 = vrot.lane.b32.xlu0 %v5091_v40, %s4197_s12 }
 0x1fd   :  { %2280 = vrot.lane.b32.xlu1 %v2093_v61, %s4198_s3 }
 0x1fe   :  { %2278 = vrot.lane.b32.xlu0 %v5106_v63, %s4198_s3  ;;  %v2323_v63 = vsel %vm2322_vm15, %v1937_v12, %v2099_v16 }
 0x201   :  { %2156 = vrot.lane.b32.xlu1 %v5123_v15, %s4197_s12  ;;  %v6233_v15 = vrot.slane %v4872_v54, 1 }
 0x202   :  { %2154 = vrot.lane.b32.xlu0 %v5125_v27, %s4197_s12 }
 0x203   :  { %v2065_v40 = vsel %vm957_vm0, %v2030_v8, %v6233_v15 }
 0x205   :  { %2284 = vrot.lane.b32.xlu1 %v2029_v7, %s4198_s3 }
 0x206   :  { %2282 = vrot.lane.b32.xlu0 %v5146_v5, %s4198_s3  ;;  %v2097_v5 = vsel %vm698_vm2, %v2065_v40, 0.0 }
 0x207   :  { %v5284_v29 = vpop.permute.xlu1 %2132 }
 0x208   :  { %v5286_v34 = vpop.permute.xlu0 %2130 }
 0x209   :  { %2160 = vrot.lane.b32.xlu1 %v5163_v2, %s4197_s12 }
 0x20a   :  { %2158 = vrot.lane.b32.xlu0 %v5167_v56, %s4197_s12  ;;  %v2324_v56 = vsel %vm2322_vm15, %v4885_v51, %v2101_v38 }
 0x20b   :  { %v2105_v11 = vpop.permute.xlu1 %2104 }
 0x20c   :  { %v2227_v27 = vpop.permute.xlu0 %2226 }
 0x20d   :  { %v2356_v57 = vsel %vm2355_vm14, %v2323_v63, %v2227_v27  ;;  %2288 = vrot.lane.b32.xlu1 %v2097_v5, %s4198_s3  ;;  %v1851_v27 = vrot.slane %v4999_v13, 7 }
 0x20e   :  { %2286 = vrot.lane.b32.xlu0 %v5191_v41, %s4198_s3  ;;  %4013 = vmatprep.mubr.msk.f32.mxu1 %vm2407_vm13, %v2356_v57  ;;  %v6234_v41 = vrot.slane %v4870_v42, 7  ;;  %v1847_v42 = vrot.slane %v4960_v48, 7 }
 0x20f   :  { %v5308_v54 = vpop.permute.xlu1 %2136  ;;  %v1852_v57 = vsel %vm765_vm6, %v1849_v60, %v1851_v27 }
 0x210   :  { %v5310_v2 = vpop.permute.xlu0 %2258  ;;  %v1846_v37 = vsel %vm765_vm6, %v6234_v41, %v1845_v55  ;;  %v1850_v25 = vsel %vm765_vm6, %v1847_v42, %v1849_v60  ;;  %v1848_v38 = vsel %vm765_vm6, %v1845_v55, %v1847_v42  ;;  %v1853_v55 = vrot.slane %v5065_v62, 7 }
 0x211   :  { %v2326_v16 = vsel %vm2322_vm15, %v1848_v38, %v2105_v11  ;;  %v1941_v12 = vsel %vm6209_vm4, %v1850_v25, 0.0  ;;  %v1859_v38 = vrot.slane %v5121_v24, 7  ;;  %vm6235_vm4 = vcmp.ge.s32.totalorder %v4709_v39, 0 }
 0x212   :  { %v1861_v24 = vrot.slane %v5165_v33, 7  ;;  %v1863_v33 = vrot.slane %v5161_v26, 7 }
 0x213   :  { %v2229_v8 = vpop.permute.xlu1 %2228 }
 0x214   :  { %v2357_v23 = vsel %vm2355_vm14, %v2324_v56, %v2229_v8  ;;  %v2103_v7 = vpop.permute.xlu0 %2102 }
 0x215   :  { %4014 = vmatmul.mubr.msk.f32.vlgmr.msra.gmra.mrb[16].mxu1 %vm2407_vm13, %v2357_v23  ;;  %v2325_v28 = vsel %vm2322_vm15, %v1846_v37, %v2103_v7  ;;  %v1854_v37 = vsel %vm765_vm6, %v1851_v27, %v1853_v55 }
 0x217   :  { %v2109_v3 = vpop.permute.xlu1 %2108 }
 0x218   :  { %v5317_v43 = vpop.permute.xlu0 %2134  ;;  %v2328_v56 = vsel %vm2322_vm15, %v1852_v57, %v2109_v3 }
 0x21b   :  { %v5322_v10 = vpop.permute.xlu1 %2260 }
 0x21c   :  { %v2231_v51 = vpop.permute.xlu0 %2230 }
 0x21d   :  { %v2358_v21 = vsel %vm2355_vm14, %v2325_v28, %v2231_v51  ;;  %v1857_v51 = vrot.slane %v5128_v4, 7 }
 0x21e   :  { %4016 = vmatprep.mubr.msk.f32.mxu1 %vm2407_vm13, %v2358_v21 }
 0x21f   :  { %v5327_v0 = vpop.permute.xlu1 %2140 }
 0x220   :  { %v5329_v50 = vpop.permute.xlu0 %2262 }
 0x223   :  { %v2113_v44 = vpop.permute.xlu1 %2112 }
 0x224   :  { %v2107_v19 = vpop.permute.xlu0 %2106 }
 0x225   :  { %v2327_v40 = vsel %vm2322_vm15, %v1941_v12, %v2107_v19  ;;  %v1855_v19 = vrot.slane %v5031_v6, 7 }
 0x227   :  { %v5333_v14 = vpop.permute.xlu1 %2144  ;;  %v1858_v62 = vsel %vm765_vm6, %v1855_v19, %v1857_v51 }
 0x228   :  { %v5336_v61 = vpop.permute.xlu0 %2138  ;;  %v1945_v4 = vsel %vm6235_vm4, %v1858_v62, 0.0  ;;  %vm6236_vm4 = vcmp.ge.s32.totalorder %v4731_v20, 0 }
 0x22b   :  { %v2233_v15 = vpop.permute.xlu1 %2232 }
 0x22c   :  { %v2359_v30 = vsel %vm2355_vm14, %v2326_v16, %v2233_v15  ;;  %v2235_v63 = vpop.permute.xlu0 %2234  ;;  %v1856_v16 = vsel %vm765_vm6, %v1853_v55, %v1855_v19  ;;  %v1864_v19 = vsel %vm765_vm6, %v1861_v24, %v1863_v33 }
 0x22d   :  { %v2360_v48 = vsel %vm2355_vm14, %v2327_v40, %v2235_v63  ;;  %4017 = vmatmul.mubr.msk.f32.gmra.mrb[18].mxu1 %vm2407_vm13, %v2359_v30  ;;  %v2330_v12 = vsel %vm2322_vm15, %v1856_v16, %v2113_v44 }
 0x22e   :  { %4019 = vmatprep.mubr.msk.f32.mxu1 %vm2407_vm13, %v2360_v48  ;;  %v1860_v48 = vsel %vm765_vm6, %v1857_v51, %v1859_v38 }
 0x22f   :  { %v5348_v5 = vpop.permute.xlu1 %2264 }
 0x230   :  { %v5350_v11 = vpop.permute.xlu0 %2266 }
 0x233   :  { %v2237_v8 = vpop.permute.xlu1 %2236 }
 0x234   :  { %v2361_v23 = vsel %vm2355_vm14, %v2328_v56, %v2237_v8  ;;  %v2111_v7 = vpop.permute.xlu0 %2110  ;;  %v1862_v8 = vsel %vm765_vm6, %v1859_v38, %v1861_v24 }
 0x235   :  { %4020 = vmatmul.mubr.msk.f32.gmra.mrb[20].mxu1 %vm2407_vm13, %v2361_v23  ;;  %v2329_v21 = vsel %vm2322_vm15, %v1854_v37, %v2111_v7  ;;  %v1865_v7 = vrot.slane %v5208_v58, 7 }
 0x237   :  { %v2117_v41 = vpop.permute.xlu1 %2116 }
 0x238   :  { %v5357_v13 = vpop.permute.xlu0 %2142  ;;  %v2332_v44 = vsel %vm2322_vm15, %v1860_v48, %v2117_v41 }
 0x23b   :  { %v5360_v28 = vpop.permute.xlu1 %2268 }
 0x23c   :  { %v2239_v3 = vpop.permute.xlu0 %2238 }
 0x23d   :  { %v2362_v60 = vsel %vm2355_vm14, %v2329_v21, %v2239_v3  ;;  %v1866_v21 = vsel %vm765_vm6, %v1863_v33, %v1865_v7 }
 0x23e   :  { %4022 = vmatprep.mubr.msk.f32.mxu1 %vm2407_vm13, %v2362_v60  ;;  %v1867_v60 = vrot.slane %v5213_v45, 7  ;;  %v1949_v58 = vsel %vm6236_vm4, %v1866_v21, 0.0  ;;  %v1869_v45 = vrot.slane %v5226_v53, 7  ;;  %vm6238_vm4 = vcmp.ge.s32.totalorder %v4753_v9, 0 }
 0x23f   :  { %v2121_v42 = vpop.permute.xlu1 %2120 }
 0x240   :  { %v2115_v25 = vpop.permute.xlu0 %2114  ;;  %v2334_v62 = vsel %vm2322_vm15, %v1864_v19, %v2121_v42  ;;  %v1870_v24 = vsel %vm765_vm6, %v1867_v60, %v1869_v45 }
 0x241   :  { %v2331_v40 = vsel %vm2322_vm15, %v1945_v4, %v2115_v25  ;;  %v1868_v4 = vsel %vm765_vm6, %v1865_v7, %v1867_v60  ;;  %v6241_v60 = vld [vmem:[#allocation5_spill] sm:$0xff] }
 0x243   :  { %v2241_v15 = vpop.permute.xlu1 %2240 }
 0x244   :  { %v2363_v6 = vsel %vm2355_vm14, %v2330_v12, %v2241_v15  ;;  %v2243_v30 = vpop.permute.xlu0 %2242 }
 0x245   :  { %v2364_v63 = vsel %vm2355_vm14, %v2331_v40, %v2243_v30  ;;  %4023 = vmatmul.mubr.msk.f32.gmra.mrb[22].mxu1 %vm2407_vm13, %v2363_v6  ;;  %v1871_v40 = vrot.slane %v5224_v1, 7 }
 0x246   :  { %4025 = vmatprep.mubr.msk.f32.mxu1 %vm2407_vm13, %v2364_v63  ;;  %v6237_v63 = vrot.slane %v4951_v36, 7 }
 0x247   :  { %v2245_v27 = vpop.permute.xlu1 %2244 }
 0x248   :  { %v2365_v57 = vsel %vm2355_vm14, %v2332_v44, %v2245_v27  ;;  %v2119_v56 = vpop.permute.xlu0 %2118  ;;  %v1874_v48 = vsel %vm765_vm6, %v1871_v40, %v6237_v63  ;;  %v1872_v27 = vsel %vm765_vm6, %v1869_v45, %v1871_v40  ;;  %v6250_v63 = vld [vmem:[#allocation16_spill] sm:$0xff] }
 0x249   :  { %4026 = vmatmul.mubr.msk.f32.gmra.mrb[24].mxu1 %vm2407_vm13, %v2365_v57  ;;  %v2333_v55 = vsel %vm2322_vm15, %v1862_v8, %v2119_v56  ;;  %v1953_v1 = vsel %vm6238_vm4, %v1874_v48, 0.0  ;;  %vm6242_vm4 = vcmp.ge.s32.totalorder %v6241_v60, 0 }
 0x24a   :  { %v2339_v36 = vsel %vm2322_vm15, %v1953_v1, %v5286_v34  ;;  %v2341_v34 = vsel %vm2322_vm15, %v4992_v47, %v5317_v43 }
 0x24b   :  { %v2125_v23 = vpop.permute.xlu1 %2124  ;;  %v2372_v7 = vsel %vm2355_vm14, %v2339_v36, %v5310_v2  ;;  %v2374_v2 = vsel %vm2355_vm14, %v2341_v34, %v5329_v50 }
 0x24c   :  { %v2247_v37 = vpop.permute.xlu0 %2246  ;;  %v2336_v42 = vsel %vm2322_vm15, %v1868_v4, %v2125_v23  ;;  %v6247_v4 = vld [vmem:[#allocation6_spill] sm:$0xff] }
 0x24d   :  { %v2366_v51 = vsel %vm2355_vm14, %v2333_v55, %v2247_v37 }
 0x24e   :  { %4028 = vmatprep.mubr.msk.f32.mxu1 %vm2407_vm13, %v2366_v51  ;;  %v2340_v51 = vsel %vm2322_vm15, %v4970_v59, %v5284_v29  ;;  %v6240_v29 = vld [vmem:[#allocation10_spill] sm:$0xff] }
 0x24f   :  { %v2129_v41 = vpop.permute.xlu1 %2128  ;;  %v2373_v33 = vsel %vm2355_vm14, %v2340_v51, %v5322_v10  ;;  %v1957_v47 = vsel %vm6242_vm4, %v6240_v29, 0.0  ;;  %vm6248_vm4 = vcmp.ge.s32.totalorder %v6247_v4, 0 }
 0x250   :  { %v2123_v3 = vpop.permute.xlu0 %2122  ;;  %v2338_v56 = vsel %vm2322_vm15, %v1872_v27, %v2129_v41  ;;  %v2343_v43 = vsel %vm2322_vm15, %v1957_v47, %v5336_v61 }
 0x251   :  { %v2335_v38 = vsel %vm2322_vm15, %v1949_v58, %v2123_v3  ;;  %v6239_v3 = vld [vmem:[#allocation8_spill] sm:$0xff]  ;;  %v2376_v50 = vsel %vm2355_vm14, %v2343_v43, %v5350_v11 }
 0x252   :  { %v2342_v59 = vsel %vm2322_vm15, %v6239_v3, %v5308_v54  ;;  %v6243_v54 = vld [vmem:[#allocation9_spill] sm:$0xff] }
 0x253   :  { %v2249_v25 = vpop.permute.xlu1 %2248  ;;  %v2375_v10 = vsel %vm2355_vm14, %v2342_v59, %v5348_v5  ;;  %v2344_v58 = vsel %vm2322_vm15, %v6243_v54, %v5327_v0  ;;  %v6246_v0 = vld [vmem:[#allocation14_spill] sm:$0xff] }
 0x254   :  { %v2367_v26 = vsel %vm2355_vm14, %v2334_v62, %v2249_v25  ;;  %v2251_v16 = vpop.permute.xlu0 %2250  ;;  %v6244_v25 = vld [vmem:[#allocation12_spill] sm:$0xff]  ;;  %v2377_v5 = vsel %vm2355_vm14, %v2344_v58, %v5360_v28  ;;  %v1961_v45 = vsel %vm6248_vm4, %v6246_v0, 0.0 }
 0x255   :  { %v2368_v12 = vsel %vm2355_vm14, %v2335_v38, %v2251_v16  ;;  %4029 = vmatmul.mubr.msk.f32.gmra.mrb[26].mxu1 %vm2407_vm13, %v2367_v26  ;;  %v2345_v61 = vsel %vm2322_vm15, %v6244_v25, %v5357_v13  ;;  %v6245_v16 = vld [vmem:[#allocation11_spill] sm:$0xff] }
 0x256   :  { %4031 = vmatprep.mubr.msk.f32.mxu1 %vm2407_vm13, %v2368_v12  ;;  %v2346_v12 = vsel %vm2322_vm15, %v6245_v16, %v5333_v14 }
 0x257   :  { %v2253_v15 = vpop.permute.xlu1 %2252 }
 0x258   :  { %v2369_v6 = vsel %vm2355_vm14, %v2336_v42, %v2253_v15  ;;  %v2127_v30 = vpop.permute.xlu0 %2126 }
 0x259   :  { %4032 = vmatmul.mubr.msk.f32.gmra.mrb[28].mxu1 %vm2407_vm13, %v2369_v6  ;;  %v2337_v53 = vsel %vm2322_vm15, %v1870_v24, %v2127_v30  ;;  %v6249_v6 = vld [vmem:[#allocation13_spill] sm:$0xff] }
 0x25b   :  { %v2257_v44 = vpop.permute.xlu1 %2256 }
 0x25c   :  { %v2255_v57 = vpop.permute.xlu0 %2254  ;;  %v2371_v23 = vsel %vm2355_vm14, %v2338_v56, %v2257_v44  ;;  %v6252_v56 = vld [vmem:[#allocation18_spill] sm:$0xff] }
 0x25d   :  { %v2370_v8 = vsel %vm2355_vm14, %v2337_v53, %v2255_v57  ;;  %v6251_v53 = vld [vmem:[#allocation15_spill] sm:$0xff]  ;;  %v1965_v36 = vsel %vm535_vm5, %v6252_v56, 0.0 }
 0x25e   :  { %4034 = vmatprep.mubr.msk.f32.mxu1 %vm2407_vm13, %v2370_v8 }
 0x25f   :  { %v2273_v55 = vpop.permute.xlu1 %2272  ;;  %4035 = vmatmul.mubr.msk.f32.gmra.mrb[30].mxu1 %vm2407_vm13, %v2371_v23 }
 0x260   :  { %v2271_v37 = vpop.permute.xlu0 %2270  ;;  %4037 = vmatprep.mubr.msk.f32.mxu1 %vm2407_vm13, %v2372_v7  ;;  %v2379_v13 = vsel %vm2355_vm14, %v2346_v12, %v2273_v55 }
 0x261   :  { %v2378_v38 = vsel %vm2355_vm14, %v2345_v61, %v2271_v37  ;;  %v6254_v37 = vld [vmem:[#allocation17_spill] sm:$0xff] }
 0x263   :  { %v2149_v41 = vpop.permute.xlu1 %2148  ;;  %4038 = vmatmul.mubr.msk.f32.gmra.mrb[32].mxu1 %vm2407_vm13, %v2373_v33 }
 0x264   :  { %v2147_v21 = vpop.permute.xlu0 %2146  ;;  %4040 = vmatprep.mubr.msk.f32.mxu1 %vm2407_vm13, %v2374_v2  ;;  %v2348_v30 = vsel %vm2322_vm15, %v6249_v6, %v2149_v41 }
 0x265   :  { %v2347_v28 = vsel %vm2322_vm15, %v1961_v45, %v2147_v21 }
 0x267   :  { %v2277_v19 = vpop.permute.xlu1 %2276  ;;  %4041 = vmatmul.mubr.msk.f32.gmra.mrb[34].mxu1 %vm2407_vm13, %v2375_v10  ;;  %v3339_v10 = vld [vmem:[%s6185_s5] sm:$0xff] }
 0x268   :  { %v2275_v62 = vpop.permute.xlu0 %2274  ;;  %4043 = vmatprep.mubr.msk.f32.mxu1 %vm2407_vm13, %v2376_v50  ;;  %v2381_v14 = vsel %vm2355_vm14, %v2348_v30, %v2277_v19  ;;  %v3341_v19 = vld [vmem:[%s6185_s5 + $0x10] sm:$0xff] }
 0x269   :  { %v2380_v42 = vsel %vm2355_vm14, %v2347_v28, %v2275_v62  ;;  %v3342_v62 = vld [vmem:[%s6185_s5 + $0x18] sm:$0xff] }
 0x26a   :  { %v4167_v54 = vpack.c.bf16 %v3342_v62, %v3341_v19 }
 0x26b   :  { %v2153_v11 = vpop.permute.xlu1 %2152  ;;  %4044 = vmatmul.mubr.msk.f32.gmra.mrb[36].mxu1 %vm2407_vm13, %v2377_v5 }
 0x26c   :  { %v2151_v26 = vpop.permute.xlu0 %2150  ;;  %4046 = vmatprep.mubr.msk.f32.mxu1 %vm2407_vm13, %v2378_v38  ;;  %v2350_v57 = vsel %vm2322_vm15, %v6251_v53, %v2153_v11  ;;  %v3343_v38 = vld [vmem:[%s6185_s5 + $0x20] sm:$0xff]  ;;  %v3344_v11 = vld [vmem:[%s6185_s5 + $0x28] sm:$0xff] }
 0x26d   :  { %v2349_v48 = vsel %vm2322_vm15, %v6250_v63, %v2151_v26  ;;  %v4171_v16 = vpack.c.bf16 %v3344_v11, %v3343_v38  ;;  %v3348_v63 = vld [vmem:[%s6185_s5 + $0x48] sm:$0xff] }
 0x26f   :  { %v2281_v15 = vpop.permute.xlu1 %2280  ;;  %4047 = vmatmul.mubr.msk.f32.gmra.mrb[38].mxu1 %vm2407_vm13, %v2379_v13 }
 0x270   :  { %v2279_v40 = vpop.permute.xlu0 %2278  ;;  %4049 = vmatprep.mubr.msk.f32.mxu1 %vm2407_vm13, %v2380_v42  ;;  %v2383_v1 = vsel %vm2355_vm14, %v2350_v57, %v2281_v15  ;;  %v3345_v42 = vld [vmem:[%s6185_s5 + $0x30] sm:$0xff]  ;;  %v3346_v15 = vld [vmem:[%s6185_s5 + $0x38] sm:$0xff] }
 0x271   :  { %v2382_v24 = vsel %vm2355_vm14, %v2349_v48, %v2279_v40  ;;  %v4175_v40 = vpack.c.bf16 %v3346_v15, %v3345_v42 }
 0x273   :  { %v2157_v44 = vpop.permute.xlu1 %2156  ;;  %4050 = vmatmul.mubr.msk.f32.gmra.mrb[40].mxu1 %vm2407_vm13, %v2381_v14  ;;  %v3347_v14 = vld [vmem:[%s6185_s5 + $0x40] sm:$0xff] }
 0x274   :  { %v2155_v27 = vpop.permute.xlu0 %2154  ;;  %4052 = vmatprep.mubr.msk.f32.mxu1 %vm2407_vm13, %v2382_v24  ;;  %v2352_v51 = vsel %vm2322_vm15, %v6254_v37, %v2157_v44  ;;  %v4179_v48 = vpack.c.bf16 %v3348_v63, %v3347_v14  ;;  %v3349_v24 = vld [vmem:[%s6185_s5 + $0x50] sm:$0xff]  ;;  %v3350_v44 = vld [vmem:[%s6185_s5 + $0x58] sm:$0xff] }
 0x275   :  { %v2351_v7 = vsel %vm2322_vm15, %v1965_v36, %v2155_v27  ;;  %v4183_v27 = vpack.c.bf16 %v3350_v44, %v3349_v24 }
 0x277   :  { %v2285_v23 = vpop.permute.xlu1 %2284  ;;  %4053 = vmatmul.mubr.msk.f32.gmra.mrb[42].mxu1 %vm2407_vm13, %v2383_v1 }
 0x278   :  { %v2283_v55 = vpop.permute.xlu0 %2282  ;;  %v2385_v33 = vsel %vm2355_vm14, %v2352_v51, %v2285_v23 }
 0x279   :  { %v2384_v34 = vsel %vm2355_vm14, %v2351_v7, %v2283_v55 }
 0x27a   :  { %4055 = vmatprep.mubr.msk.f32.mxu1 %vm2407_vm13, %v2384_v34 }
 0x27b   :  { %v2161_v2 = vpop.permute.xlu1 %2160  ;;  %4056 = vmatmul.mubr.msk.f32.gmra.mrb[44].mxu1 %vm2407_vm13, %v2385_v33 }
 0x27c   :  { %v2159_v41 = vpop.permute.xlu0 %2158  ;;  %v2354_v29 = vsel %vm2322_vm15, %v5198_v32, %v2161_v2  ;;  %v5511_v32 = vld [vmem:[%s6186_s4] ss:$0 sm:$0xff] }
 0x27d   :  { %v2353_v3 = vsel %vm2322_vm15, %v5201_v31, %v2159_v41  ;;  %v3340_v31 = vld [vmem:[%s6185_s5 + $0x8] sm:$0xff] }
 0x27e   :  { %v4163_v50 = vpack.c.bf16 %v3340_v31, %v3339_v10 }
 0x27f   :  { %v2289_v21 = vpop.permute.xlu1 %2288 }
 0x280   :  { %v2287_v59 = vpop.permute.xlu0 %2286  ;;  %v2387_v43 = vsel %vm2355_vm14, %v2354_v29, %v2289_v21  ;;  %4164 = vmatprep.subr.bf16.mxu0 %v4163_v50 }
 0x281   :  { %v2386_v47 = vsel %vm2355_vm14, %v2353_v3, %v2287_v59  ;;  %4166 = vmatpush3.bf16.msra.mxu0 %v4163_v50 }
 0x282   :  { %4058 = vmatprep.mubr.msk.f32.mxu1 %vm2407_vm13, %v2386_v47  ;;  %4168 = vmatprep.subr.bf16.mxu0 %v4167_v54 }
 0x283   :  { %4059 = vmatmul.mubr.msk.f32.gmra.mrb[46].mxu1 %vm2407_vm13, %v2387_v43 }
 0x285   :  { %4170 = vmatpush3.bf16.msra.mxu0 %v4167_v54 }
 0x286   :  { %4172 = vmatprep.subr.bf16.mxu0 %v4171_v16 }
 0x289   :  { %4174 = vmatpush3.bf16.msra.mxu0 %v4171_v16 }
 0x28a   :  { %4176 = vmatprep.subr.bf16.mxu0 %v4175_v40 }
 0x28d   :  { %4178 = vmatpush3.bf16.msra.mxu0 %v4175_v40 }
 0x28e   :  { %4180 = vmatprep.subr.bf16.mxu0 %v4179_v48 }
 0x291   :  { %4182 = vmatpush3.bf16.msra.mxu0 %v4179_v48 }
 0x292   :  { %4184 = vmatprep.subr.bf16.mxu0 %v4183_v27 }
 0x295   :  { %4186 = vmatpush3.bf16.msra.mxu0 %v4183_v27 }
 0x2e8   :  { %v4015_v58 = vpop.f32.mrb[16].mxu1 }
 0x2e9   :  { %v2576_v25 = vadd.f32 %v4015_v58, %v5511_v32  ;;  %v2570_v61 = vpop.f32.mrb[17].mxu1 }
 0x2ea   :  { %v2571_v5 = vadd.f32 %v5511_v32, %v2570_v61 }
 0x2eb   :  { %v2730_v26 = vmax.f32 %v2576_v25, 0.0 }
 0x2ec   :  { %v5527_v12 = vmax.f32 %v2571_v5, 0.0 }
 0x2ed   :  { %v2796_v0 = vrot.slane %v2730_v26, 7  ;;  %v2923_v45 = vrot.slane %v2730_v26, 1  ;;  %3053 = vrot.lane.b32.xlu1 %v2730_v26, %s4197_s12 }
 0x2ee   :  { %v6211_v13 = vrot.slane %v5527_v12, 7  ;;  %v6210_v28 = vrot.slane %v5527_v12, 1  ;;  %3051 = vrot.lane.b32.xlu0 %v5527_v12, %s4197_s12 }
 0x2f0   :  { %v2924_v6 = vsel %vm957_vm0, %v6210_v28, %v2923_v45  ;;  %v5546_v30 = vsel %vm765_vm6, %v6211_v13, %v2796_v0 }
 0x2f2   :  { %3179 = vrot.lane.b32.xlu0 %v2924_v6, %s4198_s3 }
 0x300   :  { %v4018_v53 = vpop.f32.mrb[18].mxu1 }
 0x301   :  { %v2586_v57 = vadd.f32 %v4018_v53, %v5511_v32  ;;  %v2580_v1 = vpop.f32.mrb[19].mxu1 }
 0x302   :  { %v2581_v56 = vadd.f32 %v5511_v32, %v2580_v1 }
 0x303   :  { %v2732_v36 = vmax.f32 %v2586_v57, 0.0 }
 0x304   :  { %v2731_v23 = vmax.f32 %v2581_v56, 0.0 }
 0x305   :  { %v2800_v7 = vrot.slane %v2732_v36, 7  ;;  %v2927_v55 = vrot.slane %v2732_v36, 1  ;;  %3057 = vrot.lane.b32.xlu1 %v2732_v36, %s4197_s12 }
 0x306   :  { %v2798_v37 = vrot.slane %v2731_v23, 7  ;;  %v2925_v51 = vrot.slane %v2731_v23, 1  ;;  %3055 = vrot.lane.b32.xlu0 %v2731_v23, %s4197_s12 }
 0x308   :  { %v4021_v34 = vpop.f32.mrb[20].mxu1  ;;  %v2926_v33 = vsel %vm957_vm0, %v2923_v45, %v2925_v51  ;;  %v2928_v2 = vsel %vm957_vm0, %v2925_v51, %v2927_v55  ;;  %v5568_v41 = vsel %vm765_vm6, %v2798_v37, %v2800_v7  ;;  %v5571_v21 = vsel %vm765_vm6, %v2796_v0, %v2798_v37 }
 0x309   :  { %v2596_v3 = vadd.f32 %v4021_v34, %v5511_v32  ;;  %v2590_v59 = vpop.f32.mrb[21].mxu1  ;;  %3181 = vrot.lane.b32.xlu1 %v2926_v33, %s4198_s3 }
 0x30a   :  { %v2591_v29 = vadd.f32 %v5511_v32, %v2590_v59  ;;  %3183 = vrot.lane.b32.xlu0 %v2928_v2, %s4198_s3 }
 0x30b   :  { %v2734_v47 = vmax.f32 %v2596_v3, 0.0 }
 0x30c   :  { %v2733_v43 = vmax.f32 %v2591_v29, 0.0 }
 0x30d   :  { %v2804_v10 = vrot.slane %v2734_v47, 7  ;;  %v2931_v31 = vrot.slane %v2734_v47, 1  ;;  %3061 = vrot.lane.b32.xlu1 %v2734_v47, %s4197_s12 }
 0x30e   :  { %v2802_v50 = vrot.slane %v2733_v43, 7  ;;  %v2929_v19 = vrot.slane %v2733_v43, 1  ;;  %3059 = vrot.lane.b32.xlu0 %v2733_v43, %s4197_s12 }
 0x310   :  { %v2932_v62 = vsel %vm957_vm0, %v2929_v19, %v2931_v31  ;;  %v2930_v54 = vsel %vm957_vm0, %v2927_v55, %v2929_v19  ;;  %v5582_v58 = vsel %vm765_vm6, %v2802_v50, %v2804_v10  ;;  %v5585_v25 = vsel %vm765_vm6, %v2800_v7, %v2802_v50 }
 0x311   :  { %v3022_v44 = vsel %vm670_vm1, %v2930_v54, 0.0  ;;  %vm6267_vm1 = vcmp.ge.s32.totalorder %v4680_v52, 0 }
 0x312   :  { %3187 = vrot.lane.b32.xlu0 %v2932_v62, %s4198_s3 }
 0x318   :  { %v4024_v61 = vpop.f32.mrb[22].mxu1 }
 0x319   :  { %v2606_v5 = vadd.f32 %v4024_v61, %v5511_v32  ;;  %v2600_v38 = vpop.f32.mrb[23].mxu1 }
 0x31a   :  { %v2601_v11 = vadd.f32 %v5511_v32, %v2600_v38 }
 0x31b   :  { %v2736_v26 = vmax.f32 %v2606_v5, 0.0 }
 0x31c   :  { %v2735_v16 = vmax.f32 %v2601_v11, 0.0  ;;  %v4027_v0 = vpop.f32.mrb[24].mxu1 }
 0x31d   :  { %v2808_v45 = vrot.slane %v2736_v26, 7  ;;  %v2935_v42 = vrot.slane %v2736_v26, 1  ;;  %v2616_v15 = vadd.f32 %v4027_v0, %v5511_v32  ;;  %v2610_v40 = vpop.f32.mrb[25].mxu1  ;;  %3065 = vrot.lane.b32.xlu1 %v2736_v26, %s4197_s12 }
 0x31e   :  { %v2806_v6 = vrot.slane %v2735_v16, 7  ;;  %v2933_v14 = vrot.slane %v2735_v16, 1  ;;  %v2611_v63 = vadd.f32 %v5511_v32, %v2610_v40  ;;  %3063 = vrot.lane.b32.xlu0 %v2735_v16, %s4197_s12 }
 0x31f   :  { %v2738_v48 = vmax.f32 %v2616_v15, 0.0 }
 0x320   :  { %v2737_v27 = vmax.f32 %v2611_v63, 0.0  ;;  %v2936_v53 = vsel %vm957_vm0, %v2933_v14, %v2935_v42  ;;  %v2934_v57 = vsel %vm957_vm0, %v2931_v31, %v2933_v14  ;;  %v5599_v1 = vsel %vm765_vm6, %v2806_v6, %v2808_v45 }
 0x321   :  { %v2812_v56 = vrot.slane %v2738_v48, 7  ;;  %v2939_v36 = vrot.slane %v2738_v48, 1  ;;  %3185 = vrot.lane.b32.xlu1 %v3022_v44, %s4198_s3  ;;  %v5603_v23 = vsel %vm765_vm6, %v2804_v10, %v2806_v6 }
 0x322   :  { %v2810_v7 = vrot.slane %v2737_v27, 7  ;;  %v2937_v55 = vrot.slane %v2737_v27, 1  ;;  %3191 = vrot.lane.b32.xlu0 %v2936_v53, %s4198_s3 }
 0x324   :  { %v2940_v37 = vsel %vm957_vm0, %v2937_v55, %v2939_v36  ;;  %v2938_v51 = vsel %vm957_vm0, %v2935_v42, %v2937_v55  ;;  %v5609_v34 = vsel %vm765_vm6, %v2808_v45, %v2810_v7  ;;  %v5612_v33 = vsel %vm765_vm6, %v2810_v7, %v2812_v56 }
 0x325   :  { %3189 = vrot.lane.b32.xlu1 %v2934_v57, %s4198_s3  ;;  %v3026_v26 = vsel %vm674_vm3, %v2938_v51, 0.0  ;;  %vm6269_vm3 = vcmp.ge.s32.totalorder %v4731_v20, 0 }
 0x326   :  { %3067 = vrot.lane.b32.xlu0 %v2737_v27, %s4197_s12 }
 0x328   :  { %v4030_v2 = vpop.f32.mrb[26].mxu1 }
 0x329   :  { %v2626_v3 = vadd.f32 %v4030_v2, %v5511_v32  ;;  %v2620_v59 = vpop.f32.mrb[27].mxu1  ;;  %3069 = vrot.lane.b32.xlu1 %v2738_v48, %s4197_s12 }
 0x32a   :  { %v2621_v29 = vadd.f32 %v5511_v32, %v2620_v59  ;;  %3195 = vrot.lane.b32.xlu0 %v2940_v37, %s4198_s3 }
 0x32b   :  { %v2740_v47 = vmax.f32 %v2626_v3, 0.0 }
 0x32c   :  { %v2739_v43 = vmax.f32 %v2621_v29, 0.0  ;;  %v4033_v10 = vpop.f32.mrb[28].mxu1 }
 0x32d   :  { %v2816_v31 = vrot.slane %v2740_v47, 7  ;;  %v2943_v50 = vrot.slane %v2740_v47, 1  ;;  %v2636_v19 = vadd.f32 %v4033_v10, %v5511_v32  ;;  %v2630_v62 = vpop.f32.mrb[29].mxu1  ;;  %3073 = vrot.lane.b32.xlu1 %v2740_v47, %s4197_s12 }
 0x32e   :  { %v2814_v54 = vrot.slane %v2739_v43, 7  ;;  %v2941_v61 = vrot.slane %v2739_v43, 1  ;;  %v2631_v5 = vadd.f32 %v5511_v32, %v2630_v62  ;;  %3071 = vrot.lane.b32.xlu0 %v2739_v43, %s4197_s12 }
 0x32f   :  { %v2742_v38 = vmax.f32 %v2636_v19, 0.0 }
 0x330   :  { %v2741_v16 = vmax.f32 %v2631_v5, 0.0  ;;  %v2944_v0 = vsel %vm957_vm0, %v2941_v61, %v2943_v50  ;;  %v2942_v45 = vsel %vm957_vm0, %v2939_v36, %v2941_v61  ;;  %v5629_v42 = vsel %vm765_vm6, %v2814_v54, %v2816_v31 }
 0x331   :  { %v2820_v15 = vrot.slane %v2742_v38, 7  ;;  %v2947_v40 = vrot.slane %v2742_v38, 1  ;;  %3193 = vrot.lane.b32.xlu1 %v3026_v26, %s4198_s3  ;;  %v5633_v6 = vsel %vm765_vm6, %v2812_v56, %v2814_v54 }
 0x332   :  { %v2818_v14 = vrot.slane %v2741_v16, 7  ;;  %v2945_v63 = vrot.slane %v2741_v16, 1  ;;  %v4036_v48 = vpop.f32.mrb[30].mxu1  ;;  %3199 = vrot.lane.b32.xlu0 %v2944_v0, %s4198_s3 }
 0x333   :  { %v2646_v24 = vadd.f32 %v4036_v48, %v5511_v32  ;;  %v2640_v44 = vpop.f32.mrb[31].mxu1 }
 0x334   :  { %v2641_v27 = vadd.f32 %v5511_v32, %v2640_v44  ;;  %v2948_v53 = vsel %vm957_vm0, %v2945_v63, %v2947_v40  ;;  %v2946_v57 = vsel %vm957_vm0, %v2943_v50, %v2945_v63  ;;  %v5641_v36 = vsel %vm765_vm6, %v2816_v31, %v2818_v14 }
 0x335   :  { %v2744_v7 = vmax.f32 %v2646_v24, 0.0  ;;  %3197 = vrot.lane.b32.xlu1 %v2942_v45, %s4198_s3  ;;  %v5645_v56 = vsel %vm765_vm6, %v2818_v14, %v2820_v15 }
 0x336   :  { %v2743_v55 = vmax.f32 %v2641_v27, 0.0  ;;  %v4039_v37 = vpop.f32.mrb[32].mxu1  ;;  %3075 = vrot.lane.b32.xlu0 %v2741_v16, %s4197_s12 }
 0x337   :  { %v2824_v51 = vrot.slane %v2744_v7, 7  ;;  %v2951_v2 = vrot.slane %v2744_v7, 1  ;;  %v2656_v3 = vadd.f32 %v4039_v37, %v5511_v32  ;;  %v2650_v59 = vpop.f32.mrb[33].mxu1 }
 0x338   :  { %v2822_v29 = vrot.slane %v2743_v55, 7  ;;  %v2949_v47 = vrot.slane %v2743_v55, 1  ;;  %v2651_v43 = vadd.f32 %v5511_v32, %v2650_v59 }
 0x339   :  { %v5650_v10 = vmax.f32 %v2656_v3, 0.0  ;;  %3077 = vrot.lane.b32.xlu1 %v2742_v38, %s4197_s12 }
 0x33a   :  { %v2745_v31 = vmax.f32 %v2651_v43, 0.0  ;;  %v4042_v50 = vpop.f32.mrb[34].mxu1  ;;  %3203 = vrot.lane.b32.xlu0 %v2948_v53, %s4198_s3  ;;  %v2952_v19 = vsel %vm957_vm0, %v2949_v47, %v2951_v2  ;;  %v2950_v62 = vsel %vm957_vm0, %v2947_v40, %v2949_v47  ;;  %v5657_v54 = vsel %vm765_vm6, %v2822_v29, %v2824_v51 }
 0x33b   :  { %v2955_v61 = vrot.slane %v5650_v10, 1  ;;  %v2666_v5 = vadd.f32 %v4042_v50, %v5511_v32  ;;  %v2660_v11 = vpop.f32.mrb[35].mxu1  ;;  %v5662_v26 = vsel %vm765_vm6, %v2820_v15, %v2822_v29  ;;  %v2828_v45 = vrot.slane %v5650_v10, 7 }
 0x33c   :  { %v2826_v38 = vrot.slane %v2745_v31, 7  ;;  %v2953_v16 = vrot.slane %v2745_v31, 1  ;;  %v2661_v0 = vadd.f32 %v5511_v32, %v2660_v11 }
 0x33d   :  { %v5666_v14 = vmax.f32 %v2666_v5, 0.0  ;;  %3081 = vrot.lane.b32.xlu1 %v2744_v7, %s4197_s12 }
 0x33e   :  { %v5669_v40 = vmax.f32 %v2661_v0, 0.0  ;;  %v4045_v63 = vpop.f32.mrb[36].mxu1  ;;  %3079 = vrot.lane.b32.xlu0 %v2743_v55, %s4197_s12  ;;  %v2956_v48 = vsel %vm957_vm0, %v2953_v16, %v2955_v61  ;;  %v5674_v15 = vsel %vm957_vm0, %v2951_v2, %v2953_v16  ;;  %v5677_v24 = vsel %vm765_vm6, %v2824_v51, %v2826_v38 }
 0x33f   :  { %v2832_v44 = vrot.slane %v5666_v14, 7  ;;  %v2959_v27 = vrot.slane %v5666_v14, 1  ;;  %v2676_v53 = vadd.f32 %v4045_v63, %v5511_v32  ;;  %v2670_v7 = vpop.f32.mrb[37].mxu1  ;;  %v3030_v2 = vsel %vm678_vm7, %v2946_v57, 0.0 }
 0x340   :  { %v2830_v37 = vrot.slane %v5669_v40, 7  ;;  %v2957_v3 = vrot.slane %v5669_v40, 1  ;;  %v2671_v55 = vadd.f32 %v5511_v32, %v2670_v7  ;;  %v5691_v51 = vsel %vm765_vm6, %v2826_v38, %v2828_v45 }
 0x341   :  { %v5687_v59 = vmax.f32 %v2676_v53, 0.0  ;;  %3201 = vrot.lane.b32.xlu1 %v3030_v2, %s4198_s3 }
 0x342   :  { %v5693_v29 = vmax.f32 %v2671_v55, 0.0  ;;  %v4048_v47 = vpop.f32.mrb[38].mxu1  ;;  %3207 = vrot.lane.b32.xlu0 %v2952_v19, %s4198_s3  ;;  %v5697_v43 = vsel %vm957_vm0, %v2957_v3, %v2959_v27  ;;  %v5700_v50 = vsel %vm957_vm0, %v2955_v61, %v2957_v3  ;;  %v5703_v17 = vsel %vm765_vm6, %v2830_v37, %v2832_v44 }
 0x343   :  { %v2963_v57 = vrot.slane %v5687_v59, 1  ;;  %v2686_v5 = vadd.f32 %v4048_v47, %v5511_v32  ;;  %v2680_v11 = vpop.f32.mrb[39].mxu1  ;;  %v5708_v38 = vsel %vm765_vm6, %v2828_v45, %v2830_v37  ;;  %v2836_v61 = vrot.slane %v5687_v59, 7 }
 0x344   :  { %v2834_v16 = vrot.slane %v5693_v29, 7  ;;  %v2961_v19 = vrot.slane %v5693_v29, 1  ;;  %v2681_v0 = vadd.f32 %v5511_v32, %v2680_v11 }
 0x345   :  { %v5714_v63 = vmax.f32 %v2686_v5, 0.0  ;;  %3205 = vrot.lane.b32.xlu1 %v2950_v62, %s4198_s3 }
 0x346   :  { %v5717_v53 = vmax.f32 %v2681_v0, 0.0  ;;  %v4051_v7 = vpop.f32.mrb[40].mxu1  ;;  %3083 = vrot.lane.b32.xlu0 %v2745_v31, %s4197_s12  ;;  %v5721_v45 = vsel %vm957_vm0, %v2961_v19, %v2963_v57  ;;  %v5724_v37 = vsel %vm957_vm0, %v2959_v27, %v2961_v19  ;;  %v5727_v3 = vsel %vm765_vm6, %v2832_v44, %v2834_v16 }
 0x347   :  { %6257 = vst [vmem:[#allocation8_spill] sm:$0xff] %v5727_v3  ;;  %v2840_v55 = vrot.slane %v5714_v63, 7  ;;  %v2967_v2 = vrot.slane %v5714_v63, 1  ;;  %v2696_v62 = vadd.f32 %v4051_v7, %v5511_v32  ;;  %v2690_v47 = vpop.f32.mrb[41].mxu1  ;;  %v5740_v44 = vsel %vm765_vm6, %v2834_v16, %v2836_v61 }
 0x348   :  { %v2838_v5 = vrot.slane %v5717_v53, 7  ;;  %v2965_v31 = vrot.slane %v5717_v53, 1  ;;  %v2691_v11 = vadd.f32 %v5511_v32, %v2690_v47  ;;  %6258 = vst [vmem:[#allocation10_spill] sm:$0xff] %v5740_v44 }
 0x349   :  { %v5735_v0 = vmax.f32 %v2696_v62, 0.0  ;;  %3085 = vrot.lane.b32.xlu1 %v5650_v10, %s4197_s12 }
 0x34a   :  { %v5742_v27 = vmax.f32 %v2691_v11, 0.0  ;;  %v4054_v19 = vpop.f32.mrb[42].mxu1  ;;  %3211 = vrot.lane.b32.xlu0 %v2956_v48, %s4198_s3  ;;  %v5746_v7 = vsel %vm957_vm0, %v2965_v31, %v2967_v2  ;;  %v5749_v28 = vsel %vm957_vm0, %v2963_v57, %v2965_v31  ;;  %v5752_v62 = vsel %vm765_vm6, %v2838_v5, %v2840_v55 }
 0x34b   :  { %6259 = vst [vmem:[#allocation9_spill] sm:$0xff] %v5752_v62  ;;  %v2971_v47 = vrot.slane %v5735_v0, 1  ;;  %v2706_v10 = vadd.f32 %v4054_v19, %v5511_v32  ;;  %v2700_v16 = vpop.f32.mrb[43].mxu1  ;;  %v5757_v11 = vsel %vm765_vm6, %v2836_v61, %v2838_v5  ;;  %v2844_v57 = vrot.slane %v5735_v0, 7 }
 0x34c   :  { %6260 = vst [vmem:[#allocation12_spill] sm:$0xff] %v5757_v11  ;;  %v2842_v13 = vrot.slane %v5742_v27, 7  ;;  %v2969_v48 = vrot.slane %v5742_v27, 1  ;;  %v2701_v8 = vadd.f32 %v5511_v32, %v2700_v16 }
 0x34d   :  { %v5763_v31 = vmax.f32 %v2706_v10, 0.0  ;;  %3089 = vrot.lane.b32.xlu1 %v5666_v14, %s4197_s12 }
 0x34e   :  { %v5767_v4 = vmax.f32 %v2701_v8, 0.0  ;;  %v4057_v19 = vpop.f32.mrb[44].mxu1  ;;  %3087 = vrot.lane.b32.xlu0 %v5669_v40, %s4197_s12  ;;  %v2972_v61 = vsel %vm957_vm0, %v2969_v48, %v2971_v47  ;;  %v5773_v5 = vsel %vm957_vm0, %v2967_v2, %v2969_v48  ;;  %v5776_v16 = vsel %vm765_vm6, %v2840_v55, %v2842_v13 }
 0x34f   :  { %6261 = vst [vmem:[#allocation11_spill] sm:$0xff] %v5776_v16  ;;  %v2848_v10 = vrot.slane %v5763_v31, 7  ;;  %v2975_v62 = vrot.slane %v5763_v31, 1  ;;  %v2716_v14 = vadd.f32 %v4057_v19, %v5511_v32  ;;  %v2710_v8 = vpop.f32.mrb[45].mxu1  ;;  %v3034_v2 = vsel %vm682_vm8, %v5674_v15, 0.0  ;;  %vm6279_vm8 = vmmov %vm6248_vm4 }
 0x350   :  { %v2846_v11 = vrot.slane %v5767_v4, 7  ;;  %v2973_v44 = vrot.slane %v5767_v4, 1  ;;  %v2711_v40 = vadd.f32 %v5511_v32, %v2710_v8  ;;  %v5789_v55 = vsel %vm765_vm6, %v2842_v13, %v2844_v57 }
 0x351   :  { %v2758_v48 = vmax.f32 %v2716_v14, 0.0  ;;  %3209 = vrot.lane.b32.xlu1 %v3034_v2, %s4198_s3  ;;  %v3042_v35 = vsel %vm690_vm10, %v5773_v5, 0.0 }
 0x352   :  { %v2757_v16 = vmax.f32 %v2711_v40, 0.0  ;;  %3215 = vrot.lane.b32.xlu0 %v5697_v43, %s4198_s3  ;;  %v2976_v19 = vsel %vm957_vm0, %v2973_v44, %v2975_v62  ;;  %v2974_v60 = vsel %vm957_vm0, %v2971_v47, %v2973_v44  ;;  %v5796_v8 = vsel %vm765_vm6, %v2846_v11, %v2848_v10 }
 0x353   :  { %6262 = vst [vmem:[#allocation14_spill] sm:$0xff] %v5796_v8  ;;  %v2852_v3 = vrot.slane %v2758_v48, 7  ;;  %v2979_v49 = vrot.slane %v2758_v48, 1  ;;  %v5799_v15 = vsel %vm765_vm6, %v2844_v57, %v2846_v11 }
 0x354   :  { %v2850_v14 = vrot.slane %v2757_v16, 7  ;;  %v2977_v2 = vrot.slane %v2757_v16, 1 }
 0x355   :  { %3213 = vrot.lane.b32.xlu1 %v5700_v50, %s4198_s3 }
 0x356   :  { %v4060_v13 = vpop.f32.mrb[46].mxu1  ;;  %3091 = vrot.lane.b32.xlu0 %v5693_v29, %s4197_s12  ;;  %v2980_v43 = vsel %vm957_vm0, %v2977_v2, %v2979_v49  ;;  %v2978_v44 = vsel %vm957_vm0, %v2975_v62, %v2977_v2  ;;  %v5808_v47 = vsel %vm765_vm6, %v2848_v10, %v2850_v14  ;;  %v5811_v40 = vsel %vm765_vm6, %v2850_v14, %v2852_v3 }
 0x357   :  { %6263 = vst [vmem:[#allocation13_spill] sm:$0xff] %v5808_v47  ;;  %v2726_v11 = vadd.f32 %v4060_v13, %v5511_v32  ;;  %v2720_v57 = vpop.f32.mrb[47].mxu1  ;;  %v6264_v14 = vrot.slane %v5527_v12, 7 }
 0x358   :  { %v2721_v8 = vadd.f32 %v5511_v32, %v2720_v57  ;;  %v3038_v57 = vsel %vm686_vm9, %v5724_v37, 0.0  ;;  %vm6283_vm9 = vcmask 31744  }
 0x359   :  { %v2760_v50 = vmax.f32 %v2726_v11, 0.0  ;;  %3093 = vrot.lane.b32.xlu1 %v5687_v59, %s4197_s12  ;;  %vm6284_vm10 = vmmov %vm6283_vm9 }
 0x35a   :  { %v2759_v29 = vmax.f32 %v2721_v8, 0.0  ;;  %3219 = vrot.lane.b32.xlu0 %v5721_v45, %s4198_s3 }
 0x35b   :  { %v2762_v62 = vrot.slane %v2760_v50, 7  ;;  %v2983_v2 = vrot.slane %v2760_v50, 1 }
 0x35c   :  { %v2854_v10 = vrot.slane %v2759_v29, 7  ;;  %v2981_v47 = vrot.slane %v2759_v29, 1 }
 0x35d   :  { %3097 = vrot.lane.b32.xlu1 %v5714_v63, %s4197_s12  ;;  %v2889_v13 = vsel %vm765_vm6, %v2762_v62, %v6264_v14 }
 0x35e   :  { %3095 = vrot.lane.b32.xlu0 %v5717_v53, %s4197_s12  ;;  %v2984_v32 = vsel %vm957_vm0, %v2981_v47, %v2983_v2  ;;  %v2982_v59 = vsel %vm957_vm0, %v2979_v49, %v2981_v47  ;;  %v5829_v45 = vsel %vm765_vm6, %v2854_v10, %v2762_v62  ;;  %v5832_v8 = vsel %vm765_vm6, %v2852_v3, %v2854_v10 }
 0x35f   :  { %v2890_v53 = vsel %vm507_vm12, %v2889_v13, 0.0  ;;  %vm6270_vm6 = vcmp.ge.s32.totalorder %v4753_v9, 0  ;;  %vm6286_vm12 = vmmov %vm6283_vm9 }
 0x360   :  { %v3052_v11 = vpop.permute.xlu0 %3051 }
 0x361   :  { %3217 = vrot.lane.b32.xlu1 %v3038_v57, %s4198_s3  ;;  %v3275_v49 = vsel %vm2322_vm15, %v2890_v53, %v3052_v11 }
 0x362   :  { %3223 = vrot.lane.b32.xlu0 %v5746_v7, %s4198_s3 }
 0x364   :  { %v3180_v47 = vpop.permute.xlu0 %3179 }
 0x365   :  { %v3307_v62 = vsel %vm2355_vm14, %v3275_v49, %v3180_v47  ;;  %3221 = vrot.lane.b32.xlu1 %v5749_v28, %s4198_s3  ;;  %v3054_v28 = vpop.permute.xlu1 %3053 }
 0x366   :  { %3099 = vrot.lane.b32.xlu0 %v5742_v27, %s4197_s12  ;;  %4085 = vmatprep.mubr.msk.f32.mxu0 %vm2407_vm13, %v3307_v62 }
 0x369   :  { %3101 = vrot.lane.b32.xlu1 %v5735_v0, %s4197_s12 }
 0x36a   :  { %3227 = vrot.lane.b32.xlu0 %v2972_v61, %s4198_s3 }
 0x36d   :  { %3105 = vrot.lane.b32.xlu1 %v5763_v31, %s4197_s12 }
 0x36e   :  { %3103 = vrot.lane.b32.xlu0 %v5767_v4, %s4197_s12  ;;  %v3276_v4 = vsel %vm2322_vm15, %v5546_v30, %v3054_v28  ;;  %v3046_v30 = vsel %vm694_vm11, %v2978_v44, 0.0  ;;  %v2894_v44 = vsel %vm6267_vm1, %v5585_v25, 0.0  ;;  %vm6285_vm11 = vmmov %vm6283_vm9 }
 0x371   :  { %3225 = vrot.lane.b32.xlu1 %v3042_v35, %s4198_s3 }
 0x372   :  { %3231 = vrot.lane.b32.xlu0 %v2976_v19, %s4198_s3 }
 0x375   :  { %3229 = vrot.lane.b32.xlu1 %v2974_v60, %s4198_s3 }
 0x376   :  { %3107 = vrot.lane.b32.xlu0 %v2757_v16, %s4197_s12 }
 0x377   :  { %v3058_v37 = vpop.permute.xlu1 %3057 }
 0x378   :  { %v3056_v3 = vpop.permute.xlu0 %3055 }
 0x379   :  { %3109 = vrot.lane.b32.xlu1 %v2758_v48, %s4197_s12  ;;  %v3277_v0 = vsel %vm2322_vm15, %v5571_v21, %v3056_v3  ;;  %v6266_v21 = vrot.slane %v5527_v12, 1 }
 0x37a   :  { %3235 = vrot.lane.b32.xlu0 %v2980_v43, %s4198_s3  ;;  %v3278_v43 = vsel %vm2322_vm15, %v5568_v41, %v3058_v37 }
 0x37b   :  { %v3182_v46 = vpop.permute.xlu1 %3181  ;;  %v3018_v31 = vsel %vm957_vm0, %v2983_v2, %v6266_v21  ;;  %vm6268_vm0 = vcmp.ge.s32.totalorder %v4709_v39, 0 }
 0x37c   :  { %v3308_v27 = vsel %vm2355_vm14, %v3276_v4, %v3182_v46  ;;  %v3184_v7 = vpop.permute.xlu0 %3183  ;;  %v3050_v5 = vsel %vm698_vm2, %v3018_v31, 0.0  ;;  %vm6288_vm2 = vmmov %vm6283_vm9 }
 0x37d   :  { %v3309_v60 = vsel %vm2355_vm14, %v3277_v0, %v3184_v7  ;;  %3113 = vrot.lane.b32.xlu1 %v2760_v50, %s4197_s12  ;;  %4086 = vmatmul.mubr.msk.f32.vlgmr.msra.gmra.mrb[16].mxu0 %vm2407_vm13, %v3308_v27  ;;  %vm6292_vm4 = vmmov %vm6288_vm2 }
 0x37e   :  { %3111 = vrot.lane.b32.xlu0 %v2759_v29, %s4197_s12  ;;  %4088 = vmatprep.mubr.msk.f32.mxu0 %vm2407_vm13, %v3309_v60  ;;  %vm6293_vm1 = vmmov %vm6288_vm2 }
 0x37f   :  { %v3062_v16 = vpop.permute.xlu1 %3061 }
 0x380   :  { %v3060_v61 = vpop.permute.xlu0 %3059  ;;  %v3280_v10 = vsel %vm2322_vm15, %v5582_v58, %v3062_v16 }
 0x381   :  { %3233 = vrot.lane.b32.xlu1 %v3046_v30, %s4198_s3  ;;  %v3279_v50 = vsel %vm2322_vm15, %v2894_v44, %v3060_v61 }
 0x382   :  { %3239 = vrot.lane.b32.xlu0 %v2984_v32, %s4198_s3 }
 0x384   :  { %v3188_v48 = vpop.permute.xlu0 %3187 }
 0x385   :  { %3237 = vrot.lane.b32.xlu1 %v2982_v59, %s4198_s3  ;;  %v3311_v2 = vsel %vm2355_vm14, %v3279_v50, %v3188_v48 }
 0x389   :  { %3241 = vrot.lane.b32.xlu1 %v3050_v5, %s4198_s3 }
 0x38f   :  { %v3066_v22 = vpop.permute.xlu1 %3065 }
 0x390   :  { %v3064_v19 = vpop.permute.xlu0 %3063  ;;  %v3282_v58 = vsel %vm2322_vm15, %v5599_v1, %v3066_v22 }
 0x391   :  { %v3281_v52 = vsel %vm2322_vm15, %v5603_v23, %v3064_v19  ;;  %v2898_v23 = vsel %vm6268_vm0, %v5609_v34, 0.0  ;;  %vm6294_vm0 = vmmov %vm6293_vm1 }
 0x393   :  { %v3186_v12 = vpop.permute.xlu1 %3185 }
 0x394   :  { %v3310_v29 = vsel %vm2355_vm14, %v3278_v43, %v3186_v12  ;;  %v3192_v18 = vpop.permute.xlu0 %3191 }
 0x395   :  { %4089 = vmatmul.mubr.msk.f32.gmra.mrb[18].mxu0 %vm2407_vm13, %v3310_v29  ;;  %v3313_v13 = vsel %vm2355_vm14, %v3281_v52, %v3192_v18 }
 0x396   :  { %4091 = vmatprep.mubr.msk.f32.mxu0 %vm2407_vm13, %v3311_v2 }
 0x397   :  { %v3190_v41 = vpop.permute.xlu1 %3189 }
 0x398   :  { %v3312_v25 = vsel %vm2355_vm14, %v3280_v10, %v3190_v41  ;;  %v3068_v14 = vpop.permute.xlu0 %3067 }
 0x399   :  { %4092 = vmatmul.mubr.msk.f32.gmra.mrb[20].mxu0 %vm2407_vm13, %v3312_v25  ;;  %v3283_v53 = vsel %vm2322_vm15, %v2898_v23, %v3068_v14 }
 0x39a   :  { %4094 = vmatprep.mubr.msk.f32.mxu0 %vm2407_vm13, %v3313_v13  ;;  %v6271_v13 = vld [vmem:[#allocation8_spill] sm:$0xff] }
 0x39b   :  { %v3070_v32 = vpop.permute.xlu1 %3069 }
 0x39c   :  { %v3196_v59 = vpop.permute.xlu0 %3195  ;;  %v3284_v35 = vsel %vm2322_vm15, %v5612_v33, %v3070_v32  ;;  %v6272_v32 = vld [vmem:[#allocation5_spill] sm:$0xff] }
 0x39d   :  { %v3315_v62 = vsel %vm2355_vm14, %v3283_v53, %v3196_v59  ;;  %vm6273_vm7 = vcmp.ge.s32.totalorder %v6272_v32, 0 }
 0x39f   :  { %v3074_v11 = vpop.permute.xlu1 %3073 }
 0x3a0   :  { %v3072_v63 = vpop.permute.xlu0 %3071  ;;  %v3286_v33 = vsel %vm2322_vm15, %v5629_v42, %v3074_v11 }
 0x3a1   :  { %v3285_v39 = vsel %vm2322_vm15, %v5633_v6, %v3072_v63  ;;  %v2902_v6 = vsel %vm6269_vm3, %v5641_v36, 0.0  ;;  %vm6295_vm3 = vmmov %vm6294_vm0 }
 0x3a3   :  { %v3194_v57 = vpop.permute.xlu1 %3193 }
 0x3a4   :  { %v3314_v49 = vsel %vm2355_vm14, %v3282_v58, %v3194_v57  ;;  %v3200_v47 = vpop.permute.xlu0 %3199  ;;  %v6274_v57 = vld [vmem:[#allocation10_spill] sm:$0xff] }
 0x3a5   :  { %4095 = vmatmul.mubr.msk.f32.gmra.mrb[22].mxu0 %vm2407_vm13, %v3314_v49  ;;  %v3317_v37 = vsel %vm2355_vm14, %v3285_v39, %v3200_v47  ;;  %v6275_v49 = vld [vmem:[#allocation12_spill] sm:$0xff] }
 0x3a6   :  { %4097 = vmatprep.mubr.msk.f32.mxu0 %vm2407_vm13, %v3315_v62 }
 0x3a7   :  { %v3198_v1 = vpop.permute.xlu1 %3197 }
 0x3a8   :  { %v3316_v34 = vsel %vm2355_vm14, %v3284_v35, %v3198_v1  ;;  %v3076_v28 = vpop.permute.xlu0 %3075 }
 0x3a9   :  { %4098 = vmatmul.mubr.msk.f32.gmra.mrb[24].mxu0 %vm2407_vm13, %v3316_v34  ;;  %v3287_v7 = vsel %vm2322_vm15, %v2902_v6, %v3076_v28 }
 0x3aa   :  { %4100 = vmatprep.mubr.msk.f32.mxu0 %vm2407_vm13, %v3317_v37 }
 0x3ab   :  { %v3078_v3 = vpop.permute.xlu1 %3077 }
 0x3ac   :  { %v3204_v4 = vpop.permute.xlu0 %3203  ;;  %v3288_v31 = vsel %vm2322_vm15, %v5645_v56, %v3078_v3  ;;  %v6276_v3 = vld [vmem:[#allocation9_spill] sm:$0xff] }
 0x3ad   :  { %v3319_v21 = vsel %vm2355_vm14, %v3287_v7, %v3204_v4 }
 0x3af   :  { %v3082_v46 = vpop.permute.xlu1 %3081 }
 0x3b0   :  { %v3080_v0 = vpop.permute.xlu0 %3079  ;;  %v3290_v56 = vsel %vm2322_vm15, %v5657_v54, %v3082_v46  ;;  %v6277_v46 = vld [vmem:[#allocation11_spill] sm:$0xff] }
 0x3b1   :  { %v3289_v20 = vsel %vm2322_vm15, %v5662_v26, %v3080_v0  ;;  %v2906_v26 = vsel %vm6270_vm6, %v5677_v24, 0.0  ;;  %vm6296_vm6 = vmmov %vm6294_vm0 }
 0x3b3   :  { %v3202_v27 = vpop.permute.xlu1 %3201 }
 0x3b4   :  { %v3318_v60 = vsel %vm2355_vm14, %v3286_v33, %v3202_v27  ;;  %v3208_v30 = vpop.permute.xlu0 %3207  ;;  %v2914_v33 = vsel %vm6279_vm8, %v6277_v46, 0.0  ;;  %vm6298_vm8 = vmmov %vm6294_vm0 }
 0x3b5   :  { %4101 = vmatmul.mubr.msk.f32.gmra.mrb[26].mxu0 %vm2407_vm13, %v3318_v60  ;;  %v3321_v5 = vsel %vm2355_vm14, %v3289_v20, %v3208_v30 }
 0x3b6   :  { %4103 = vmatprep.mubr.msk.f32.mxu0 %vm2407_vm13, %v3319_v21 }
 0x3b7   :  { %v3206_v42 = vpop.permute.xlu1 %3205 }
 0x3b8   :  { %v3320_v36 = vsel %vm2355_vm14, %v3288_v31, %v3206_v42  ;;  %v3084_v61 = vpop.permute.xlu0 %3083 }
 0x3b9   :  { %4104 = vmatmul.mubr.msk.f32.gmra.mrb[28].mxu0 %vm2407_vm13, %v3320_v36  ;;  %v3291_v44 = vsel %vm2322_vm15, %v2906_v26, %v3084_v61 }
 0x3ba   :  { %4106 = vmatprep.mubr.msk.f32.mxu0 %vm2407_vm13, %v3321_v5 }
 0x3bb   :  { %v3086_v16 = vpop.permute.xlu1 %3085 }
 0x3bc   :  { %v3212_v48 = vpop.permute.xlu0 %3211  ;;  %v3292_v18 = vsel %vm2322_vm15, %v5691_v51, %v3086_v16 }
 0x3bd   :  { %v3323_v29 = vsel %vm2355_vm14, %v3291_v44, %v3212_v48 }
 0x3bf   :  { %v3090_v22 = vpop.permute.xlu1 %3089 }
 0x3c0   :  { %v3088_v19 = vpop.permute.xlu0 %3087  ;;  %v3294_v51 = vsel %vm2322_vm15, %v5703_v17, %v3090_v22 }
 0x3c1   :  { %v3293_v9 = vsel %vm2322_vm15, %v5708_v38, %v3088_v19  ;;  %v2910_v38 = vsel %vm6273_vm7, %v6271_v13, 0.0  ;;  %v6280_v19 = vld [vmem:[#allocation14_spill] sm:$0xff]  ;;  %vm6297_vm7 = vmmov %vm6294_vm0 }
 0x3c3   :  { %v3210_v43 = vpop.permute.xlu1 %3209 }
 0x3c4   :  { %v3322_v12 = vsel %vm2355_vm14, %v3290_v56, %v3210_v43  ;;  %v3216_v50 = vpop.permute.xlu0 %3215  ;;  %v6281_v56 = vld [vmem:[#allocation13_spill] sm:$0xff] }
 0x3c5   :  { %4107 = vmatmul.mubr.msk.f32.gmra.mrb[30].mxu0 %vm2407_vm13, %v3322_v12  ;;  %v3325_v10 = vsel %vm2355_vm14, %v3293_v9, %v3216_v50 }
 0x3c6   :  { %4109 = vmatprep.mubr.msk.f32.mxu0 %vm2407_vm13, %v3323_v29 }
 0x3c7   :  { %v3214_v54 = vpop.permute.xlu1 %3213 }
 0x3c8   :  { %v3324_v24 = vsel %vm2355_vm14, %v3292_v18, %v3214_v54  ;;  %v3092_v2 = vpop.permute.xlu0 %3091 }
 0x3c9   :  { %4110 = vmatmul.mubr.msk.f32.gmra.mrb[32].mxu0 %vm2407_vm13, %v3324_v24  ;;  %v3295_v11 = vsel %vm2322_vm15, %v2910_v38, %v3092_v2 }
 0x3ca   :  { %4112 = vmatprep.mubr.msk.f32.mxu0 %vm2407_vm13, %v3325_v10 }
 0x3cb   :  { %v3094_v41 = vpop.permute.xlu1 %3093 }
 0x3cc   :  { %v3220_v52 = vpop.permute.xlu0 %3219  ;;  %v3296_v53 = vsel %vm2322_vm15, %v6274_v57, %v3094_v41 }
 0x3cd   :  { %v3327_v23 = vsel %vm2355_vm14, %v3295_v11, %v3220_v52 }
 0x3cf   :  { %v3098_v25 = vpop.permute.xlu1 %3097 }
 0x3d0   :  { %v3096_v14 = vpop.permute.xlu0 %3095  ;;  %v3298_v4 = vsel %vm2322_vm15, %v6276_v3, %v3098_v25 }
 0x3d1   :  { %v3297_v47 = vsel %vm2322_vm15, %v6275_v49, %v3096_v14 }
 0x3d3   :  { %v3218_v59 = vpop.permute.xlu1 %3217 }
 0x3d4   :  { %v3326_v63 = vsel %vm2355_vm14, %v3294_v51, %v3218_v59  ;;  %v3224_v58 = vpop.permute.xlu0 %3223 }
 0x3d5   :  { %4113 = vmatmul.mubr.msk.f32.gmra.mrb[34].mxu0 %vm2407_vm13, %v3326_v63  ;;  %v3329_v1 = vsel %vm2355_vm14, %v3297_v47, %v3224_v58 }
 0x3d6   :  { %4115 = vmatprep.mubr.msk.f32.mxu0 %vm2407_vm13, %v3327_v23 }
 0x3d7   :  { %v3222_v17 = vpop.permute.xlu1 %3221 }
 0x3d8   :  { %v3328_v62 = vsel %vm2355_vm14, %v3296_v53, %v3222_v17  ;;  %v3100_v35 = vpop.permute.xlu0 %3099 }
 0x3d9   :  { %4116 = vmatmul.mubr.msk.f32.gmra.mrb[36].mxu0 %vm2407_vm13, %v3328_v62  ;;  %v3299_v27 = vsel %vm2322_vm15, %v2914_v33, %v3100_v35 }
 0x3da   :  { %4118 = vmatprep.mubr.msk.f32.mxu0 %vm2407_vm13, %v3329_v1 }
 0x3db   :  { %v3102_v39 = vpop.permute.xlu1 %3101 }
 0x3dc   :  { %v3228_v34 = vpop.permute.xlu0 %3227  ;;  %v3300_v21 = vsel %vm2322_vm15, %v5789_v55, %v3102_v39 }
 0x3dd   :  { %v3331_v30 = vsel %vm2355_vm14, %v3299_v27, %v3228_v34 }
 0x3df   :  { %v3106_v28 = vpop.permute.xlu1 %3105 }
 0x3e0   :  { %v3104_v37 = vpop.permute.xlu0 %3103  ;;  %v3302_v55 = vsel %vm2322_vm15, %v6280_v19, %v3106_v28 }
 0x3e1   :  { %v3301_v42 = vsel %vm2322_vm15, %v5799_v15, %v3104_v37  ;;  %v2918_v15 = vsel %vm535_vm5, %v6281_v56, 0.0  ;;  %vm6289_vm5 = vmmov %vm6288_vm2 }
 0x3e3   :  { %v3226_v6 = vpop.permute.xlu1 %3225 }
 0x3e4   :  { %v3330_v7 = vsel %vm2355_vm14, %v3298_v4, %v3226_v6  ;;  %v3232_v60 = vpop.permute.xlu0 %3231 }
 0x3e5   :  { %4119 = vmatmul.mubr.msk.f32.gmra.mrb[38].mxu0 %vm2407_vm13, %v3330_v7  ;;  %v3333_v61 = vsel %vm2355_vm14, %v3301_v42, %v3232_v60 }
 0x3e6   :  { %4121 = vmatprep.mubr.msk.f32.mxu0 %vm2407_vm13, %v3331_v30 }
 0x3e7   :  { %v3230_v31 = vpop.permute.xlu1 %3229 }
 0x3e8   :  { %v3332_v20 = vsel %vm2355_vm14, %v3300_v21, %v3230_v31  ;;  %v3108_v36 = vpop.permute.xlu0 %3107 }
 0x3e9   :  { %4122 = vmatmul.mubr.msk.f32.gmra.mrb[40].mxu0 %vm2407_vm13, %v3332_v20  ;;  %v3303_v44 = vsel %vm2322_vm15, %v2918_v15, %v3108_v36 }
 0x3ea   :  { %4124 = vmatprep.mubr.msk.f32.mxu0 %vm2407_vm13, %v3333_v61 }
 0x3eb   :  { %v3110_v5 = vpop.permute.xlu1 %3109 }
 0x3ec   :  { %v3236_v16 = vpop.permute.xlu0 %3235  ;;  %v3304_v18 = vsel %vm2322_vm15, %v5811_v40, %v3110_v5  ;;  %v6019_v40 = vld [vmem:[%s6187_s6] ss:$0 sm:$0xff] }
 0x3ed   :  { %v3335_v50 = vsel %vm2355_vm14, %v3303_v44, %v3236_v16 }
 0x3ef   :  { %v3114_v48 = vpop.permute.xlu1 %3113 }
 0x3f0   :  { %v3112_v22 = vpop.permute.xlu0 %3111  ;;  %v3306_v10 = vsel %vm2322_vm15, %v5829_v45, %v3114_v48 }
 0x3f1   :  { %v3305_v9 = vsel %vm2322_vm15, %v5832_v8, %v3112_v22  ;;  %vm6291_vm15 = vmmov %vm6288_vm2 }
 0x3f3   :  { %v3234_v43 = vpop.permute.xlu1 %3233 }
 0x3f4   :  { %v3334_v12 = vsel %vm2355_vm14, %v3302_v55, %v3234_v43  ;;  %v3240_v29 = vpop.permute.xlu0 %3239 }
 0x3f5   :  { %4125 = vmatmul.mubr.msk.f32.gmra.mrb[42].mxu0 %vm2407_vm13, %v3334_v12  ;;  %v3337_v2 = vsel %vm2355_vm14, %v3305_v9, %v3240_v29 }
 0x3f6   :  { %4127 = vmatprep.mubr.msk.f32.mxu0 %vm2407_vm13, %v3335_v50 }
 0x3f7   :  { %v3238_v54 = vpop.permute.xlu1 %3237 }
 0x3f8   :  { %v3336_v24 = vsel %vm2355_vm14, %v3304_v18, %v3238_v54 }
 0x3f9   :  { %4128 = vmatmul.mubr.msk.f32.gmra.mrb[44].mxu0 %vm2407_vm13, %v3336_v24 }
 0x3fa   :  { %4130 = vmatprep.mubr.msk.f32.mxu0 %vm2407_vm13, %v3337_v2 }
 0x3fb   :  { %v3242_v41 = vpop.permute.xlu1 %3241 }
 0x3fc   :  { %v3338_v52 = vsel %vm2355_vm14, %v3306_v10, %v3242_v41  ;;  %vm6290_vm14 = vmmov %vm6288_vm2 }
 0x3fd   :  { %4131 = vmatmul.mubr.msk.f32.gmra.mrb[46].mxu0 %vm2407_vm13, %v3338_v52  ;;  %vm6287_vm13 = vmmov %vm6283_vm9 }
 0x450   :  { %v4087_v8 = vpop.f32.mrb[16].mxu0 }
 0x451   :  { %v3526_v25 = vadd.f32 %v4087_v8, %v6019_v40  ;;  %v3520_v14 = vpop.f32.mrb[17].mxu0 }
 0x452   :  { %v3521_v51 = vadd.f32 %v6019_v40, %v3520_v14 }
 0x453   :  { %3680 = vst.msk [vmem:[%s6188_s7 + $0x8] sm:$0xff] %vm6283_vm9, %v3526_v25  ;;  %vm6299_vm9 = vmmov %vm6294_vm0 }
 0x454   :  { %3679 = vst.msk [vmem:[%s6188_s7] sm:$0xff] %vm6284_vm10, %v3521_v51  ;;  %vm6300_vm10 = vmmov %vm6294_vm0 }
 0x468   :  { %v4090_v45 = vpop.f32.mrb[18].mxu0 }
 0x469   :  { %v3536_v13 = vadd.f32 %v4090_v45, %v6019_v40  ;;  %v3530_v32 = vpop.f32.mrb[19].mxu0 }
 0x46a   :  { %v3531_v38 = vadd.f32 %v6019_v40, %v3530_v32 }
 0x46b   :  { %3682 = vst.msk [vmem:[%s6188_s7 + $0x18] sm:$0xff] %vm6285_vm11, %v3536_v13  ;;  %vm6301_vm11 = vmmov %vm6294_vm0 }
 0x46c   :  { %3681 = vst.msk [vmem:[%s6188_s7 + $0x10] sm:$0xff] %vm6286_vm12, %v3531_v38  ;;  %v4093_v59 = vpop.f32.mrb[20].mxu0  ;;  %vm6302_vm12 = vmmov %vm6294_vm0 }
 0x46d   :  { %v3546_v11 = vadd.f32 %v4093_v59, %v6019_v40  ;;  %v3540_v63 = vpop.f32.mrb[21].mxu0 }
 0x46e   :  { %v3541_v58 = vadd.f32 %v6019_v40, %v3540_v63 }
 0x46f   :  { %3684 = vst.msk [vmem:[%s6188_s7 + $0x28] sm:$0xff] %vm6287_vm13, %v3546_v11  ;;  %vm6303_vm13 = vmmov %vm6294_vm0 }
 0x470   :  { %3683 = vst.msk [vmem:[%s6188_s7 + $0x20] sm:$0xff] %vm6288_vm2, %v3541_v58  ;;  %vm6304_vm2 = vmmov %vm6294_vm0 }
 0x478   :  { %v4096_v23 = vpop.f32.mrb[22].mxu0 }
 0x479   :  { %v3556_v57 = vadd.f32 %v4096_v23, %v6019_v40  ;;  %v3550_v53 = vpop.f32.mrb[23].mxu0 }
 0x47a   :  { %v3551_v17 = vadd.f32 %v6019_v40, %v3550_v53 }
 0x47b   :  { %3686 = vst.msk [vmem:[%s6188_s7 + $0x38] sm:$0xff] %vm6289_vm5, %v3556_v57  ;;  %vm6305_vm5 = vmmov %vm6294_vm0 }
 0x47c   :  { %3685 = vst.msk [vmem:[%s6188_s7 + $0x30] sm:$0xff] %vm6290_vm14, %v3551_v17  ;;  %v4099_v49 = vpop.f32.mrb[24].mxu0  ;;  %vm6306_vm14 = vmmov %vm6294_vm0 }
 0x47d   :  { %v3566_v47 = vadd.f32 %v4099_v49, %v6019_v40  ;;  %v3560_v62 = vpop.f32.mrb[25].mxu0 }
 0x47e   :  { %v3561_v35 = vadd.f32 %v6019_v40, %v3560_v62 }
 0x47f   :  { %3688 = vst.msk [vmem:[%s6188_s7 + $0x48] sm:$0xff] %vm6291_vm15, %v3566_v47  ;;  %vm6307_vm15 = vmmov %vm6294_vm0 }
 0x480   :  { %3687 = vst.msk [vmem:[%s6188_s7 + $0x40] sm:$0xff] %vm6292_vm4, %v3561_v35  ;;  %vm6308_vm4 = vmmov %vm6294_vm0 }
 0x488   :  { %v4102_v1 = vpop.f32.mrb[26].mxu0 }
 0x489   :  { %v3576_v39 = vadd.f32 %v4102_v1, %v6019_v40  ;;  %v3570_v34 = vpop.f32.mrb[27].mxu0 }
 0x48a   :  { %v3571_v28 = vadd.f32 %v6019_v40, %v3570_v34 }
 0x48b   :  { %3690 = vst.msk [vmem:[%s6188_s7 + $0x58] sm:$0xff] %vm6293_vm1, %v3576_v39  ;;  %vm6309_vm1 = vmmov %vm6294_vm0 }
 0x48c   :  { %3689 = vst.msk [vmem:[%s6188_s7 + $0x50] sm:$0xff] %vm6294_vm0, %v3571_v28  ;;  %v4105_v37 = vpop.f32.mrb[28].mxu0 }
 0x48d   :  { %v3586_v3 = vadd.f32 %v4105_v37, %v6019_v40  ;;  %v3580_v4 = vpop.f32.mrb[29].mxu0 }
 0x48e   :  { %v3581_v46 = vadd.f32 %v6019_v40, %v3580_v4 }
 0x48f   :  { %3692 = vst.msk [vmem:[%s6188_s7 + $0x68] sm:$0xff] %vm6295_vm3, %v3586_v3  ;;  %vm6310_vm3 = vmmov %vm6294_vm0 }
 0x490   :  { %3691 = vst.msk [vmem:[%s6188_s7 + $0x60] sm:$0xff] %vm6296_vm6, %v3581_v46  ;;  %vm6311_vm6 = vmmov %vm6294_vm0 }
 0x498   :  { %v4108_v0 = vpop.f32.mrb[30].mxu0 }
 0x499   :  { %v3596_v33 = vadd.f32 %v4108_v0, %v6019_v40  ;;  %v3590_v6 = vpop.f32.mrb[31].mxu0 }
 0x49a   :  { %v3591_v27 = vadd.f32 %v6019_v40, %v3590_v6 }
 0x49b   :  { %3694 = vst.msk [vmem:[%s6188_s7 + $0x78] sm:$0xff] %vm6297_vm7, %v3596_v33  ;;  %vm6312_vm7 = vmmov %vm6294_vm0 }
 0x49c   :  { %3693 = vst.msk [vmem:[%s6188_s7 + $0x70] sm:$0xff] %vm6298_vm8, %v3591_v27  ;;  %v4111_v7 = vpop.f32.mrb[32].mxu0  ;;  %vm6313_vm8 = vmmov %vm6294_vm0 }
 0x49d   :  { %v3606_v60 = vadd.f32 %v4111_v7, %v6019_v40  ;;  %v3600_v30 = vpop.f32.mrb[33].mxu0 }
 0x49e   :  { %v3601_v21 = vadd.f32 %v6019_v40, %v3600_v30 }
 0x49f   :  { %3696 = vst.msk [vmem:[%s6188_s7 + $0x88] sm:$0xff] %vm6299_vm9, %v3606_v60 }
 0x4a0   :  { %3695 = vst.msk [vmem:[%s6188_s7 + $0x80] sm:$0xff] %vm6300_vm10, %v3601_v21 }
 0x4a8   :  { %v4114_v31 = vpop.f32.mrb[34].mxu0 }
 0x4a9   :  { %v3616_v42 = vadd.f32 %v4114_v31, %v6019_v40  ;;  %v3610_v20 = vpop.f32.mrb[35].mxu0 }
 0x4aa   :  { %v3611_v36 = vadd.f32 %v6019_v40, %v3610_v20 }
 0x4ab   :  { %3698 = vst.msk [vmem:[%s6188_s7 + $0x98] sm:$0xff] %vm6301_vm11, %v3616_v42 }
 0x4ac   :  { %3697 = vst.msk [vmem:[%s6188_s7 + $0x90] sm:$0xff] %vm6302_vm12, %v3611_v36  ;;  %v4117_v61 = vpop.f32.mrb[36].mxu0 }
 0x4ad   :  { %v3626_v5 = vadd.f32 %v4117_v61, %v6019_v40  ;;  %v3620_v16 = vpop.f32.mrb[37].mxu0 }
 0x4ae   :  { %v3621_v48 = vadd.f32 %v6019_v40, %v3620_v16 }
 0x4af   :  { %3700 = vst.msk [vmem:[%s6188_s7 + $0xa8] sm:$0xff] %vm6303_vm13, %v3626_v5 }
 0x4b0   :  { %3699 = vst.msk [vmem:[%s6188_s7 + $0xa0] sm:$0xff] %vm6304_vm2, %v3621_v48 }
 0x4b8   :  { %v4120_v22 = vpop.f32.mrb[38].mxu0 }
 0x4b9   :  { %v3636_v19 = vadd.f32 %v4120_v22, %v6019_v40  ;;  %v3630_v55 = vpop.f32.mrb[39].mxu0 }
 0x4ba   :  { %v3631_v56 = vadd.f32 %v6019_v40, %v3630_v55 }
 0x4bb   :  { %3702 = vst.msk [vmem:[%s6188_s7 + $0xb8] sm:$0xff] %vm6305_vm5, %v3636_v19 }
 0x4bc   :  { %3701 = vst.msk [vmem:[%s6188_s7 + $0xb0] sm:$0xff] %vm6306_vm14, %v3631_v56  ;;  %v4123_v26 = vpop.f32.mrb[40].mxu0 }
 0x4bd   :  { %v3646_v15 = vadd.f32 %v4123_v26, %v6019_v40  ;;  %v3640_v43 = vpop.f32.mrb[41].mxu0 }
 0x4be   :  { %v3641_v44 = vadd.f32 %v6019_v40, %v3640_v43 }
 0x4bf   :  { %3704 = vst.msk [vmem:[%s6188_s7 + $0xc8] sm:$0xff] %vm6307_vm15, %v3646_v15 }
 0x4c0   :  { %3703 = vst.msk [vmem:[%s6188_s7 + $0xc0] sm:$0xff] %vm6308_vm4, %v3641_v44 }
 0x4c8   :  { %v4126_v12 = vpop.f32.mrb[42].mxu0 }
 0x4c9   :  { %v3656_v50 = vadd.f32 %v4126_v12, %v6019_v40  ;;  %v3650_v29 = vpop.f32.mrb[43].mxu0 }
 0x4ca   :  { %v3651_v18 = vadd.f32 %v6019_v40, %v3650_v29 }
 0x4cb   :  { %3706 = vst.msk [vmem:[%s6188_s7 + $0xd8] sm:$0xff] %vm6309_vm1, %v3656_v50 }
 0x4cc   :  { %3705 = vst.msk [vmem:[%s6188_s7 + $0xd0] sm:$0xff] %vm6294_vm0, %v3651_v18  ;;  %v4129_v54 = vpop.f32.mrb[44].mxu0 }
 0x4cd   :  { %v3666_v9 = vadd.f32 %v4129_v54, %v6019_v40  ;;  %v3660_v24 = vpop.f32.mrb[45].mxu0 }
 0x4ce   :  { %v3661_v2 = vadd.f32 %v6019_v40, %v3660_v24 }
 0x4cf   :  { %3708 = vst.msk [vmem:[%s6188_s7 + $0xe8] sm:$0xff] %vm6310_vm3, %v3666_v9 }
 0x4d0   :  { %3707 = vst.msk [vmem:[%s6188_s7 + $0xe0] sm:$0xff] %vm6311_vm6, %v3661_v2  ;;  %v4132_v10 = vpop.f32.mrb[46].mxu0 }
 0x4d1   :  { %v3676_v41 = vadd.f32 %v4132_v10, %v6019_v40  ;;  %v3670_v52 = vpop.f32.mrb[47].mxu0 }
 0x4d2   :  { %v3671_v8 = vadd.f32 %v6019_v40, %v3670_v52 }
 0x4d3   :  { %3710 = vst.msk [vmem:[%s6188_s7 + $0xf8] sm:$0xff] %vm6312_vm7, %v3676_v41 }
 0x4d4   :  { %3709 = vst.msk [vmem:[%s6188_s7 + $0xf0] sm:$0xff] %vm6313_vm8, %v3671_v8 }

</bundles_post_ra>
